<compile_context>
chip_gen: v7x
topology: tpu7x:2x2x1
jax: 0.10.0
libtpu: 0.0.40
codegen_flags: <defaults>
</compile_context>

<pallas_src>
import functools

import jax
import jax.numpy as jnp
import numpy as np
from jax.experimental import pallas as pl
from jax.experimental.pallas import tpu as pltpu

_MARGIN = 3              # >= max dilation used by the network
_DIM = 8                 # hidden channel count of SM_uint
_DILS = (1, 1, 2, 3, 1)  # dilations of E, conv1, conv2, conv3, G


def _round_up(v, m):
    return ((v + m - 1) // m) * m


@functools.lru_cache(maxsize=None)
def _probe_roll_mode(n_lanes, test_shift):
    """Pin down pltpu.roll's shift convention with a one-off probe kernel.

    Returns:
      "np"  : pltpu.roll(x, s, axis) == np.roll(x, s, axis)
      "neg" : pltpu.roll(x, s, axis) == np.roll(x, -s, axis)
      "jnp" : pltpu.roll unusable here -> use jnp.roll (slower, always correct)
    """
    def k(x_ref, o_ref):
        o_ref[...] = pltpu.roll(x_ref[...], test_shift, axis=1)

    x = jnp.arange(8 * n_lanes, dtype=jnp.float32).reshape(8, n_lanes)
    try:
        out = np.asarray(pl.pallas_call(
            k, out_shape=jax.ShapeDtypeStruct((8, n_lanes), jnp.float32))(x))
    except Exception:
        return "jnp"
    xn = np.asarray(x)
    if np.array_equal(out, np.roll(xn, test_shift, axis=1)):
        return "np"
    if np.array_equal(out, np.roll(xn, -test_shift, axis=1)):
        return "neg"
    return "jnp"


def _sm_uint_kernel(x_ref, mask_ref, w_ref, b_ref, o_ref, *,
                    LB, Wp, mm_dtype, roll_mode):
    """Fused SM_uint forward; activations are lane-dense (8, LB) f32 tiles."""

    def gather(a, off):
        # g[:, q] = a[:, q + off] for every in-image lane q.  The 3-pixel zero
        # margin keeps q+off inside [0, LB) for those lanes, so the circular
        # wrap of the roll only pollutes margin lanes, which are masked to
        # zero (intermediate layers) or sliced away (final output).
        if off == 0:
            return a
        if roll_mode == "np":      # pltpu.roll(x, s) == np.roll(x, s)
            return pltpu.roll(a, (-off) % LB, axis=1)
        if roll_mode == "neg":     # pltpu.roll(x, s) == np.roll(x, -s)
            return pltpu.roll(a, off % LB, axis=1)
        return jnp.roll(a, -off, axis=1)          # portable fallback

    def conv3x3(a, layer):
        # 3x3 dilated conv as 9 tap-wise (8,8)x(8,LB) MXU dots accumulated in
        # f32 — no (72, LB) im2col buffer, no zero-flank concatenates.
        d = _DILS[layer]
        acc = None
        t = 0
        for ky in (-1, 0, 1):
            for kx in (-1, 0, 1):
                tap = gather(a, ky * d * Wp + kx * d).astype(mm_dtype)
                w_t = w_ref[layer * 9 + t].astype(mm_dtype)          # (8, 8)
                term = jnp.dot(w_t, tap, preferred_element_type=jnp.float32)
                acc = term if acc is None else acc + term
                t += 1
        return acc + b_ref[layer]                    # (8, 1) bias, lane-broadcast

    mask = jnp.broadcast_to(mask_ref[...], (_DIM, LB))   # hoisted once
    a = x_ref[0]                                         # (8, LB); only channel 0 nonzero

    a = jnp.maximum(conv3x3(a, 0), 0.0) * mask                    # E
    a = (jnp.maximum(conv3x3(a, 1), 0.0) + a) * mask              # conv1 + residual
    a = (jnp.maximum(conv3x3(a, 2), 0.0) + a) * mask              # conv2 (dilation 2)
    a = (jnp.maximum(conv3x3(a, 3), 0.0) + a) * mask              # conv3 (dilation 3)
    g = jnp.maximum(conv3x3(a, 4), 0.0)                           # G (Cout padded to 8)
    o_ref[0] = g[0:1, :].astype(o_ref.dtype)


def _pack_params(p):
    """Pack the 5 conv layers into one (45, 8, 8) weight + one (5, 8, 1) bias array.

    weights[l*9 + t] is the (Cout, Cin) matrix of layer l, tap t (= ky*3 + kx),
    zero-padded to (8, 8): E pads its single input channel, G its single output
    channel; the padded rows/cols only ever touch zero activations or produce
    channels that are discarded, so the math is unchanged.
    """
    names = ("E", "c1", "c2", "c3", "G")
    w_all = np.zeros((5 * 9, _DIM, _DIM), np.float32)
    b_all = np.zeros((5, _DIM, 1), np.float32)
    for l, name in enumerate(names):
        w = np.asarray(p[f"{name}_w"], np.float32)      # (3, 3, Cin, Cout) HWIO
        b = np.asarray(p[f"{name}_b"], np.float32)      # (Cout,)
        kh, kw, cin, cout = w.shape
        wt = np.transpose(w, (0, 1, 3, 2)).reshape(kh * kw, cout, cin)
        w_all[l * 9:(l + 1) * 9, :cout, :cin] = wt
        b_all[l, :cout, 0] = b
    return jnp.asarray(w_all), jnp.asarray(b_all)


def sm_uint_forward(x_nchw, params, *, batch_block=1, matmul_dtype=jnp.float32):
    """Fused Pallas implementation of SM_uint.forward.  x_nchw: (N, 1, H, W).

    batch_block  : batch elements folded into the lane axis of one grid step
                   (1 -> grid=(N,) parallel steps, keeps both v7x TCs busy;
                    N -> one fat step, amortizes per-step overhead on v5e/v6e).
    matmul_dtype : dtype of the MXU dot operands (accumulation stays f32).
    """
    N, C, H, W = x_nchw.shape
    assert C == 1, "SM_uint takes a 1-channel input"
    Hp = _round_up(H + 2 * _MARGIN, 8)
    # Lane-friendly width; for very wide images round to 128 so +-d*Wp row taps
    # become vreg-aligned (not worth the padding at W=16).
    Wp = _round_up(W + 2 * _MARGIN, 128 if W >= 100 else 32)
    L = Hp * Wp                                   # multiple of 256 -> lane aligned
    num_steps = -(-N // batch_block)
    Ntot = num_steps * batch_block
    LB = batch_block * L                          # lanes per grid step

    # Zero-embed the 1-channel input into the (Hp, Wp) grid (3-pixel margin ==
    # conv zero padding), fold batch_block elements per grid step into the lane
    # axis, and add 7 zero channels so every layer is a uniform Cin=8 conv.
    xg = jnp.pad(x_nchw[:, 0].astype(jnp.float32),
                 ((0, Ntot - N),
                  (_MARGIN, Hp - H - _MARGIN),
                  (_MARGIN, Wp - W - _MARGIN)))
    x8 = jnp.concatenate(
        [xg.reshape(num_steps, 1, LB),
         jnp.zeros((num_steps, _DIM - 1, LB), jnp.float32)], axis=1)

    # {0,1} interior mask: re-zeroes the margin after every layer (emulating the
    # zero padding each conv needs for the next layer's taps).
    rows = jnp.arange(Hp)
    cols = jnp.arange(Wp)
    m2d = (((rows >= _MARGIN) & (rows < _MARGIN + H))[:, None] &
           ((cols >= _MARGIN) & (cols < _MARGIN + W))[None, :]).astype(jnp.float32)
    mask = jnp.tile(m2d.reshape(1, L), (1, batch_block))          # (1, LB)

    w_all, b_all = _pack_params(params)

    # Determine pltpu.roll's shift convention once per lane width (static,
    # baked into the kernel trace).
    test_shift = (LB - (3 * Wp + 3)) % LB
    if test_shift in (0, LB // 2):
        test_shift = max(1, test_shift - 1)
    roll_mode = _probe_roll_mode(LB, test_shift)

    kernel = functools.partial(_sm_uint_kernel, LB=LB, Wp=Wp,
                               mm_dtype=matmul_dtype, roll_mode=roll_mode)

    out_flat = pl.pallas_call(
        kernel,
        out_shape=jax.ShapeDtypeStruct((num_steps, 1, LB), jnp.float32),
        grid=(num_steps,),
        in_specs=[
            pl.BlockSpec((1, _DIM, LB), lambda g: (g, 0, 0)),      # input (lane-dense)
            pl.BlockSpec((1, LB), lambda g: (0, 0)),               # interior mask
            pl.BlockSpec((45, _DIM, _DIM), lambda g: (0, 0, 0)),   # packed weights
            pl.BlockSpec((5, _DIM, 1), lambda g: (0, 0, 0)),       # packed biases
        ],
        out_specs=pl.BlockSpec((1, 1, LB), lambda g: (g, 0, 0)),   # lane-dense output
        compiler_params=pltpu.CompilerParams(
            dimension_semantics=("parallel",),
            vmem_limit_bytes=32 * 1024 * 1024),
    )(x8, mask, w_all, b_all)

    out = out_flat.reshape(Ntot, Hp, Wp)[:N, _MARGIN:_MARGIN + H, _MARGIN:_MARGIN + W]
    return out[:, None, :, :]                                      # (N, 1, H, W)


def init_params(key, dim=_DIM):
    """Deterministic init matching the PyTorch layer shapes (HWIO weights)."""
    params = {}
    layer_defs = {
        "E":  (1,   dim),
        "c1": (dim, dim),
        "c2": (dim, dim),
        "c3": (dim, dim),
        "G":  (dim, 1),
    }
    for name, (cin, cout) in layer_defs.items():
        key, kw, kb = jax.random.split(key, 3)
        bound = 1.0 / np.sqrt(cin * 9)          # PyTorch default conv init range
        params[f"{name}_w"] = jax.random.uniform(
            kw, (3, 3, cin, cout), jnp.float32, minval=-bound, maxval=bound)
        params[f"{name}_b"] = jax.random.uniform(
            kb, (cout,), jnp.float32, minval=-bound, maxval=bound)
    return params


# ---- plain-JAX reference (for the correctness check) -----------------------
def _conv_ref(x, w, b, d):
    y = jax.lax.conv_general_dilated(
        x, w, window_strides=(1, 1), padding=[(d, d), (d, d)],
        rhs_dilation=(d, d), dimension_numbers=("NHWC", "HWIO", "NHWC"))
    return y + b.reshape(1, 1, 1, -1)


def sm_uint_ref(x_nchw, p):
    x = jnp.transpose(x_nchw, (0, 2, 3, 1))
    out = jax.nn.relu(_conv_ref(x,   p["E_w"],  p["E_b"],  1))
    out = jax.nn.relu(_conv_ref(out, p["c1_w"], p["c1_b"], 1)) + out
    out = jax.nn.relu(_conv_ref(out, p["c2_w"], p["c2_b"], 2)) + out
    out = jax.nn.relu(_conv_ref(out, p["c3_w"], p["c3_b"], 3)) + out
    out = jax.nn.relu(_conv_ref(out, p["G_w"],  p["G_b"],  1))
    return jnp.transpose(out, (0, 3, 1, 2))


if __name__ == "__main__":
    key = jax.random.PRNGKey(0)
    k_x, k_p = jax.random.split(key)

    N, C, H, W = 2, 1, 16, 16                      # module takes 1-channel input
    x = jax.random.normal(k_x, (N, C, H, W), jnp.float32)
    params = init_params(k_p, dim=_DIM)

    ref = jax.block_until_ready(sm_uint_ref(x, params))

    # f32 operands, one batch element per parallel grid step (v7x: both TCs busy).
    out = jax.block_until_ready(sm_uint_forward(x, params, batch_block=1))
    assert out.shape == (N, 1, H, W), out.shape
    np.testing.assert_allclose(np.asarray(out), np.asarray(ref),
                               rtol=1e-4, atol=1e-4)

    # Batch folded into the lane axis: one fat grid step (v5e/v6e single-TC path).
    out_folded = jax.block_until_ready(sm_uint_forward(x, params, batch_block=2))
    np.testing.assert_allclose(np.asarray(out_folded), np.asarray(ref),
                               rtol=1e-4, atol=1e-4)

    # bf16 MXU operands with f32 accumulation (v6e/v7x path); relaxed tolerance.
    out_bf16 = jax.block_until_ready(
        sm_uint_forward(x, params, batch_block=1, matmul_dtype=jnp.bfloat16))
    np.testing.assert_allclose(np.asarray(out_bf16), np.asarray(ref),
                               rtol=5e-2, atol=5e-2)

    print("KERNEL_OK")
</pallas_src>

<mosaic_0001>
module attributes {stable_mosaic.version = 11 : i64} {
  func.func @k(%arg0: memref<8x768xf32, #tpu.memory_space<vmem>>, %arg1: memref<8x768xf32, #tpu.memory_space<vmem>>) attributes {dimension_semantics = [], scalar_prefetch = 0 : i64, scratch_operands = 0 : i64, tpu.core_type = #tpu.core_type<tc>} {
    %c0 = arith.constant 0 : index
    %c0_0 = arith.constant 0 : index
    %0 = vector.load %arg0[%c0, %c0_0] : memref<8x768xf32, #tpu.memory_space<vmem>>, vector<8x768xf32>
    %c669_i32 = arith.constant 669 : i32
    %1 = tpu.dynamic_rotate %0 by %c669_i32 dim 1 : vector<8x768xf32>, i32 -> vector<8x768xf32>
    %c0_1 = arith.constant 0 : index
    %c0_2 = arith.constant 0 : index
    %2 = vector.load %arg1[%c0_1, %c0_2] : memref<8x768xf32, #tpu.memory_space<vmem>>, vector<8x768xf32>
    tpu.vector_store %arg1[%c0_1, %c0_2], %1 {strides = array<i32>} : memref<8x768xf32, #tpu.memory_space<vmem>>, vector<8x768xf32>,
    return
  }
}

module attributes {stable_mosaic.version = 11 : i64} {
  func.func @_sm_uint_kernel(%arg0: i32, %arg1: memref<1x8x768xf32, #tpu.memory_space<vmem>>, %arg2: memref<1x768xf32, #tpu.memory_space<vmem>>, %arg3: memref<45x8x8xf32, #tpu.memory_space<vmem>>, %arg4: memref<5x8x1xf32, #tpu.memory_space<vmem>>, %arg5: memref<1x1x768xf32, #tpu.memory_space<vmem>>) attributes {dimension_semantics = [#tpu.dimension_semantics<parallel>], iteration_bounds = array<i64: 2>, scalar_prefetch = 0 : i64, scratch_operands = 0 : i64, tpu.core_type = #tpu.core_type<tc>, window_params = [{transform_indices = @transform_0, window_bounds = array<i64: 1, 8, 768>}, {pipeline_mode = #tpu.pipeline_mode<synchronous>, transform_indices = @transform_1, window_bounds = array<i64: 1, 768>}, {pipeline_mode = #tpu.pipeline_mode<synchronous>, transform_indices = @transform_2, window_bounds = array<i64: 45, 8, 8>}, {pipeline_mode = #tpu.pipeline_mode<synchronous>, transform_indices = @transform_3, window_bounds = array<i64: 5, 8, 1>}, {transform_indices = @transform_4, window_bounds = array<i64: 1, 1, 768>}]} {
    %c0 = arith.constant 0 : index
    %c0_0 = arith.constant 0 : index
    %0 = vector.load %arg2[%c0, %c0_0] : memref<1x768xf32, #tpu.memory_space<vmem>>, vector<1x768xf32>
    %1 = vector.shape_cast %0 : vector<1x768xf32> to vector<1x768xf32>
    %2 = vector.broadcast %1 : vector<1x768xf32> to vector<8x768xf32>
    %c0_1 = arith.constant 0 : index
    %c0_2 = arith.constant 0 : index
    %c0_3 = arith.constant 0 : index
    %3 = vector.load %arg1[%c0_1, %c0_2, %c0_3] : memref<1x8x768xf32, #tpu.memory_space<vmem>>, vector<1x8x768xf32>
    %4 = vector.shape_cast %3 : vector<1x8x768xf32> to vector<8x768xf32>
    %5 = vector.extract_strided_slice %4 {offsets = [0, 735], sizes = [8, 33], strides = [1, 1]} : vector<8x768xf32> to vector<8x33xf32>
    %6 = vector.extract_strided_slice %4 {offsets = [0, 0], sizes = [8, 735], strides = [1, 1]} : vector<8x768xf32> to vector<8x735xf32>
    %7 = tpu.concatenate %5, %6 in 1 : vector<8x33xf32>, vector<8x735xf32> -> vector<8x768xf32>
    %c0_4 = arith.constant 0 : index
    %c0_5 = arith.constant 0 : index
    %c0_6 = arith.constant 0 : index
    %8 = vector.load %arg3[%c0_4, %c0_5, %c0_6] : memref<45x8x8xf32, #tpu.memory_space<vmem>>, vector<1x8x8xf32>
    %9 = vector.shape_cast %8 : vector<1x8x8xf32> to vector<8x8xf32>
    %cst = arith.constant dense<0.000000e+00> : vector<8x768xf32>
    %10 = tpu.matmul %9, %7, %cst {dimension_numbers = #tpu.dot_dimension_numbers<[1], [0], [0], [1], [0, 0, 1, 1], [], []>} : vector<8x8xf32>, vector<8x768xf32>, vector<8x768xf32> -> vector<8x768xf32>
    %11 = vector.extract_strided_slice %4 {offsets = [0, 736], sizes = [8, 32], strides = [1, 1]} : vector<8x768xf32> to vector<8x32xf32>
    %12 = vector.extract_strided_slice %4 {offsets = [0, 0], sizes = [8, 736], strides = [1, 1]} : vector<8x768xf32> to vector<8x736xf32>
    %13 = tpu.concatenate %11, %12 in 1 : vector<8x32xf32>, vector<8x736xf32> -> vector<8x768xf32>
    %c1 = arith.constant 1 : index
    %c0_7 = arith.constant 0 : index
    %c0_8 = arith.constant 0 : index
    %14 = vector.load %arg3[%c1, %c0_7, %c0_8] : memref<45x8x8xf32, #tpu.memory_space<vmem>>, vector<1x8x8xf32>
    %15 = vector.shape_cast %14 : vector<1x8x8xf32> to vector<8x8xf32>
    %cst_9 = arith.constant dense<0.000000e+00> : vector<8x768xf32>
    %16 = tpu.matmul %15, %13, %cst_9 {dimension_numbers = #tpu.dot_dimension_numbers<[1], [0], [0], [1], [0, 0, 1, 1], [], []>} : vector<8x8xf32>, vector<8x768xf32>, vector<8x768xf32> -> vector<8x768xf32>
    %17 = arith.addf %10, %16 : vector<8x768xf32>
    %18 = vector.extract_strided_slice %4 {offsets = [0, 737], sizes = [8, 31], strides = [1, 1]} : vector<8x768xf32> to vector<8x31xf32>
    %19 = vector.extract_strided_slice %4 {offsets = [0, 0], sizes = [8, 737], strides = [1, 1]} : vector<8x768xf32> to vector<8x737xf32>
    %20 = tpu.concatenate %18, %19 in 1 : vector<8x31xf32>, vector<8x737xf32> -> vector<8x768xf32>
    %c2 = arith.constant 2 : index
    %c0_10 = arith.constant 0 : index
    %c0_11 = arith.constant 0 : index
    %21 = vector.load %arg3[%c2, %c0_10, %c0_11] : memref<45x8x8xf32, #tpu.memory_space<vmem>>, vector<1x8x8xf32>
    %22 = vector.shape_cast %21 : vector<1x8x8xf32> to vector<8x8xf32>
    %cst_12 = arith.constant dense<0.000000e+00> : vector<8x768xf32>
    %23 = tpu.matmul %22, %20, %cst_12 {dimension_numbers = #tpu.dot_dimension_numbers<[1], [0], [0], [1], [0, 0, 1, 1], [], []>} : vector<8x8xf32>, vector<8x768xf32>, vector<8x768xf32> -> vector<8x768xf32>
    %24 = arith.addf %17, %23 : vector<8x768xf32>
    %25 = vector.extract_strided_slice %4 {offsets = [0, 767], sizes = [8, 1], strides = [1, 1]} : vector<8x768xf32> to vector<8x1xf32>
    %26 = vector.extract_strided_slice %4 {offsets = [0, 0], sizes = [8, 767], strides = [1, 1]} : vector<8x768xf32> to vector<8x767xf32>
    %27 = tpu.concatenate %25, %26 in 1 : vector<8x1xf32>, vector<8x767xf32> -> vector<8x768xf32>
    %c3 = arith.constant 3 : index
    %c0_13 = arith.constant 0 : index
    %c0_14 = arith.constant 0 : index
    %28 = vector.load %arg3[%c3, %c0_13, %c0_14] : memref<45x8x8xf32, #tpu.memory_space<vmem>>, vector<1x8x8xf32>
    %29 = vector.shape_cast %28 : vector<1x8x8xf32> to vector<8x8xf32>
    %cst_15 = arith.constant dense<0.000000e+00> : vector<8x768xf32>
    %30 = tpu.matmul %29, %27, %cst_15 {dimension_numbers = #tpu.dot_dimension_numbers<[1], [0], [0], [1], [0, 0, 1, 1], [], []>} : vector<8x8xf32>, vector<8x768xf32>, vector<8x768xf32> -> vector<8x768xf32>
    %31 = arith.addf %24, %30 : vector<8x768xf32>
    %c4 = arith.constant 4 : index
    %c0_16 = arith.constant 0 : index
    %c0_17 = arith.constant 0 : index
    %32 = vector.load %arg3[%c4, %c0_16, %c0_17] : memref<45x8x8xf32, #tpu.memory_space<vmem>>, vector<1x8x8xf32>
    %33 = vector.shape_cast %32 : vector<1x8x8xf32> to vector<8x8xf32>
    %cst_18 = arith.constant dense<0.000000e+00> : vector<8x768xf32>
    %34 = tpu.matmul %33, %4, %cst_18 {dimension_numbers = #tpu.dot_dimension_numbers<[1], [0], [0], [1], [0, 0, 1, 1], [], []>} : vector<8x8xf32>, vector<8x768xf32>, vector<8x768xf32> -> vector<8x768xf32>
    %35 = arith.addf %31, %34 : vector<8x768xf32>
    %36 = vector.extract_strided_slice %4 {offsets = [0, 1], sizes = [8, 767], strides = [1, 1]} : vector<8x768xf32> to vector<8x767xf32>
    %37 = vector.extract_strided_slice %4 {offsets = [0, 0], sizes = [8, 1], strides = [1, 1]} : vector<8x768xf32> to vector<8x1xf32>
    %38 = tpu.concatenate %36, %37 in 1 : vector<8x767xf32>, vector<8x1xf32> -> vector<8x768xf32>
    %c5 = arith.constant 5 : index
    %c0_19 = arith.constant 0 : index
    %c0_20 = arith.constant 0 : index
    %39 = vector.load %arg3[%c5, %c0_19, %c0_20] : memref<45x8x8xf32, #tpu.memory_space<vmem>>, vector<1x8x8xf32>
    %40 = vector.shape_cast %39 : vector<1x8x8xf32> to vector<8x8xf32>
    %cst_21 = arith.constant dense<0.000000e+00> : vector<8x768xf32>
    %41 = tpu.matmul %40, %38, %cst_21 {dimension_numbers = #tpu.dot_dimension_numbers<[1], [0], [0], [1], [0, 0, 1, 1], [], []>} : vector<8x8xf32>, vector<8x768xf32>, vector<8x768xf32> -> vector<8x768xf32>
    %42 = arith.addf %35, %41 : vector<8x768xf32>
    %43 = vector.extract_strided_slice %4 {offsets = [0, 31], sizes = [8, 737], strides = [1, 1]} : vector<8x768xf32> to vector<8x737xf32>
    %44 = vector.extract_strided_slice %4 {offsets = [0, 0], sizes = [8, 31], strides = [1, 1]} : vector<8x768xf32> to vector<8x31xf32>
    %45 = tpu.concatenate %43, %44 in 1 : vector<8x737xf32>, vector<8x31xf32> -> vector<8x768xf32>
    %c6 = arith.constant 6 : index
    %c0_22 = arith.constant 0 : index
    %c0_23 = arith.constant 0 : index
    %46 = vector.load %arg3[%c6, %c0_22, %c0_23] : memref<45x8x8xf32, #tpu.memory_space<vmem>>, vector<1x8x8xf32>
    %47 = vector.shape_cast %46 : vector<1x8x8xf32> to vector<8x8xf32>
    %cst_24 = arith.constant dense<0.000000e+00> : vector<8x768xf32>
    %48 = tpu.matmul %47, %45, %cst_24 {dimension_numbers = #tpu.dot_dimension_numbers<[1], [0], [0], [1], [0, 0, 1, 1], [], []>} : vector<8x8xf32>, vector<8x768xf32>, vector<8x768xf32> -> vector<8x768xf32>
    %49 = arith.addf %42, %48 : vector<8x768xf32>
    %50 = vector.extract_strided_slice %4 {offsets = [0, 32], sizes = [8, 736], strides = [1, 1]} : vector<8x768xf32> to vector<8x736xf32>
    %51 = vector.extract_strided_slice %4 {offsets = [0, 0], sizes = [8, 32], strides = [1, 1]} : vector<8x768xf32> to vector<8x32xf32>
    %52 = tpu.concatenate %50, %51 in 1 : vector<8x736xf32>, vector<8x32xf32> -> vector<8x768xf32>
    %c7 = arith.constant 7 : index
    %c0_25 = arith.constant 0 : index
    %c0_26 = arith.constant 0 : index
    %53 = vector.load %arg3[%c7, %c0_25, %c0_26] : memref<45x8x8xf32, #tpu.memory_space<vmem>>, vector<1x8x8xf32>
    %54 = vector.shape_cast %53 : vector<1x8x8xf32> to vector<8x8xf32>
    %cst_27 = arith.constant dense<0.000000e+00> : vector<8x768xf32>
    %55 = tpu.matmul %54, %52, %cst_27 {dimension_numbers = #tpu.dot_dimension_numbers<[1], [0], [0], [1], [0, 0, 1, 1], [], []>} : vector<8x8xf32>, vector<8x768xf32>, vector<8x768xf32> -> vector<8x768xf32>
    %56 = arith.addf %49, %55 : vector<8x768xf32>
    %57 = vector.extract_strided_slice %4 {offsets = [0, 33], sizes = [8, 735], strides = [1, 1]} : vector<8x768xf32> to vector<8x735xf32>
    %58 = vector.extract_strided_slice %4 {offsets = [0, 0], sizes = [8, 33], strides = [1, 1]} : vector<8x768xf32> to vector<8x33xf32>
    %59 = tpu.concatenate %57, %58 in 1 : vector<8x735xf32>, vector<8x33xf32> -> vector<8x768xf32>
    %c8 = arith.constant 8 : index
    %c0_28 = arith.constant 0 : index
    %c0_29 = arith.constant 0 : index
    %60 = vector.load %arg3[%c8, %c0_28, %c0_29] : memref<45x8x8xf32, #tpu.memory_space<vmem>>, vector<1x8x8xf32>
    %61 = vector.shape_cast %60 : vector<1x8x8xf32> to vector<8x8xf32>
    %cst_30 = arith.constant dense<0.000000e+00> : vector<8x768xf32>
    %62 = tpu.matmul %61, %59, %cst_30 {dimension_numbers = #tpu.dot_dimension_numbers<[1], [0], [0], [1], [0, 0, 1, 1], [], []>} : vector<8x8xf32>, vector<8x768xf32>, vector<8x768xf32> -> vector<8x768xf32>
    %63 = arith.addf %56, %62 : vector<8x768xf32>
    %c0_31 = arith.constant 0 : index
    %c0_32 = arith.constant 0 : index
    %c0_33 = arith.constant 0 : index
    %64 = vector.load %arg4[%c0_31, %c0_32, %c0_33] : memref<5x8x1xf32, #tpu.memory_space<vmem>>, vector<1x8x1xf32>
    %65 = vector.shape_cast %64 : vector<1x8x1xf32> to vector<8x1xf32>
    %66 = vector.broadcast %65 : vector<8x1xf32> to vector<8x768xf32>
    %67 = arith.addf %63, %66 : vector<8x768xf32>
    %cst_34 = arith.constant 0.000000e+00 : f32
    %68 = vector.broadcast %cst_34 : f32 to vector<8x768xf32>
    %69 = arith.maximumf %67, %68 : vector<8x768xf32>
    %70 = arith.mulf %69, %2 : vector<8x768xf32>
    %71 = vector.extract_strided_slice %70 {offsets = [0, 735], sizes = [8, 33], strides = [1, 1]} : vector<8x768xf32> to vector<8x33xf32>
    %72 = vector.extract_strided_slice %70 {offsets = [0, 0], sizes = [8, 735], strides = [1, 1]} : vector<8x768xf32> to vector<8x735xf32>
    %73 = tpu.concatenate %71, %72 in 1 : vector<8x33xf32>, vector<8x735xf32> -> vector<8x768xf32>
    %c9 = arith.constant 9 : index
    %c0_35 = arith.constant 0 : index
    %c0_36 = arith.constant 0 : index
    %74 = vector.load %arg3[%c9, %c0_35, %c0_36] : memref<45x8x8xf32, #tpu.memory_space<vmem>>, vector<1x8x8xf32>
    %75 = vector.shape_cast %74 : vector<1x8x8xf32> to vector<8x8xf32>
    %cst_37 = arith.constant dense<0.000000e+00> : vector<8x768xf32>
    %76 = tpu.matmul %75, %73, %cst_37 {dimension_numbers = #tpu.dot_dimension_numbers<[1], [0], [0], [1], [0, 0, 1, 1], [], []>} : vector<8x8xf32>, vector<8x768xf32>, vector<8x768xf32> -> vector<8x768xf32>
    %77 = vector.extract_strided_slice %70 {offsets = [0, 736], sizes = [8, 32], strides = [1, 1]} : vector<8x768xf32> to vector<8x32xf32>
    %78 = vector.extract_strided_slice %70 {offsets = [0, 0], sizes = [8, 736], strides = [1, 1]} : vector<8x768xf32> to vector<8x736xf32>
    %79 = tpu.concatenate %77, %78 in 1 : vector<8x32xf32>, vector<8x736xf32> -> vector<8x768xf32>
    %c10 = arith.constant 10 : index
    %c0_38 = arith.constant 0 : index
    %c0_39 = arith.constant 0 : index
    %80 = vector.load %arg3[%c10, %c0_38, %c0_39] : memref<45x8x8xf32, #tpu.memory_space<vmem>>, vector<1x8x8xf32>
    %81 = vector.shape_cast %80 : vector<1x8x8xf32> to vector<8x8xf32>
    %cst_40 = arith.constant dense<0.000000e+00> : vector<8x768xf32>
    %82 = tpu.matmul %81, %79, %cst_40 {dimension_numbers = #tpu.dot_dimension_numbers<[1], [0], [0], [1], [0, 0, 1, 1], [], []>} : vector<8x8xf32>, vector<8x768xf32>, vector<8x768xf32> -> vector<8x768xf32>
    %83 = arith.addf %76, %82 : vector<8x768xf32>
    %84 = vector.extract_strided_slice %70 {offsets = [0, 737], sizes = [8, 31], strides = [1, 1]} : vector<8x768xf32> to vector<8x31xf32>
    %85 = vector.extract_strided_slice %70 {offsets = [0, 0], sizes = [8, 737], strides = [1, 1]} : vector<8x768xf32> to vector<8x737xf32>
    %86 = tpu.concatenate %84, %85 in 1 : vector<8x31xf32>, vector<8x737xf32> -> vector<8x768xf32>
    %c11 = arith.constant 11 : index
    %c0_41 = arith.constant 0 : index
    %c0_42 = arith.constant 0 : index
    %87 = vector.load %arg3[%c11, %c0_41, %c0_42] : memref<45x8x8xf32, #tpu.memory_space<vmem>>, vector<1x8x8xf32>
    %88 = vector.shape_cast %87 : vector<1x8x8xf32> to vector<8x8xf32>
    %cst_43 = arith.constant dense<0.000000e+00> : vector<8x768xf32>
    %89 = tpu.matmul %88, %86, %cst_43 {dimension_numbers = #tpu.dot_dimension_numbers<[1], [0], [0], [1], [0, 0, 1, 1], [], []>} : vector<8x8xf32>, vector<8x768xf32>, vector<8x768xf32> -> vector<8x768xf32>
    %90 = arith.addf %83, %89 : vector<8x768xf32>
    %91 = vector.extract_strided_slice %70 {offsets = [0, 767], sizes = [8, 1], strides = [1, 1]} : vector<8x768xf32> to vector<8x1xf32>
    %92 = vector.extract_strided_slice %70 {offsets = [0, 0], sizes = [8, 767], strides = [1, 1]} : vector<8x768xf32> to vector<8x767xf32>
    %93 = tpu.concatenate %91, %92 in 1 : vector<8x1xf32>, vector<8x767xf32> -> vector<8x768xf32>
    %c12 = arith.constant 12 : index
    %c0_44 = arith.constant 0 : index
    %c0_45 = arith.constant 0 : index
    %94 = vector.load %arg3[%c12, %c0_44, %c0_45] : memref<45x8x8xf32, #tpu.memory_space<vmem>>, vector<1x8x8xf32>
    %95 = vector.shape_cast %94 : vector<1x8x8xf32> to vector<8x8xf32>
    %cst_46 = arith.constant dense<0.000000e+00> : vector<8x768xf32>
    %96 = tpu.matmul %95, %93, %cst_46 {dimension_numbers = #tpu.dot_dimension_numbers<[1], [0], [0], [1], [0, 0, 1, 1], [], []>} : vector<8x8xf32>, vector<8x768xf32>, vector<8x768xf32> -> vector<8x768xf32>
    %97 = arith.addf %90, %96 : vector<8x768xf32>
    %c13 = arith.constant 13 : index
    %c0_47 = arith.constant 0 : index
    %c0_48 = arith.constant 0 : index
    %98 = vector.load %arg3[%c13, %c0_47, %c0_48] : memref<45x8x8xf32, #tpu.memory_space<vmem>>, vector<1x8x8xf32>
    %99 = vector.shape_cast %98 : vector<1x8x8xf32> to vector<8x8xf32>
    %cst_49 = arith.constant dense<0.000000e+00> : vector<8x768xf32>
    %100 = tpu.matmul %99, %70, %cst_49 {dimension_numbers = #tpu.dot_dimension_numbers<[1], [0], [0], [1], [0, 0, 1, 1], [], []>} : vector<8x8xf32>, vector<8x768xf32>, vector<8x768xf32> -> vector<8x768xf32>
    %101 = arith.addf %97, %100 : vector<8x768xf32>
    %102 = vector.extract_strided_slice %70 {offsets = [0, 1], sizes = [8, 767], strides = [1, 1]} : vector<8x768xf32> to vector<8x767xf32>
    %103 = vector.extract_strided_slice %70 {offsets = [0, 0], sizes = [8, 1], strides = [1, 1]} : vector<8x768xf32> to vector<8x1xf32>
    %104 = tpu.concatenate %102, %103 in 1 : vector<8x767xf32>, vector<8x1xf32> -> vector<8x768xf32>
    %c14 = arith.constant 14 : index
    %c0_50 = arith.constant 0 : index
    %c0_51 = arith.constant 0 : index
    %105 = vector.load %arg3[%c14, %c0_50, %c0_51] : memref<45x8x8xf32, #tpu.memory_space<vmem>>, vector<1x8x8xf32>
    %106 = vector.shape_cast %105 : vector<1x8x8xf32> to vector<8x8xf32>
    %cst_52 = arith.constant dense<0.000000e+00> : vector<8x768xf32>
    %107 = tpu.matmul %106, %104, %cst_52 {dimension_numbers = #tpu.dot_dimension_numbers<[1], [0], [0], [1], [0, 0, 1, 1], [], []>} : vector<8x8xf32>, vector<8x768xf32>, vector<8x768xf32> -> vector<8x768xf32>
    %108 = arith.addf %101, %107 : vector<8x768xf32>
    %109 = vector.extract_strided_slice %70 {offsets = [0, 31], sizes = [8, 737], strides = [1, 1]} : vector<8x768xf32> to vector<8x737xf32>
    %110 = vector.extract_strided_slice %70 {offsets = [0, 0], sizes = [8, 31], strides = [1, 1]} : vector<8x768xf32> to vector<8x31xf32>
    %111 = tpu.concatenate %109, %110 in 1 : vector<8x737xf32>, vector<8x31xf32> -> vector<8x768xf32>
    %c15 = arith.constant 15 : index
    %c0_53 = arith.constant 0 : index
    %c0_54 = arith.constant 0 : index
    %112 = vector.load %arg3[%c15, %c0_53, %c0_54] : memref<45x8x8xf32, #tpu.memory_space<vmem>>, vector<1x8x8xf32>
    %113 = vector.shape_cast %112 : vector<1x8x8xf32> to vector<8x8xf32>
    %cst_55 = arith.constant dense<0.000000e+00> : vector<8x768xf32>
    %114 = tpu.matmul %113, %111, %cst_55 {dimension_numbers = #tpu.dot_dimension_numbers<[1], [0], [0], [1], [0, 0, 1, 1], [], []>} : vector<8x8xf32>, vector<8x768xf32>, vector<8x768xf32> -> vector<8x768xf32>
    %115 = arith.addf %108, %114 : vector<8x768xf32>
    %116 = vector.extract_strided_slice %70 {offsets = [0, 32], sizes = [8, 736], strides = [1, 1]} : vector<8x768xf32> to vector<8x736xf32>
    %117 = vector.extract_strided_slice %70 {offsets = [0, 0], sizes = [8, 32], strides = [1, 1]} : vector<8x768xf32> to vector<8x32xf32>
    %118 = tpu.concatenate %116, %117 in 1 : vector<8x736xf32>, vector<8x32xf32> -> vector<8x768xf32>
    %c16 = arith.constant 16 : index
    %c0_56 = arith.constant 0 : index
    %c0_57 = arith.constant 0 : index
    %119 = vector.load %arg3[%c16, %c0_56, %c0_57] : memref<45x8x8xf32, #tpu.memory_space<vmem>>, vector<1x8x8xf32>
    %120 = vector.shape_cast %119 : vector<1x8x8xf32> to vector<8x8xf32>
    %cst_58 = arith.constant dense<0.000000e+00> : vector<8x768xf32>
    %121 = tpu.matmul %120, %118, %cst_58 {dimension_numbers = #tpu.dot_dimension_numbers<[1], [0], [0], [1], [0, 0, 1, 1], [], []>} : vector<8x8xf32>, vector<8x768xf32>, vector<8x768xf32> -> vector<8x768xf32>
    %122 = arith.addf %115, %121 : vector<8x768xf32>
    %123 = vector.extract_strided_slice %70 {offsets = [0, 33], sizes = [8, 735], strides = [1, 1]} : vector<8x768xf32> to vector<8x735xf32>
    %124 = vector.extract_strided_slice %70 {offsets = [0, 0], sizes = [8, 33], strides = [1, 1]} : vector<8x768xf32> to vector<8x33xf32>
    %125 = tpu.concatenate %123, %124 in 1 : vector<8x735xf32>, vector<8x33xf32> -> vector<8x768xf32>
    %c17 = arith.constant 17 : index
    %c0_59 = arith.constant 0 : index
    %c0_60 = arith.constant 0 : index
    %126 = vector.load %arg3[%c17, %c0_59, %c0_60] : memref<45x8x8xf32, #tpu.memory_space<vmem>>, vector<1x8x8xf32>
    %127 = vector.shape_cast %126 : vector<1x8x8xf32> to vector<8x8xf32>
    %cst_61 = arith.constant dense<0.000000e+00> : vector<8x768xf32>
    %128 = tpu.matmul %127, %125, %cst_61 {dimension_numbers = #tpu.dot_dimension_numbers<[1], [0], [0], [1], [0, 0, 1, 1], [], []>} : vector<8x8xf32>, vector<8x768xf32>, vector<8x768xf32> -> vector<8x768xf32>
    %129 = arith.addf %122, %128 : vector<8x768xf32>
    %c1_62 = arith.constant 1 : index
    %c0_63 = arith.constant 0 : index
    %c0_64 = arith.constant 0 : index
    %130 = vector.load %arg4[%c1_62, %c0_63, %c0_64] : memref<5x8x1xf32, #tpu.memory_space<vmem>>, vector<1x8x1xf32>
    %131 = vector.shape_cast %130 : vector<1x8x1xf32> to vector<8x1xf32>
    %132 = vector.broadcast %131 : vector<8x1xf32> to vector<8x768xf32>
    %133 = arith.addf %129, %132 : vector<8x768xf32>
    %cst_65 = arith.constant 0.000000e+00 : f32
    %134 = vector.broadcast %cst_65 : f32 to vector<8x768xf32>
    %135 = arith.maximumf %133, %134 : vector<8x768xf32>
    %136 = arith.addf %135, %70 : vector<8x768xf32>
    %137 = arith.mulf %136, %2 : vector<8x768xf32>
    %138 = vector.extract_strided_slice %137 {offsets = [0, 702], sizes = [8, 66], strides = [1, 1]} : vector<8x768xf32> to vector<8x66xf32>
    %139 = vector.extract_strided_slice %137 {offsets = [0, 0], sizes = [8, 702], strides = [1, 1]} : vector<8x768xf32> to vector<8x702xf32>
    %140 = tpu.concatenate %138, %139 in 1 : vector<8x66xf32>, vector<8x702xf32> -> vector<8x768xf32>
    %c18 = arith.constant 18 : index
    %c0_66 = arith.constant 0 : index
    %c0_67 = arith.constant 0 : index
    %141 = vector.load %arg3[%c18, %c0_66, %c0_67] : memref<45x8x8xf32, #tpu.memory_space<vmem>>, vector<1x8x8xf32>
    %142 = vector.shape_cast %141 : vector<1x8x8xf32> to vector<8x8xf32>
    %cst_68 = arith.constant dense<0.000000e+00> : vector<8x768xf32>
    %143 = tpu.matmul %142, %140, %cst_68 {dimension_numbers = #tpu.dot_dimension_numbers<[1], [0], [0], [1], [0, 0, 1, 1], [], []>} : vector<8x8xf32>, vector<8x768xf32>, vector<8x768xf32> -> vector<8x768xf32>
    %144 = vector.extract_strided_slice %137 {offsets = [0, 704], sizes = [8, 64], strides = [1, 1]} : vector<8x768xf32> to vector<8x64xf32>
    %145 = vector.extract_strided_slice %137 {offsets = [0, 0], sizes = [8, 704], strides = [1, 1]} : vector<8x768xf32> to vector<8x704xf32>
    %146 = tpu.concatenate %144, %145 in 1 : vector<8x64xf32>, vector<8x704xf32> -> vector<8x768xf32>
    %c19 = arith.constant 19 : index
    %c0_69 = arith.constant 0 : index
    %c0_70 = arith.constant 0 : index
    %147 = vector.load %arg3[%c19, %c0_69, %c0_70] : memref<45x8x8xf32, #tpu.memory_space<vmem>>, vector<1x8x8xf32>
    %148 = vector.shape_cast %147 : vector<1x8x8xf32> to vector<8x8xf32>
    %cst_71 = arith.constant dense<0.000000e+00> : vector<8x768xf32>
    %149 = tpu.matmul %148, %146, %cst_71 {dimension_numbers = #tpu.dot_dimension_numbers<[1], [0], [0], [1], [0, 0, 1, 1], [], []>} : vector<8x8xf32>, vector<8x768xf32>, vector<8x768xf32> -> vector<8x768xf32>
    %150 = arith.addf %143, %149 : vector<8x768xf32>
    %151 = vector.extract_strided_slice %137 {offsets = [0, 706], sizes = [8, 62], strides = [1, 1]} : vector<8x768xf32> to vector<8x62xf32>
    %152 = vector.extract_strided_slice %137 {offsets = [0, 0], sizes = [8, 706], strides = [1, 1]} : vector<8x768xf32> to vector<8x706xf32>
    %153 = tpu.concatenate %151, %152 in 1 : vector<8x62xf32>, vector<8x706xf32> -> vector<8x768xf32>
    %c20 = arith.constant 20 : index
    %c0_72 = arith.constant 0 : index
    %c0_73 = arith.constant 0 : index
    %154 = vector.load %arg3[%c20, %c0_72, %c0_73] : memref<45x8x8xf32, #tpu.memory_space<vmem>>, vector<1x8x8xf32>
    %155 = vector.shape_cast %154 : vector<1x8x8xf32> to vector<8x8xf32>
    %cst_74 = arith.constant dense<0.000000e+00> : vector<8x768xf32>
    %156 = tpu.matmul %155, %153, %cst_74 {dimension_numbers = #tpu.dot_dimension_numbers<[1], [0], [0], [1], [0, 0, 1, 1], [], []>} : vector<8x8xf32>, vector<8x768xf32>, vector<8x768xf32> -> vector<8x768xf32>
    %157 = arith.addf %150, %156 : vector<8x768xf32>
    %158 = vector.extract_strided_slice %137 {offsets = [0, 766], sizes = [8, 2], strides = [1, 1]} : vector<8x768xf32> to vector<8x2xf32>
    %159 = vector.extract_strided_slice %137 {offsets = [0, 0], sizes = [8, 766], strides = [1, 1]} : vector<8x768xf32> to vector<8x766xf32>
    %160 = tpu.concatenate %158, %159 in 1 : vector<8x2xf32>, vector<8x766xf32> -> vector<8x768xf32>
    %c21 = arith.constant 21 : index
    %c0_75 = arith.constant 0 : index
    %c0_76 = arith.constant 0 : index
    %161 = vector.load %arg3[%c21, %c0_75, %c0_76] : memref<45x8x8xf32, #tpu.memory_space<vmem>>, vector<1x8x8xf32>
    %162 = vector.shape_cast %161 : vector<1x8x8xf32> to vector<8x8xf32>
    %cst_77 = arith.constant dense<0.000000e+00> : vector<8x768xf32>
    %163 = tpu.matmul %162, %160, %cst_77 {dimension_numbers = #tpu.dot_dimension_numbers<[1], [0], [0], [1], [0, 0, 1, 1], [], []>} : vector<8x8xf32>, vector<8x768xf32>, vector<8x768xf32> -> vector<8x768xf32>
    %164 = arith.addf %157, %163 : vector<8x768xf32>
    %c22 = arith.constant 22 : index
    %c0_78 = arith.constant 0 : index
    %c0_79 = arith.constant 0 : index
    %165 = vector.load %arg3[%c22, %c0_78, %c0_79] : memref<45x8x8xf32, #tpu.memory_space<vmem>>, vector<1x8x8xf32>
    %166 = vector.shape_cast %165 : vector<1x8x8xf32> to vector<8x8xf32>
    %cst_80 = arith.constant dense<0.000000e+00> : vector<8x768xf32>
    %167 = tpu.matmul %166, %137, %cst_80 {dimension_numbers = #tpu.dot_dimension_numbers<[1], [0], [0], [1], [0, 0, 1, 1], [], []>} : vector<8x8xf32>, vector<8x768xf32>, vector<8x768xf32> -> vector<8x768xf32>
    %168 = arith.addf %164, %167 : vector<8x768xf32>
    %169 = vector.extract_strided_slice %137 {offsets = [0, 2], sizes = [8, 766], strides = [1, 1]} : vector<8x768xf32> to vector<8x766xf32>
    %170 = vector.extract_strided_slice %137 {offsets = [0, 0], sizes = [8, 2], strides = [1, 1]} : vector<8x768xf32> to vector<8x2xf32>
    %171 = tpu.concatenate %169, %170 in 1 : vector<8x766xf32>, vector<8x2xf32> -> vector<8x768xf32>
    %c23 = arith.constant 23 : index
    %c0_81 = arith.constant 0 : index
    %c0_82 = arith.constant 0 : index
    %172 = vector.load %arg3[%c23, %c0_81, %c0_82] : memref<45x8x8xf32, #tpu.memory_space<vmem>>, vector<1x8x8xf32>
    %173 = vector.shape_cast %172 : vector<1x8x8xf32> to vector<8x8xf32>
    %cst_83 = arith.constant dense<0.000000e+00> : vector<8x768xf32>
    %174 = tpu.matmul %173, %171, %cst_83 {dimension_numbers = #tpu.dot_dimension_numbers<[1], [0], [0], [1], [0, 0, 1, 1], [], []>} : vector<8x8xf32>, vector<8x768xf32>, vector<8x768xf32> -> vector<8x768xf32>
    %175 = arith.addf %168, %174 : vector<8x768xf32>
    %176 = vector.extract_strided_slice %137 {offsets = [0, 62], sizes = [8, 706], strides = [1, 1]} : vector<8x768xf32> to vector<8x706xf32>
    %177 = vector.extract_strided_slice %137 {offsets = [0, 0], sizes = [8, 62], strides = [1, 1]} : vector<8x768xf32> to vector<8x62xf32>
    %178 = tpu.concatenate %176, %177 in 1 : vector<8x706xf32>, vector<8x62xf32> -> vector<8x768xf32>
    %c24 = arith.constant 24 : index
    %c0_84 = arith.constant 0 : index
    %c0_85 = arith.constant 0 : index
    %179 = vector.load %arg3[%c24, %c0_84, %c0_85] : memref<45x8x8xf32, #tpu.memory_space<vmem>>, vector<1x8x8xf32>
    %180 = vector.shape_cast %179 : vector<1x8x8xf32> to vector<8x8xf32>
    %cst_86 = arith.constant dense<0.000000e+00> : vector<8x768xf32>
    %181 = tpu.matmul %180, %178, %cst_86 {dimension_numbers = #tpu.dot_dimension_numbers<[1], [0], [0], [1], [0, 0, 1, 1], [], []>} : vector<8x8xf32>, vector<8x768xf32>, vector<8x768xf32> -> vector<8x768xf32>
    %182 = arith.addf %175, %181 : vector<8x768xf32>
    %183 = vector.extract_strided_slice %137 {offsets = [0, 64], sizes = [8, 704], strides = [1, 1]} : vector<8x768xf32> to vector<8x704xf32>
    %184 = vector.extract_strided_slice %137 {offsets = [0, 0], sizes = [8, 64], strides = [1, 1]} : vector<8x768xf32> to vector<8x64xf32>
    %185 = tpu.concatenate %183, %184 in 1 : vector<8x704xf32>, vector<8x64xf32> -> vector<8x768xf32>
    %c25 = arith.constant 25 : index
    %c0_87 = arith.constant 0 : index
    %c0_88 = arith.constant 0 : index
    %186 = vector.load %arg3[%c25, %c0_87, %c0_88] : memref<45x8x8xf32, #tpu.memory_space<vmem>>, vector<1x8x8xf32>
    %187 = vector.shape_cast %186 : vector<1x8x8xf32> to vector<8x8xf32>
    %cst_89 = arith.constant dense<0.000000e+00> : vector<8x768xf32>
    %188 = tpu.matmul %187, %185, %cst_89 {dimension_numbers = #tpu.dot_dimension_numbers<[1], [0], [0], [1], [0, 0, 1, 1], [], []>} : vector<8x8xf32>, vector<8x768xf32>, vector<8x768xf32> -> vector<8x768xf32>
    %189 = arith.addf %182, %188 : vector<8x768xf32>
    %190 = vector.extract_strided_slice %137 {offsets = [0, 66], sizes = [8, 702], strides = [1, 1]} : vector<8x768xf32> to vector<8x702xf32>
    %191 = vector.extract_strided_slice %137 {offsets = [0, 0], sizes = [8, 66], strides = [1, 1]} : vector<8x768xf32> to vector<8x66xf32>
    %192 = tpu.concatenate %190, %191 in 1 : vector<8x702xf32>, vector<8x66xf32> -> vector<8x768xf32>
    %c26 = arith.constant 26 : index
    %c0_90 = arith.constant 0 : index
    %c0_91 = arith.constant 0 : index
    %193 = vector.load %arg3[%c26, %c0_90, %c0_91] : memref<45x8x8xf32, #tpu.memory_space<vmem>>, vector<1x8x8xf32>
    %194 = vector.shape_cast %193 : vector<1x8x8xf32> to vector<8x8xf32>
    %cst_92 = arith.constant dense<0.000000e+00> : vector<8x768xf32>
    %195 = tpu.matmul %194, %192, %cst_92 {dimension_numbers = #tpu.dot_dimension_numbers<[1], [0], [0], [1], [0, 0, 1, 1], [], []>} : vector<8x8xf32>, vector<8x768xf32>, vector<8x768xf32> -> vector<8x768xf32>
    %196 = arith.addf %189, %195 : vector<8x768xf32>
    %c2_93 = arith.constant 2 : index
    %c0_94 = arith.constant 0 : index
    %c0_95 = arith.constant 0 : index
    %197 = vector.load %arg4[%c2_93, %c0_94, %c0_95] : memref<5x8x1xf32, #tpu.memory_space<vmem>>, vector<1x8x1xf32>
    %198 = vector.shape_cast %197 : vector<1x8x1xf32> to vector<8x1xf32>
    %199 = vector.broadcast %198 : vector<8x1xf32> to vector<8x768xf32>
    %200 = arith.addf %196, %199 : vector<8x768xf32>
    %cst_96 = arith.constant 0.000000e+00 : f32
    %201 = vector.broadcast %cst_96 : f32 to vector<8x768xf32>
    %202 = arith.maximumf %200, %201 : vector<8x768xf32>
    %203 = arith.addf %202, %137 : vector<8x768xf32>
    %204 = arith.mulf %203, %2 : vector<8x768xf32>
    %205 = vector.extract_strided_slice %204 {offsets = [0, 669], sizes = [8, 99], strides = [1, 1]} : vector<8x768xf32> to vector<8x99xf32>
    %206 = vector.extract_strided_slice %204 {offsets = [0, 0], sizes = [8, 669], strides = [1, 1]} : vector<8x768xf32> to vector<8x669xf32>
    %207 = tpu.concatenate %205, %206 in 1 : vector<8x99xf32>, vector<8x669xf32> -> vector<8x768xf32>
    %c27 = arith.constant 27 : index
    %c0_97 = arith.constant 0 : index
    %c0_98 = arith.constant 0 : index
    %208 = vector.load %arg3[%c27, %c0_97, %c0_98] : memref<45x8x8xf32, #tpu.memory_space<vmem>>, vector<1x8x8xf32>
    %209 = vector.shape_cast %208 : vector<1x8x8xf32> to vector<8x8xf32>
    %cst_99 = arith.constant dense<0.000000e+00> : vector<8x768xf32>
    %210 = tpu.matmul %209, %207, %cst_99 {dimension_numbers = #tpu.dot_dimension_numbers<[1], [0], [0], [1], [0, 0, 1, 1], [], []>} : vector<8x8xf32>, vector<8x768xf32>, vector<8x768xf32> -> vector<8x768xf32>
    %211 = vector.extract_strided_slice %204 {offsets = [0, 672], sizes = [8, 96], strides = [1, 1]} : vector<8x768xf32> to vector<8x96xf32>
    %212 = vector.extract_strided_slice %204 {offsets = [0, 0], sizes = [8, 672], strides = [1, 1]} : vector<8x768xf32> to vector<8x672xf32>
    %213 = tpu.concatenate %211, %212 in 1 : vector<8x96xf32>, vector<8x672xf32> -> vector<8x768xf32>
    %c28 = arith.constant 28 : index
    %c0_100 = arith.constant 0 : index
    %c0_101 = arith.constant 0 : index
    %214 = vector.load %arg3[%c28, %c0_100, %c0_101] : memref<45x8x8xf32, #tpu.memory_space<vmem>>, vector<1x8x8xf32>
    %215 = vector.shape_cast %214 : vector<1x8x8xf32> to vector<8x8xf32>
    %cst_102 = arith.constant dense<0.000000e+00> : vector<8x768xf32>
    %216 = tpu.matmul %215, %213, %cst_102 {dimension_numbers = #tpu.dot_dimension_numbers<[1], [0], [0], [1], [0, 0, 1, 1], [], []>} : vector<8x8xf32>, vector<8x768xf32>, vector<8x768xf32> -> vector<8x768xf32>
    %217 = arith.addf %210, %216 : vector<8x768xf32>
    %218 = vector.extract_strided_slice %204 {offsets = [0, 675], sizes = [8, 93], strides = [1, 1]} : vector<8x768xf32> to vector<8x93xf32>
    %219 = vector.extract_strided_slice %204 {offsets = [0, 0], sizes = [8, 675], strides = [1, 1]} : vector<8x768xf32> to vector<8x675xf32>
    %220 = tpu.concatenate %218, %219 in 1 : vector<8x93xf32>, vector<8x675xf32> -> vector<8x768xf32>
    %c29 = arith.constant 29 : index
    %c0_103 = arith.constant 0 : index
    %c0_104 = arith.constant 0 : index
    %221 = vector.load %arg3[%c29, %c0_103, %c0_104] : memref<45x8x8xf32, #tpu.memory_space<vmem>>, vector<1x8x8xf32>
    %222 = vector.shape_cast %221 : vector<1x8x8xf32> to vector<8x8xf32>
    %cst_105 = arith.constant dense<0.000000e+00> : vector<8x768xf32>
    %223 = tpu.matmul %222, %220, %cst_105 {dimension_numbers = #tpu.dot_dimension_numbers<[1], [0], [0], [1], [0, 0, 1, 1], [], []>} : vector<8x8xf32>, vector<8x768xf32>, vector<8x768xf32> -> vector<8x768xf32>
    %224 = arith.addf %217, %223 : vector<8x768xf32>
    %225 = vector.extract_strided_slice %204 {offsets = [0, 765], sizes = [8, 3], strides = [1, 1]} : vector<8x768xf32> to vector<8x3xf32>
    %226 = vector.extract_strided_slice %204 {offsets = [0, 0], sizes = [8, 765], strides = [1, 1]} : vector<8x768xf32> to vector<8x765xf32>
    %227 = tpu.concatenate %225, %226 in 1 : vector<8x3xf32>, vector<8x765xf32> -> vector<8x768xf32>
    %c30 = arith.constant 30 : index
    %c0_106 = arith.constant 0 : index
    %c0_107 = arith.constant 0 : index
    %228 = vector.load %arg3[%c30, %c0_106, %c0_107] : memref<45x8x8xf32, #tpu.memory_space<vmem>>, vector<1x8x8xf32>
    %229 = vector.shape_cast %228 : vector<1x8x8xf32> to vector<8x8xf32>
    %cst_108 = arith.constant dense<0.000000e+00> : vector<8x768xf32>
    %230 = tpu.matmul %229, %227, %cst_108 {dimension_numbers = #tpu.dot_dimension_numbers<[1], [0], [0], [1], [0, 0, 1, 1], [], []>} : vector<8x8xf32>, vector<8x768xf32>, vector<8x768xf32> -> vector<8x768xf32>
    %231 = arith.addf %224, %230 : vector<8x768xf32>
    %c31 = arith.constant 31 : index
    %c0_109 = arith.constant 0 : index
    %c0_110 = arith.constant 0 : index
    %232 = vector.load %arg3[%c31, %c0_109, %c0_110] : memref<45x8x8xf32, #tpu.memory_space<vmem>>, vector<1x8x8xf32>
    %233 = vector.shape_cast %232 : vector<1x8x8xf32> to vector<8x8xf32>
    %cst_111 = arith.constant dense<0.000000e+00> : vector<8x768xf32>
    %234 = tpu.matmul %233, %204, %cst_111 {dimension_numbers = #tpu.dot_dimension_numbers<[1], [0], [0], [1], [0, 0, 1, 1], [], []>} : vector<8x8xf32>, vector<8x768xf32>, vector<8x768xf32> -> vector<8x768xf32>
    %235 = arith.addf %231, %234 : vector<8x768xf32>
    %236 = vector.extract_strided_slice %204 {offsets = [0, 3], sizes = [8, 765], strides = [1, 1]} : vector<8x768xf32> to vector<8x765xf32>
    %237 = vector.extract_strided_slice %204 {offsets = [0, 0], sizes = [8, 3], strides = [1, 1]} : vector<8x768xf32> to vector<8x3xf32>
    %238 = tpu.concatenate %236, %237 in 1 : vector<8x765xf32>, vector<8x3xf32> -> vector<8x768xf32>
    %c32 = arith.constant 32 : index
    %c0_112 = arith.constant 0 : index
    %c0_113 = arith.constant 0 : index
    %239 = vector.load %arg3[%c32, %c0_112, %c0_113] : memref<45x8x8xf32, #tpu.memory_space<vmem>>, vector<1x8x8xf32>
    %240 = vector.shape_cast %239 : vector<1x8x8xf32> to vector<8x8xf32>
    %cst_114 = arith.constant dense<0.000000e+00> : vector<8x768xf32>
    %241 = tpu.matmul %240, %238, %cst_114 {dimension_numbers = #tpu.dot_dimension_numbers<[1], [0], [0], [1], [0, 0, 1, 1], [], []>} : vector<8x8xf32>, vector<8x768xf32>, vector<8x768xf32> -> vector<8x768xf32>
    %242 = arith.addf %235, %241 : vector<8x768xf32>
    %243 = vector.extract_strided_slice %204 {offsets = [0, 93], sizes = [8, 675], strides = [1, 1]} : vector<8x768xf32> to vector<8x675xf32>
    %244 = vector.extract_strided_slice %204 {offsets = [0, 0], sizes = [8, 93], strides = [1, 1]} : vector<8x768xf32> to vector<8x93xf32>
    %245 = tpu.concatenate %243, %244 in 1 : vector<8x675xf32>, vector<8x93xf32> -> vector<8x768xf32>
    %c33 = arith.constant 33 : index
    %c0_115 = arith.constant 0 : index
    %c0_116 = arith.constant 0 : index
    %246 = vector.load %arg3[%c33, %c0_115, %c0_116] : memref<45x8x8xf32, #tpu.memory_space<vmem>>, vector<1x8x8xf32>
    %247 = vector.shape_cast %246 : vector<1x8x8xf32> to vector<8x8xf32>
    %cst_117 = arith.constant dense<0.000000e+00> : vector<8x768xf32>
    %248 = tpu.matmul %247, %245, %cst_117 {dimension_numbers = #tpu.dot_dimension_numbers<[1], [0], [0], [1], [0, 0, 1, 1], [], []>} : vector<8x8xf32>, vector<8x768xf32>, vector<8x768xf32> -> vector<8x768xf32>
    %249 = arith.addf %242, %248 : vector<8x768xf32>
    %250 = vector.extract_strided_slice %204 {offsets = [0, 96], sizes = [8, 672], strides = [1, 1]} : vector<8x768xf32> to vector<8x672xf32>
    %251 = vector.extract_strided_slice %204 {offsets = [0, 0], sizes = [8, 96], strides = [1, 1]} : vector<8x768xf32> to vector<8x96xf32>
    %252 = tpu.concatenate %250, %251 in 1 : vector<8x672xf32>, vector<8x96xf32> -> vector<8x768xf32>
    %c34 = arith.constant 34 : index
    %c0_118 = arith.constant 0 : index
    %c0_119 = arith.constant 0 : index
    %253 = vector.load %arg3[%c34, %c0_118, %c0_119] : memref<45x8x8xf32, #tpu.memory_space<vmem>>, vector<1x8x8xf32>
    %254 = vector.shape_cast %253 : vector<1x8x8xf32> to vector<8x8xf32>
    %cst_120 = arith.constant dense<0.000000e+00> : vector<8x768xf32>
    %255 = tpu.matmul %254, %252, %cst_120 {dimension_numbers = #tpu.dot_dimension_numbers<[1], [0], [0], [1], [0, 0, 1, 1], [], []>} : vector<8x8xf32>, vector<8x768xf32>, vector<8x768xf32> -> vector<8x768xf32>
    %256 = arith.addf %249, %255 : vector<8x768xf32>
    %257 = vector.extract_strided_slice %204 {offsets = [0, 99], sizes = [8, 669], strides = [1, 1]} : vector<8x768xf32> to vector<8x669xf32>
    %258 = vector.extract_strided_slice %204 {offsets = [0, 0], sizes = [8, 99], strides = [1, 1]} : vector<8x768xf32> to vector<8x99xf32>
    %259 = tpu.concatenate %257, %258 in 1 : vector<8x669xf32>, vector<8x99xf32> -> vector<8x768xf32>
    %c35 = arith.constant 35 : index
    %c0_121 = arith.constant 0 : index
    %c0_122 = arith.constant 0 : index
    %260 = vector.load %arg3[%c35, %c0_121, %c0_122] : memref<45x8x8xf32, #tpu.memory_space<vmem>>, vector<1x8x8xf32>
    %261 = vector.shape_cast %260 : vector<1x8x8xf32> to vector<8x8xf32>
    %cst_123 = arith.constant dense<0.000000e+00> : vector<8x768xf32>
    %262 = tpu.matmul %261, %259, %cst_123 {dimension_numbers = #tpu.dot_dimension_numbers<[1], [0], [0], [1], [0, 0, 1, 1], [], []>} : vector<8x8xf32>, vector<8x768xf32>, vector<8x768xf32> -> vector<8x768xf32>
    %263 = arith.addf %256, %262 : vector<8x768xf32>
    %c3_124 = arith.constant 3 : index
    %c0_125 = arith.constant 0 : index
    %c0_126 = arith.constant 0 : index
    %264 = vector.load %arg4[%c3_124, %c0_125, %c0_126] : memref<5x8x1xf32, #tpu.memory_space<vmem>>, vector<1x8x1xf32>
    %265 = vector.shape_cast %264 : vector<1x8x1xf32> to vector<8x1xf32>
    %266 = vector.broadcast %265 : vector<8x1xf32> to vector<8x768xf32>
    %267 = arith.addf %263, %266 : vector<8x768xf32>
    %cst_127 = arith.constant 0.000000e+00 : f32
    %268 = vector.broadcast %cst_127 : f32 to vector<8x768xf32>
    %269 = arith.maximumf %267, %268 : vector<8x768xf32>
    %270 = arith.addf %269, %204 : vector<8x768xf32>
    %271 = arith.mulf %270, %2 : vector<8x768xf32>
    %272 = vector.extract_strided_slice %271 {offsets = [0, 735], sizes = [8, 33], strides = [1, 1]} : vector<8x768xf32> to vector<8x33xf32>
    %273 = vector.extract_strided_slice %271 {offsets = [0, 0], sizes = [8, 735], strides = [1, 1]} : vector<8x768xf32> to vector<8x735xf32>
    %274 = tpu.concatenate %272, %273 in 1 : vector<8x33xf32>, vector<8x735xf32> -> vector<8x768xf32>
    %c36 = arith.constant 36 : index
    %c0_128 = arith.constant 0 : index
    %c0_129 = arith.constant 0 : index
    %275 = vector.load %arg3[%c36, %c0_128, %c0_129] : memref<45x8x8xf32, #tpu.memory_space<vmem>>, vector<1x8x8xf32>
    %276 = vector.shape_cast %275 : vector<1x8x8xf32> to vector<8x8xf32>
    %cst_130 = arith.constant dense<0.000000e+00> : vector<8x768xf32>
    %277 = tpu.matmul %276, %274, %cst_130 {dimension_numbers = #tpu.dot_dimension_numbers<[1], [0], [0], [1], [0, 0, 1, 1], [], []>} : vector<8x8xf32>, vector<8x768xf32>, vector<8x768xf32> -> vector<8x768xf32>
    %278 = vector.extract_strided_slice %271 {offsets = [0, 736], sizes = [8, 32], strides = [1, 1]} : vector<8x768xf32> to vector<8x32xf32>
    %279 = vector.extract_strided_slice %271 {offsets = [0, 0], sizes = [8, 736], strides = [1, 1]} : vector<8x768xf32> to vector<8x736xf32>
    %280 = tpu.concatenate %278, %279 in 1 : vector<8x32xf32>, vector<8x736xf32> -> vector<8x768xf32>
    %c37 = arith.constant 37 : index
    %c0_131 = arith.constant 0 : index
    %c0_132 = arith.constant 0 : index
    %281 = vector.load %arg3[%c37, %c0_131, %c0_132] : memref<45x8x8xf32, #tpu.memory_space<vmem>>, vector<1x8x8xf32>
    %282 = vector.shape_cast %281 : vector<1x8x8xf32> to vector<8x8xf32>
    %cst_133 = arith.constant dense<0.000000e+00> : vector<8x768xf32>
    %283 = tpu.matmul %282, %280, %cst_133 {dimension_numbers = #tpu.dot_dimension_numbers<[1], [0], [0], [1], [0, 0, 1, 1], [], []>} : vector<8x8xf32>, vector<8x768xf32>, vector<8x768xf32> -> vector<8x768xf32>
    %284 = arith.addf %277, %283 : vector<8x768xf32>
    %285 = vector.extract_strided_slice %271 {offsets = [0, 737], sizes = [8, 31], strides = [1, 1]} : vector<8x768xf32> to vector<8x31xf32>
    %286 = vector.extract_strided_slice %271 {offsets = [0, 0], sizes = [8, 737], strides = [1, 1]} : vector<8x768xf32> to vector<8x737xf32>
    %287 = tpu.concatenate %285, %286 in 1 : vector<8x31xf32>, vector<8x737xf32> -> vector<8x768xf32>
    %c38 = arith.constant 38 : index
    %c0_134 = arith.constant 0 : index
    %c0_135 = arith.constant 0 : index
    %288 = vector.load %arg3[%c38, %c0_134, %c0_135] : memref<45x8x8xf32, #tpu.memory_space<vmem>>, vector<1x8x8xf32>
    %289 = vector.shape_cast %288 : vector<1x8x8xf32> to vector<8x8xf32>
    %cst_136 = arith.constant dense<0.000000e+00> : vector<8x768xf32>
    %290 = tpu.matmul %289, %287, %cst_136 {dimension_numbers = #tpu.dot_dimension_numbers<[1], [0], [0], [1], [0, 0, 1, 1], [], []>} : vector<8x8xf32>, vector<8x768xf32>, vector<8x768xf32> -> vector<8x768xf32>
    %291 = arith.addf %284, %290 : vector<8x768xf32>
    %292 = vector.extract_strided_slice %271 {offsets = [0, 767], sizes = [8, 1], strides = [1, 1]} : vector<8x768xf32> to vector<8x1xf32>
    %293 = vector.extract_strided_slice %271 {offsets = [0, 0], sizes = [8, 767], strides = [1, 1]} : vector<8x768xf32> to vector<8x767xf32>
    %294 = tpu.concatenate %292, %293 in 1 : vector<8x1xf32>, vector<8x767xf32> -> vector<8x768xf32>
    %c39 = arith.constant 39 : index
    %c0_137 = arith.constant 0 : index
    %c0_138 = arith.constant 0 : index
    %295 = vector.load %arg3[%c39, %c0_137, %c0_138] : memref<45x8x8xf32, #tpu.memory_space<vmem>>, vector<1x8x8xf32>
    %296 = vector.shape_cast %295 : vector<1x8x8xf32> to vector<8x8xf32>
    %cst_139 = arith.constant dense<0.000000e+00> : vector<8x768xf32>
    %297 = tpu.matmul %296, %294, %cst_139 {dimension_numbers = #tpu.dot_dimension_numbers<[1], [0], [0], [1], [0, 0, 1, 1], [], []>} : vector<8x8xf32>, vector<8x768xf32>, vector<8x768xf32> -> vector<8x768xf32>
    %298 = arith.addf %291, %297 : vector<8x768xf32>
    %c40 = arith.constant 40 : index
    %c0_140 = arith.constant 0 : index
    %c0_141 = arith.constant 0 : index
    %299 = vector.load %arg3[%c40, %c0_140, %c0_141] : memref<45x8x8xf32, #tpu.memory_space<vmem>>, vector<1x8x8xf32>
    %300 = vector.shape_cast %299 : vector<1x8x8xf32> to vector<8x8xf32>
    %cst_142 = arith.constant dense<0.000000e+00> : vector<8x768xf32>
    %301 = tpu.matmul %300, %271, %cst_142 {dimension_numbers = #tpu.dot_dimension_numbers<[1], [0], [0], [1], [0, 0, 1, 1], [], []>} : vector<8x8xf32>, vector<8x768xf32>, vector<8x768xf32> -> vector<8x768xf32>
    %302 = arith.addf %298, %301 : vector<8x768xf32>
    %303 = vector.extract_strided_slice %271 {offsets = [0, 1], sizes = [8, 767], strides = [1, 1]} : vector<8x768xf32> to vector<8x767xf32>
    %304 = vector.extract_strided_slice %271 {offsets = [0, 0], sizes = [8, 1], strides = [1, 1]} : vector<8x768xf32> to vector<8x1xf32>
    %305 = tpu.concatenate %303, %304 in 1 : vector<8x767xf32>, vector<8x1xf32> -> vector<8x768xf32>
    %c41 = arith.constant 41 : index
    %c0_143 = arith.constant 0 : index
    %c0_144 = arith.constant 0 : index
    %306 = vector.load %arg3[%c41, %c0_143, %c0_144] : memref<45x8x8xf32, #tpu.memory_space<vmem>>, vector<1x8x8xf32>
    %307 = vector.shape_cast %306 : vector<1x8x8xf32> to vector<8x8xf32>
    %cst_145 = arith.constant dense<0.000000e+00> : vector<8x768xf32>
    %308 = tpu.matmul %307, %305, %cst_145 {dimension_numbers = #tpu.dot_dimension_numbers<[1], [0], [0], [1], [0, 0, 1, 1], [], []>} : vector<8x8xf32>, vector<8x768xf32>, vector<8x768xf32> -> vector<8x768xf32>
    %309 = arith.addf %302, %308 : vector<8x768xf32>
    %310 = vector.extract_strided_slice %271 {offsets = [0, 31], sizes = [8, 737], strides = [1, 1]} : vector<8x768xf32> to vector<8x737xf32>
    %311 = vector.extract_strided_slice %271 {offsets = [0, 0], sizes = [8, 31], strides = [1, 1]} : vector<8x768xf32> to vector<8x31xf32>
    %312 = tpu.concatenate %310, %311 in 1 : vector<8x737xf32>, vector<8x31xf32> -> vector<8x768xf32>
    %c42 = arith.constant 42 : index
    %c0_146 = arith.constant 0 : index
    %c0_147 = arith.constant 0 : index
    %313 = vector.load %arg3[%c42, %c0_146, %c0_147] : memref<45x8x8xf32, #tpu.memory_space<vmem>>, vector<1x8x8xf32>
    %314 = vector.shape_cast %313 : vector<1x8x8xf32> to vector<8x8xf32>
    %cst_148 = arith.constant dense<0.000000e+00> : vector<8x768xf32>
    %315 = tpu.matmul %314, %312, %cst_148 {dimension_numbers = #tpu.dot_dimension_numbers<[1], [0], [0], [1], [0, 0, 1, 1], [], []>} : vector<8x8xf32>, vector<8x768xf32>, vector<8x768xf32> -> vector<8x768xf32>
    %316 = arith.addf %309, %315 : vector<8x768xf32>
    %317 = vector.extract_strided_slice %271 {offsets = [0, 32], sizes = [8, 736], strides = [1, 1]} : vector<8x768xf32> to vector<8x736xf32>
    %318 = vector.extract_strided_slice %271 {offsets = [0, 0], sizes = [8, 32], strides = [1, 1]} : vector<8x768xf32> to vector<8x32xf32>
    %319 = tpu.concatenate %317, %318 in 1 : vector<8x736xf32>, vector<8x32xf32> -> vector<8x768xf32>
    %c43 = arith.constant 43 : index
    %c0_149 = arith.constant 0 : index
    %c0_150 = arith.constant 0 : index
    %320 = vector.load %arg3[%c43, %c0_149, %c0_150] : memref<45x8x8xf32, #tpu.memory_space<vmem>>, vector<1x8x8xf32>
    %321 = vector.shape_cast %320 : vector<1x8x8xf32> to vector<8x8xf32>
    %cst_151 = arith.constant dense<0.000000e+00> : vector<8x768xf32>
    %322 = tpu.matmul %321, %319, %cst_151 {dimension_numbers = #tpu.dot_dimension_numbers<[1], [0], [0], [1], [0, 0, 1, 1], [], []>} : vector<8x8xf32>, vector<8x768xf32>, vector<8x768xf32> -> vector<8x768xf32>
    %323 = arith.addf %316, %322 : vector<8x768xf32>
    %324 = vector.extract_strided_slice %271 {offsets = [0, 33], sizes = [8, 735], strides = [1, 1]} : vector<8x768xf32> to vector<8x735xf32>
    %325 = vector.extract_strided_slice %271 {offsets = [0, 0], sizes = [8, 33], strides = [1, 1]} : vector<8x768xf32> to vector<8x33xf32>
    %326 = tpu.concatenate %324, %325 in 1 : vector<8x735xf32>, vector<8x33xf32> -> vector<8x768xf32>
    %c44 = arith.constant 44 : index
    %c0_152 = arith.constant 0 : index
    %c0_153 = arith.constant 0 : index
    %327 = vector.load %arg3[%c44, %c0_152, %c0_153] : memref<45x8x8xf32, #tpu.memory_space<vmem>>, vector<1x8x8xf32>
    %328 = vector.shape_cast %327 : vector<1x8x8xf32> to vector<8x8xf32>
    %cst_154 = arith.constant dense<0.000000e+00> : vector<8x768xf32>
    %329 = tpu.matmul %328, %326, %cst_154 {dimension_numbers = #tpu.dot_dimension_numbers<[1], [0], [0], [1], [0, 0, 1, 1], [], []>} : vector<8x8xf32>, vector<8x768xf32>, vector<8x768xf32> -> vector<8x768xf32>
    %330 = arith.addf %323, %329 : vector<8x768xf32>
    %c4_155 = arith.constant 4 : index
    %c0_156 = arith.constant 0 : index
    %c0_157 = arith.constant 0 : index
    %331 = vector.load %arg4[%c4_155, %c0_156, %c0_157] : memref<5x8x1xf32, #tpu.memory_space<vmem>>, vector<1x8x1xf32>
    %332 = vector.shape_cast %331 : vector<1x8x1xf32> to vector<8x1xf32>
    %333 = vector.broadcast %332 : vector<8x1xf32> to vector<8x768xf32>
    %334 = arith.addf %330, %333 : vector<8x768xf32>
    %cst_158 = arith.constant 0.000000e+00 : f32
    %335 = vector.broadcast %cst_158 : f32 to vector<8x768xf32>
    %336 = arith.maximumf %334, %335 : vector<8x768xf32>
    %337 = vector.extract_strided_slice %336 {offsets = [0, 0], sizes = [1, 768], strides = [1, 1]} : vector<8x768xf32> to vector<1x768xf32>
    %c0_159 = arith.constant 0 : index
    %c0_160 = arith.constant 0 : index
    %c0_161 = arith.constant 0 : index
    %338 = vector.load %arg5[%c0_159, %c0_160, %c0_161] : memref<1x1x768xf32, #tpu.memory_space<vmem>>, vector<1x1x768xf32>
    %339 = vector.shape_cast %338 : vector<1x1x768xf32> to vector<1x768xf32>
    %340 = vector.shape_cast %337 : vector<1x768xf32> to vector<1x1x768xf32>
    tpu.vector_store %arg5[%c0_159, %c0_160, %c0_161], %340 {strides = array<i32>} : memref<1x1x768xf32, #tpu.memory_space<vmem>>, vector<1x1x768xf32>,
    return
  }
  func.func @transform_0(%arg0: i32) -> (i32, i32, i32) {
    %c0_i32 = arith.constant 0 : i32
    %c0_i32_0 = arith.constant 0 : i32
    %c0_i32_1 = arith.constant 0 : i32
    return %arg0, %c0_i32, %c0_i32_0 : i32, i32, i32
  }
  func.func @transform_1(%arg0: i32) -> (i32, i32) {
    %c0_i32 = arith.constant 0 : i32
    %c0_i32_0 = arith.constant 0 : i32
    %c0_i32_1 = arith.constant 0 : i32
    return %c0_i32, %c0_i32_0 : i32, i32
  }
  func.func @transform_2(%arg0: i32) -> (i32, i32, i32) {
    %c0_i32 = arith.constant 0 : i32
    %c0_i32_0 = arith.constant 0 : i32
    %c0_i32_1 = arith.constant 0 : i32
    %c0_i32_2 = arith.constant 0 : i32
    return %c0_i32, %c0_i32_0, %c0_i32_1 : i32, i32, i32
  }
  func.func @transform_3(%arg0: i32) -> (i32, i32, i32) {
    %c0_i32 = arith.constant 0 : i32
    %c0_i32_0 = arith.constant 0 : i32
    %c0_i32_1 = arith.constant 0 : i32
    %c0_i32_2 = arith.constant 0 : i32
    return %c0_i32, %c0_i32_0, %c0_i32_1 : i32, i32, i32
  }
  func.func @transform_4(%arg0: i32) -> (i32, i32, i32) {
    %c0_i32 = arith.constant 0 : i32
    %c0_i32_0 = arith.constant 0 : i32
    %c0_i32_1 = arith.constant 0 : i32
    return %arg0, %c0_i32, %c0_i32_0 : i32, i32, i32
  }
}

</mosaic_0001>

<bundles_post_ra>
// kernel: tpu_custom_call.1
= control target key start
LH: loop header
LB: loop body
LE: loop exit
PB: predicated region body
PF: predicated region fallthrough
CT: control target
= control target key end

     0   :  { %6 = vsyncpa [#allocation3], 0  ;;  %s163_s0 = inlined_call_operand.hbm [shape: f32[8,768], index: 0, kind: input, shape index: {}]   ;;  %s164_s1 = inlined_call_operand.hbm [shape: f32[8,768], index: 1, kind: output, shape index: {}]  }
   0x1   :  { %7 = vsyncpa [#allocation4], 0  ;;  %s120_s6 = smov [#allocation2]   ;;  %s72_s10 = scalar_lea.hbm %s163_s0, 768 }
   0x2   :  { %s14_s7 = sshll.u32 %s120_s6, 4  ;;  %p73_p0 = scmp.ne.s32.totalorder %s163_s0, %s72_s10  ;;  %s15_s7 = int_to_ptr.vmem [resolvable:$true] %s14_s7 }
   0x3   :  { %p76_p1 = scmp.lt.u32.totalorder %s72_s10, %s163_s0 }
   0x5   :  { %p78_p2 = pnand %p76_p1, %p73_p0 }
   0x7   :  { %81 = shalt.err (!%p78_p2)
}
   0x8   :  { %s82_s15 = scalar_lea.vmem %s15_s7, 768  ;;  %p87_p4 = scmp.lt.s32.totalorder %s15_s7, %s15_s7 }
   0x9   :  { %p83_p3 = scmp.ne.s32.totalorder %s15_s7, %s82_s15  ;;  %p88_p5 = scmp.lt.s32.totalorder %s82_s15, %s82_s15 }
   0xb   :  { %p89_p6 = por %p88_p5, %p87_p4 }
   0xd   :  { %p90_p7 = pnand %p89_p6, %p83_p3 }
   0xf   :  { %93 = shalt.err (!%p90_p7)
}
  0x10   :  { %17 = dma.hbm_to_vmem [thread:$0]  %s163_s0, 768, %s15_s7, [#allocation3]  }
  0x11   :  { %116 = dma.done.wait [#allocation3], 768  }
  0x12   :  { %117 = vsyncadd [#allocation3], 4294966528  ;;  %v23_v0 = vld [vmem:[#allocation2 + $0x10] sm:$0xff]  ;;  %v21_v1 = vld [vmem:[#allocation2] sm:$0xff]  ;;  %s121_s18 = smov 29   ;;  %v39_v6 = vlaneseq  ;;  %s122_s0 = smov [#allocation5]  }
  0x13   :  { %31 = vrot.lane.b32.xlu1 %v23_v0, %s121_s18  ;;  %27 = vrot.lane.b32.xlu0 %v21_v1, %s121_s18  ;;  %v24_v2 = vld [vmem:[#allocation2 + $0x18] sm:$0xff]  ;;  %v22_v3 = vld [vmem:[#allocation2 + $0x8] sm:$0xff]  ;;  %v25_v5 = vld [vmem:[#allocation2 + $0x20] sm:$0xff]  ;;  %s60_s19 = sshll.u32 %s122_s0, 4  ;;  %s61_s19 = int_to_ptr.vmem [resolvable:$true] %s60_s19 }
  0x14   :  { %v26_v4 = vld [vmem:[#allocation2 + $0x28] sm:$0xff]  ;;  %v40_v7 = vand.u32 127, %v39_v6  ;;  %s94_s20 = scalar_lea.vmem %s61_s19, 768  ;;  %p99_p9 = scmp.lt.s32.totalorder %s61_s19, %s61_s19 }
  0x15   :  { %p95_p8 = scmp.ne.s32.totalorder %s61_s19, %s94_s20  ;;  %p100_p10 = scmp.lt.s32.totalorder %s94_s20, %s94_s20 }
  0x16   :  { %vm41_vm0 = vcmp.lt.s32.totalorder %v40_v7, 29 }
  0x17   :  { %33 = vrot.lane.b32.xlu1 %v24_v2, %s121_s18  ;;  %29 = vrot.lane.b32.xlu0 %v22_v3, %s121_s18  ;;  %p101_p11 = por %p100_p10, %p99_p9 }
  0x19   :  { %p102_p12 = pnand %p101_p11, %p95_p8 }
  0x1b   :  { %37 = vrot.lane.b32.xlu1 %v26_v4, %s121_s18  ;;  %35 = vrot.lane.b32.xlu0 %v25_v5, %s121_s18 }
  0x85   :  { %v32_v8 = vpop.permute.xlu1 %31  ;;  %v28_v9 = vpop.permute.xlu0 %27 }
  0x89   :  { %v34_v10 = vpop.permute.xlu1 %33  ;;  %v30_v11 = vpop.permute.xlu0 %29 }
  0x8a   :  { %v44_v12 = vsel %vm41_vm0, %v32_v8, %v34_v10  ;;  %v45_v13 = vsel %vm41_vm0, %v30_v11, %v32_v8  ;;  %v46_v14 = vsel %vm41_vm0, %v28_v9, %v30_v11 }
  0x8b   :  { %50 = vst [vmem:[#allocation5 + $0x10] sm:$0xff] %v44_v12  ;;  %48 = vst [vmem:[#allocation5] sm:$0xff] %v46_v14 }
  0x8c   :  { %49 = vst [vmem:[#allocation5 + $0x8] sm:$0xff] %v45_v13 }
  0x8d   :  { %v38_v15 = vpop.permute.xlu1 %37  ;;  %v36_v16 = vpop.permute.xlu0 %35 }
  0x8e   :  { %v47_v17 = vsel %vm41_vm0, %v38_v15, %v28_v9  ;;  %v42_v18 = vsel %vm41_vm0, %v36_v16, %v38_v15  ;;  %v43_v19 = vsel %vm41_vm0, %v34_v10, %v36_v16 }
  0x8f   :  { %53 = vst [vmem:[#allocation5 + $0x28] sm:$0xff] %v47_v17  ;;  %51 = vst [vmem:[#allocation5 + $0x18] sm:$0xff] %v43_v19 }
  0x90   :  { %52 = vst [vmem:[#allocation5 + $0x20] sm:$0xff] %v42_v18 }
  0x91   :  { %105 = shalt.err (!%p102_p12)
}
  0x92   :  { %s106_s23 = scalar_lea.hbm %s164_s1, 768 }
  0x93   :  { %p107_p13 = scmp.ne.s32.totalorder %s164_s1, %s106_s23  ;;  %p110_p0 = scmp.lt.u32.totalorder %s106_s23, %s164_s1 }
  0x95   :  { %p112_p1 = pnand %p110_p0, %p107_p13 }
  0x97   :  { %115 = shalt.err (!%p112_p1)
}
  0x98   :  { %63 = dma.vmem_to_hbm [thread:$0]  %s61_s19, 768, %s164_s1, [#allocation4]  }
  0x99   :  { %118 = dma.done.wait [#allocation4], 768  }
  0x9a   :  { %119 = vsyncadd [#allocation4], 4294966528 }
  0x9b   :  { %67 = vsyncpa [#allocation3], 1 }
  0x9c   :  { %68 = vsyncpa [#allocation4], 1 }

// kernel: tpu_custom_call.1
= control target key start
LH: loop header
LB: loop body
LE: loop exit
PB: predicated region body
PF: predicated region fallthrough
CT: control target
= control target key end

     0   :  { %9 = vsyncpa [#allocation3], 0  ;;  %s13449_s0 = inlined_call_operand.vmem [shape: f32[2,8,768], index: 0, kind: input, shape index: {}]   ;;  %s13450_s1 = inlined_call_operand.vmem [shape: f32[1,768], index: 1, kind: input, shape index: {}]   ;;  %s13451_s2 = inlined_call_operand.vmem [shape: f32[45,8,8], index: 2, kind: input, shape index: {}]   ;;  %s13452_s3 = inlined_call_operand.vmem [shape: f32[5,8,1], index: 3, kind: input, shape index: {}]   ;;  %s13453_s4 = inlined_call_operand.hbm [shape: f32[2,1,768], index: 4, kind: output, shape index: {}]  }
   0x1   :  { %11 = vsyncpa [#allocation3 + $0x1], 0  ;;  %s12099_s15 = smov 0   ;;  %s12101_s16 = smov 0  }
   0x2   :  { %s12103_s17 = smov 0   ;;  %s12105_s18 = smov 0  }
   0x3 LB: > { %s12120_s19 = sadd.s32 4294967295, %s12049_s18   ;;  %s11490_s20 = sadd.s32 4294967294, %s12049_s18   ;;  %s12049_s18 = sphi %s12105_s18, %s13459_s18   ;;  %s12045_s17 = sphi %s12103_s17, %s13458_s17   ;;  %s12041_s16 = sphi %s12101_s16, %s13457_s16   ;;  %s12037_s15 = sphi %s12099_s15, %s13456_s15  }
   0x4   : > { %s12124_s21 = sadd.s32 1, %s12049_s18   ;;  %s113_s22 = sadd.s32 1, %s12045_s17 }
   0x5   : > { %s110_s23 = ssub.s32 %s12049_s18, %s12124_s21  ;;  %p123_p0 = scmp.ne.s32.totalorder %s12045_s17, %s12041_s16 }
   0x6   : > { %p111_p1 = scmp.eq.s32.totalorder %s110_s23, 0  ;;  %p124_p2 = scmp.eq.s32.totalorder %s12120_s19, 1 }
   0x7   : > { %p129_p3 = scmp.ne.s32.totalorder %s12041_s16, %s12037_s15  ;;  %p130_p4 = scmp.eq.s32.totalorder %s11490_s20, 1 }
   0x8   : > { %s12135_s24 = scalar_select %p111_p1, %s12045_s17, %s113_s22  }
   0x9   : > { %p12137_p5 = por %p124_p2, %p123_p0  ;;  %p12141_p6 = por %p130_p4, %p129_p3 }
   0xa   : > { %p11493_p7 = scmp.ge.s32.totalorder %s12049_s18, 1  ;;  %p165_p8 = scmp.lt.s32.totalorder %s12049_s18, 3 }
   0xc   : > { %p166_p9 = pnand %p11493_p7, %p165_p8 }
   0xd   : > { %p191_p10 = scmp.lt.s32.totalorder (!%p166_p9), %s12120_s19, 1  ;;  %v12051_v0 = vmov (!%p166_p9), 0.0   ;;  %s12052_s6 = smov (!%p166_p9), 32   ;;  %v12060_v7 = vmov (!%p166_p9), 0   ;;  %v2452_v8 = vld [vmem:[%s13452_s3] sm:$0xff] (!%p166_p9)  ;;  %vm280_vm0 = vcmask (!%p166_p9), 261120  }
   0xe   : > { %169 = sbr.rel (%p166_p9) target bundleno = 2247 (0x8c7), region = 36  ;;  %363 = vmatprep.mubr.f32.mxu1 (!%p166_p9), %v12051_v0  ;;  %823 = vmatprep.mubr.f32.mxu0 (!%p166_p9), %v12051_v0  ;;  %s12053_s7 = smov (!%p166_p9), 33   ;;  %v11495_v14 = vld [vmem:[%s13451_s2 + $0x8] sm:$0xff] (!%p166_p9)  ;;  %vm295_vm1 = vcmask (!%p166_p9), 64512   ;;  %vm253_vm2 = vcmask (!%p166_p9), 269312   ;;  %v266_v28 = vld [vmem:[%s13451_s2] sm:$0xff] (!%p166_p9) }
   0xf   : > { %s12054_s8 = smov (!%p166_p9), 31   ;;  %s12055_s9 = smov (!%p166_p9), 1   ;;  %11985 = vset.pattern.permute.xlu0 (!%p166_p9), %v12060_v7  ;;  %11986 = vset.pattern.permute.xlu1 (!%p166_p9), %v12060_v7  ;;  %vm741_vm3 = vcmask (!%p166_p9), 252928   ;;  %v11502_v34 = vld [vmem:[%s13451_s2 + $0x10] sm:$0xff] (!%p166_p9)  ;;  %vm991_vm4 = vcmask (!%p166_p9), 7168   ;;  %v11506_v53 = vld [vmem:[%s13451_s2 + $0x18] sm:$0xff] (!%p166_p9) }
  0x10   : > { %s12056_s10 = smov (!%p166_p9), 127   ;;  %s12057_s11 = smov (!%p166_p9), 97   ;;  %v11510_v63 = vld [vmem:[%s13451_s2 + $0x20] sm:$0xff] (!%p166_p9)  ;;  %vm1464_vm5 = vcmask (!%p166_p9), 1039360   ;;  %vm1714_vm6 = vcmask (!%p166_p9), 793600   ;;  %vm1964_vm7 = vcmask (!%p166_p9), 785408  }
  0x11   : > { %s12058_s12 = smov (!%p166_p9), 96   ;;  %s12059_s13 = smov (!%p166_p9), 95   ;;  %vm2214_vm8 = vcmask (!%p166_p9), 777216   ;;  %vm4764_vm9 = vcmask (!%p166_p9), 523264   ;;  %vm4736_vm10 = vcmask (!%p166_p9), 539648   ;;  %vm5224_vm11 = vcmask (!%p166_p9), 506880  }
  0x12   : > { %s12061_s29 = smov (!%p166_p9), 64   ;;  %s12062_s30 = smov (!%p166_p9), 66   ;;  %vm5474_vm12 = vcmask (!%p166_p9), 15360   ;;  %vm5947_vm13 = vcmask (!%p166_p9), 1031168   ;;  %vm6907_vm14 = vcmask (!%p166_p9), 809984   ;;  %vm7394_vm15 = vcmask (!%p166_p9), 760832  }
  0x13   : > { %s12064_s14 = smov (!%p166_p9), 2   ;;  %s12065_s20 = smov (!%p166_p9), 126  }
  0x15   : > { %s192_s27 = scalar_select %p191_p10, %s12120_s19, 1 }
  0x17   : > { %s11922_s28 = smul.u32 48, %s192_s27  ;;  %s12066_s27 = smov 99  }
  0x19   : > { %s195_s5 = scalar_lea.vmem %s13449_s0, %s11922_s28  ;;  %s12067_s28 = smov 93  }
  0x1a   : > { %v12154_v1 = vld [vmem:[%s195_s5 + $0x28] sm:$0xff]  ;;  %v12156_v2 = vld [vmem:[%s195_s5] sm:$0xff]  ;;  %v12162_v3 = vld [vmem:[%s195_s5 + $0x10] sm:$0xff] }
  0x1b   : > { %267 = vrot.lane.b32.xlu1 %v12154_v1, %s12052_s6  ;;  %270 = vrot.lane.b32.xlu0 %v12156_v2, %s12052_s6  ;;  %v12164_v4 = vld [vmem:[%s195_s5 + $0x8] sm:$0xff]  ;;  %v12170_v5 = vld [vmem:[%s195_s5 + $0x20] sm:$0xff] }
  0x1c   : > { %v12172_v6 = vld [vmem:[%s195_s5 + $0x18] sm:$0xff]  ;;  %s12063_s5 = smov 62  }
  0x1f   : > { %274 = vrot.lane.b32.xlu1 %v12162_v3, %s12052_s6  ;;  %272 = vrot.lane.b32.xlu0 %v12164_v4, %s12052_s6 }
  0x23   : > { %278 = vrot.lane.b32.xlu1 %v12170_v5, %s12052_s6  ;;  %276 = vrot.lane.b32.xlu0 %v12172_v6, %s12052_s6 }
  0x27   : > { %245 = vrot.lane.b32.xlu1 %v12164_v4, %s12053_s7  ;;  %243 = vrot.lane.b32.xlu0 %v12156_v2, %s12053_s7 }
  0x2b   : > { %731 = vrot.lane.b32.xlu1 %v12156_v2, %s12054_s8  ;;  %235 = vrot.lane.b32.xlu0 %v12154_v1, %s12053_s7 }
  0x2f   : > { %247 = vrot.lane.b32.xlu1 %v12162_v3, %s12053_s7  ;;  %733 = vrot.lane.b32.xlu0 %v12164_v4, %s12054_s8 }
  0x33   : > { %728 = vrot.lane.b32.xlu1 %v12154_v1, %s12054_s8  ;;  %249 = vrot.lane.b32.xlu0 %v12172_v6, %s12053_s7 }
  0x37   : > { %251 = vrot.lane.b32.xlu1 %v12170_v5, %s12053_s7  ;;  %739 = vrot.lane.b32.xlu0 %v12170_v5, %s12054_s8 }
  0x3b   : > { %981 = vrot.lane.b32.xlu1 %v12156_v2, %s12055_s9  ;;  %737 = vrot.lane.b32.xlu0 %v12172_v6, %s12054_s8 }
  0x3f   : > { %735 = vrot.lane.b32.xlu1 %v12162_v3, %s12054_s8  ;;  %983 = vrot.lane.b32.xlu0 %v12164_v4, %s12055_s9 }
  0x43   : > { %989 = vrot.lane.b32.xlu1 %v12170_v5, %s12055_s9  ;;  %978 = vrot.lane.b32.xlu0 %v12154_v1, %s12055_s9 }
  0x47   : > { %985 = vrot.lane.b32.xlu1 %v12162_v3, %s12055_s9  ;;  %987 = vrot.lane.b32.xlu0 %v12172_v6, %s12055_s9 }
  0x4b   : > { %1456 = vrot.lane.b32.xlu1 %v12162_v3, %s12056_s10  ;;  %1454 = vrot.lane.b32.xlu0 %v12164_v4, %s12056_s10 }
  0x4f   : > { %1462 = vrot.lane.b32.xlu1 %v12154_v1, %s12056_s10  ;;  %1452 = vrot.lane.b32.xlu0 %v12156_v2, %s12056_s10 }
  0x53   : > { %1704 = vrot.lane.b32.xlu1 %v12164_v4, %s12057_s11  ;;  %1460 = vrot.lane.b32.xlu0 %v12170_v5, %s12056_s10 }
  0x57   : > { %1458 = vrot.lane.b32.xlu1 %v12172_v6, %s12056_s10  ;;  %1706 = vrot.lane.b32.xlu0 %v12162_v3, %s12057_s11 }
  0x5b   : > { %1712 = vrot.lane.b32.xlu1 %v12154_v1, %s12057_s11  ;;  %1702 = vrot.lane.b32.xlu0 %v12156_v2, %s12057_s11 }
  0x5f   : > { %1954 = vrot.lane.b32.xlu1 %v12164_v4, %s12058_s12  ;;  %1710 = vrot.lane.b32.xlu0 %v12170_v5, %s12057_s11 }
  0x63   : > { %1708 = vrot.lane.b32.xlu1 %v12172_v6, %s12057_s11  ;;  %1956 = vrot.lane.b32.xlu0 %v12162_v3, %s12058_s12 }
  0x67   : > { %1962 = vrot.lane.b32.xlu1 %v12154_v1, %s12058_s12  ;;  %1952 = vrot.lane.b32.xlu0 %v12156_v2, %s12058_s12 }
  0x6b   : > { %2204 = vrot.lane.b32.xlu1 %v12164_v4, %s12059_s13  ;;  %1960 = vrot.lane.b32.xlu0 %v12170_v5, %s12058_s12 }
  0x6f   : > { %1958 = vrot.lane.b32.xlu1 %v12172_v6, %s12058_s12  ;;  %2206 = vrot.lane.b32.xlu0 %v12162_v3, %s12059_s13 }
  0x73   : > { %2212 = vrot.lane.b32.xlu1 %v12154_v1, %s12059_s13  ;;  %2202 = vrot.lane.b32.xlu0 %v12156_v2, %s12059_s13 }
  0x77   : > { %2208 = vrot.lane.b32.xlu1 %v12172_v6, %s12059_s13  ;;  %2210 = vrot.lane.b32.xlu0 %v12170_v5, %s12059_s13 }
  0x7b   : > { %2455 = vperm.xlu0 %11985, %v2452_v8  }
  0x8d   : > { %v268_v9 = vpop.permute.xlu1 %267  ;;  %v271_v10 = vpop.permute.xlu0 %270 }
  0x8e   : > { %v292_v15 = vsel %vm280_vm0, %v268_v9, %v271_v10 }
  0x91   : > { %v275_v11 = vpop.permute.xlu1 %274  ;;  %v273_v12 = vpop.permute.xlu0 %272 }
  0x92   : > { %v281_v13 = vsel %vm280_vm0, %v271_v10, %v273_v12  ;;  %v282_v19 = vsel %vm280_vm0, %v273_v12, %v275_v11 }
  0x93   : > { %299 = vmatprep.subr.mxu1 %v281_v13 }
  0x94   : > { %300 = vmatpush1.msra.mxu1 %v292_v15 }
  0x95   : > { %v279_v16 = vpop.permute.xlu1 %278  ;;  %v277_v17 = vpop.permute.xlu0 %276  ;;  %11496 = vmatmul.mubr.msk.f32.vlgmr.msra.gmra.mrb[0].mxu1 %vm295_vm1, %v11495_v14 }
  0x96   : > { %v283_v18 = vsel %vm280_vm0, %v275_v11, %v277_v17  ;;  %434 = vmatprep.mubr.f32.mxu1 %v12051_v0  ;;  %v285_v20 = vsel %vm280_vm0, %v279_v16, %v268_v9  ;;  %v284_v23 = vsel %vm280_vm0, %v277_v17, %v279_v16  ;;  %v11518_v17 = vld [vmem:[%s13451_s2 + $0x30] sm:$0xff] }
  0x97   : > { %370 = vmatprep.subr.mxu1 %v283_v18 }
  0x98   : > { %371 = vmatpush1.msra.mxu1 %v282_v19 }
  0x99   : > { %v246_v21 = vpop.permute.xlu1 %245  ;;  %441 = vmatprep.subr.mxu1 %v285_v20  ;;  %v244_v22 = vpop.permute.xlu0 %243  ;;  %11497 = vmatmul.mubr.msk.f32.vlgmr.msra.gmra.mrb[2].mxu1 %vm295_vm1, %v11495_v14 }
  0x9a   : > { %442 = vmatpush1.msra.mxu1 %v284_v23  ;;  %v254_v24 = vsel %vm253_vm2, %v244_v22, %v246_v21  ;;  %505 = vmatprep.mubr.f32.mxu1 %v12051_v0 }
  0x9b   : > { %515 = vmatprep.subr.mxu1 %v254_v24 }
  0x9d   : > { %v732_v25 = vpop.permute.xlu1 %731  ;;  %v236_v26 = vpop.permute.xlu0 %235  ;;  %11498 = vmatmul.mubr.msk.f32.vlgmr.msra.gmra.mrb[4].mxu1 %vm295_vm1, %v11495_v14 }
  0x9e   : > { %v265_v27 = vsel %vm253_vm2, %v236_v26, %v244_v22  ;;  %579 = vmatprep.mubr.f32.mxu1 %v12051_v0 }
  0x9f   : > { %516 = vmatpush1.msra.mxu1 %v265_v27 }
  0xa1   : > { %v248_v29 = vpop.permute.xlu1 %247  ;;  %v734_v30 = vpop.permute.xlu0 %733  ;;  %11499 = vmatmul.mubr.msk.f32.vlgmr.msra.gmra.mrb[0].mxu1 %vm295_vm1, %v266_v28 }
  0xa2   : > { %v742_v31 = vsel %vm741_vm3, %v732_v25, %v734_v30  ;;  %650 = vmatprep.mubr.f32.mxu1 %v12051_v0  ;;  %v255_v37 = vsel %vm253_vm2, %v246_v21, %v248_v29 }
  0xa3   : > { %759 = vmatprep.subr.mxu0 %v742_v31 }
  0xa5   : > { %v729_v32 = vpop.permute.xlu1 %728  ;;  %v250_v33 = vpop.permute.xlu0 %249 }
  0xa6   : > { %v256_v35 = vsel %vm253_vm2, %v248_v29, %v250_v33  ;;  %v753_v36 = vsel %vm741_vm3, %v729_v32, %v732_v25 }
  0xa7   : > { %586 = vmatprep.subr.mxu1 %v256_v35  ;;  %760 = vmatpush1.msra.mxu0 %v753_v36 }
  0xa8   : > { %587 = vmatpush1.msra.mxu1 %v255_v37  ;;  %11503 = vmatmul.mubr.msk.f32.vlgmr.msra.gmra.mrb[0].mxu0 %vm295_vm1, %v11502_v34 }
  0xa9   : > { %v252_v38 = vpop.permute.xlu1 %251  ;;  %v740_v39 = vpop.permute.xlu0 %739  ;;  %11500 = vmatmul.mubr.msk.f32.vlgmr.msra.gmra.mrb[2].mxu1 %vm295_vm1, %v266_v28  ;;  %965 = vmatprep.mubr.f32.mxu0 %v12051_v0 }
  0xaa   : > { %v258_v40 = vsel %vm253_vm2, %v252_v38, %v236_v26  ;;  %v746_v41 = vsel %vm741_vm3, %v740_v39, %v729_v32  ;;  %v257_v42 = vsel %vm253_vm2, %v250_v33, %v252_v38  ;;  %721 = vmatprep.mubr.f32.mxu1 %v12051_v0 }
  0xab   : > { %657 = vmatprep.subr.mxu1 %v258_v40  ;;  %901 = vmatprep.subr.mxu0 %v746_v41 }
  0xac   : > { %658 = vmatpush1.msra.mxu1 %v257_v42 }
  0xad   : > { %v982_v43 = vpop.permute.xlu1 %981  ;;  %v738_v44 = vpop.permute.xlu0 %737  ;;  %11501 = vmatmul.mubr.msk.f32.vlgmr.msra.gmra.mrb[4].mxu1 %vm295_vm1, %v266_v28 }
  0xae   : > { %v745_v45 = vsel %vm741_vm3, %v738_v44, %v740_v39  ;;  %894 = vmatprep.mubr.f32.mxu1 %v12051_v0 }
  0xaf   : > { %902 = vmatpush1.msra.mxu0 %v745_v45 }
  0xb0   : > { %11505 = vmatmul.mubr.msk.f32.vlgmr.msra.gmra.mrb[2].mxu0 %vm295_vm1, %v11502_v34 }
  0xb1   : > { %v736_v46 = vpop.permute.xlu1 %735  ;;  %v984_v47 = vpop.permute.xlu0 %983  ;;  %1073 = vmatprep.mubr.f32.mxu0 %v12051_v0 }
  0xb2   : > { %v744_v48 = vsel %vm741_vm3, %v736_v46, %v738_v44  ;;  %v992_v49 = vsel %vm991_vm4, %v982_v43, %v984_v47  ;;  %v743_v50 = vsel %vm741_vm3, %v734_v30, %v736_v46  ;;  %v11522_v30 = vld [vmem:[%s13451_s2 + $0x38] sm:$0xff] }
  0xb3   : > { %830 = vmatprep.subr.mxu1 %v744_v48  ;;  %1009 = vmatprep.subr.mxu0 %v992_v49 }
  0xb4   : > { %831 = vmatpush1.msra.mxu1 %v743_v50 }
  0xb5   : > { %v990_v51 = vpop.permute.xlu1 %989  ;;  %v979_v52 = vpop.permute.xlu0 %978  ;;  %11504 = vmatmul.mubr.msk.f32.vlgmr.msra.gmra.mrb[2].mxu1 %vm295_vm1, %v11502_v34 }
  0xb6   : > { %v1003_v54 = vsel %vm991_vm4, %v979_v52, %v982_v43  ;;  %v996_v55 = vsel %vm991_vm4, %v990_v51, %v979_v52  ;;  %1144 = vmatprep.mubr.f32.mxu1 %v12051_v0  ;;  %v11526_v43 = vld [vmem:[%s13451_s2 + $0x40] sm:$0xff] }
  0xb7   : > { %1010 = vmatpush1.msra.mxu0 %v1003_v54 }
  0xb8   : > { %11507 = vmatmul.mubr.msk.f32.vlgmr.msra.gmra.mrb[0].mxu0 %vm295_vm1, %v11506_v53  ;;  %1151 = vmatprep.subr.mxu0 %v996_v55  ;;  %v198_v55 = vlaneseq }
  0xb9   : > { %v986_v56 = vpop.permute.xlu1 %985  ;;  %v988_v57 = vpop.permute.xlu0 %987  ;;  %1215 = vmatprep.mubr.f32.mxu0 %v12051_v0 }
  0xba   : > { %v994_v58 = vsel %vm991_vm4, %v986_v56, %v988_v57  ;;  %v995_v59 = vsel %vm991_vm4, %v988_v57, %v990_v51  ;;  %v993_v60 = vsel %vm991_vm4, %v984_v47, %v986_v56  ;;  %v12401_v56 = vshrl.u32 %v198_v55, 7 }
  0xbb   : > { %1080 = vmatprep.subr.mxu1 %v994_v58  ;;  %1152 = vmatpush1.msra.mxu0 %v995_v59  ;;  %v196_v59 = vld [vmem:[%s13450_s1] sm:$0x3f] }
  0xbc   : > { %1081 = vmatpush1.msra.mxu1 %v993_v60  ;;  %11509 = vmatmul.mubr.msk.f32.vlgmr.msra.gmra.mrb[2].mxu0 %vm295_vm1, %v11506_v53  ;;  %v200_v57 = vsub.s32 0, %v12401_v56 }
  0xbd   : > { %v1457_v61 = vpop.permute.xlu1 %1456  ;;  %1233 = vmatprep.subr.mxu0 %v12164_v4  ;;  %v1455_v62 = vpop.permute.xlu0 %1454  ;;  %1297 = vmatprep.mubr.f32.mxu0 %v12051_v0 }
  0xbe   : > { %1234 = vmatpush1.msra.mxu0 %v12156_v2  ;;  %11508 = vmatmul.mubr.msk.f32.vlgmr.msra.gmra.mrb[2].mxu1 %vm295_vm1, %v11506_v53  ;;  %v1466_v7 = vsel %vm1464_vm5, %v1455_v62, %v1457_v61 }
  0xbf   : > { %1375 = vmatprep.subr.mxu0 %v12154_v1  ;;  %1304 = vmatprep.subr.mxu1 %v12172_v6 }
  0xc0   : > { %11511 = vmatmul.mubr.msk.f32.vlgmr.msra.gmra.mrb[0].mxu0 %vm295_vm1, %v11510_v63  ;;  %1305 = vmatpush1.msra.mxu1 %v12162_v3 }
  0xc1   : > { %1376 = vmatpush1.msra.mxu0 %v12170_v5  ;;  %v1463_v4 = vpop.permute.xlu1 %1462  ;;  %v1453_v8 = vpop.permute.xlu0 %1452  ;;  %1439 = vmatprep.mubr.f32.mxu0 %v12051_v0  ;;  %v11514_v5 = vld [vmem:[%s13451_s2 + $0x28] sm:$0xff] }
  0xc2   : > { %1483 = vmatprep.subr.mxu0 %v1466_v7  ;;  %v1465_v2 = vsel %vm1464_vm5, %v1453_v8, %v1455_v62  ;;  %1368 = vmatprep.mubr.f32.mxu1 %v12051_v0  ;;  %v1477_v6 = vsel %vm1464_vm5, %v1463_v4, %v1453_v8  ;;  %v12408_v7 = vrot.slane %v196_v59, %v200_v57  ;;  %v11530_v57 = vld [vmem:[%s13451_s2 + $0x48] sm:$0xff] }
  0xc4   : > { %11513 = vmatmul.mubr.msk.f32.vlgmr.msra.gmra.mrb[2].mxu0 %vm295_vm1, %v11510_v63 }
  0xc5   : > { %1484 = vmatpush1.msra.mxu0 %v1465_v2  ;;  %v1705_v1 = vpop.permute.xlu1 %1704  ;;  %v1461_v3 = vpop.permute.xlu0 %1460  ;;  %1547 = vmatprep.mubr.f32.mxu0 %v12051_v0 }
  0xc6   : > { %1625 = vmatprep.subr.mxu0 %v1477_v6  ;;  %v1469_v9 = vsel %vm1464_vm5, %v1461_v3, %v1463_v4  ;;  %11512 = vmatmul.mubr.msk.f32.vlgmr.msra.gmra.mrb[2].mxu1 %vm295_vm1, %v11510_v63  ;;  %v204_v4 = vsub.s32 1, %v12401_v56  ;;  %v220_v6 = vsub.s32 5, %v12401_v56 }
  0xc7   : > { %1618 = vmatprep.mubr.f32.mxu1 %v12051_v0 }
  0xc8   : > { %11515 = vmatmul.mubr.msk.f32.vlgmr.msra.gmra.mrb[0].mxu0 %vm295_vm1, %v11514_v5 }
  0xc9   : > { %1626 = vmatpush1.msra.mxu0 %v1469_v9  ;;  %v1459_v10 = vpop.permute.xlu1 %1458  ;;  %v1707_v11 = vpop.permute.xlu0 %1706  ;;  %1689 = vmatprep.mubr.f32.mxu0 %v12051_v0 }
  0xca   : > { %v1468_v12 = vsel %vm1464_vm5, %v1459_v10, %v1461_v3  ;;  %v1716_v13 = vsel %vm1714_vm6, %v1705_v1, %v1707_v11  ;;  %v1467_v14 = vsel %vm1464_vm5, %v1457_v61, %v1459_v10 }
  0xcb   : > { %1554 = vmatprep.subr.mxu1 %v1468_v12  ;;  %1733 = vmatprep.subr.mxu0 %v1716_v13 }
  0xcc   : > { %1555 = vmatpush1.msra.mxu1 %v1467_v14  ;;  %11517 = vmatmul.mubr.msk.f32.vlgmr.msra.gmra.mrb[2].mxu0 %vm295_vm1, %v11514_v5 }
  0xcd   : > { %v1713_v15 = vpop.permute.xlu1 %1712  ;;  %v1703_v16 = vpop.permute.xlu0 %1702  ;;  %1797 = vmatprep.mubr.f32.mxu0 %v12051_v0 }
  0xce   : > { %v1715_v18 = vsel %vm1714_vm6, %v1703_v16, %v1705_v1  ;;  %v1727_v19 = vsel %vm1714_vm6, %v1713_v15, %v1703_v16  ;;  %11516 = vmatmul.mubr.msk.f32.vlgmr.msra.gmra.mrb[2].mxu1 %vm295_vm1, %v11514_v5  ;;  %v208_v16 = vsub.s32 2, %v12401_v56 }
  0xcf   : > { %1734 = vmatpush1.msra.mxu0 %v1715_v18  ;;  %1868 = vmatprep.mubr.f32.mxu1 %v12051_v0  ;;  %v12417_v18 = vrot.slane %v196_v59, %v220_v6 }
  0xd0   : > { %1875 = vmatprep.subr.mxu0 %v1727_v19  ;;  %11519 = vmatmul.mubr.msk.f32.vlgmr.msra.gmra.mrb[0].mxu0 %vm295_vm1, %v11518_v17 }
  0xd1   : > { %v1955_v20 = vpop.permute.xlu1 %1954  ;;  %v1711_v21 = vpop.permute.xlu0 %1710  ;;  %1939 = vmatprep.mubr.f32.mxu0 %v12051_v0 }
  0xd2   : > { %v1719_v22 = vsel %vm1714_vm6, %v1711_v21, %v1713_v15 }
  0xd3   : > { %1876 = vmatpush1.msra.mxu0 %v1719_v22  ;;  %v216_v22 = vsub.s32 4, %v12401_v56 }
  0xd4   : > { %11521 = vmatmul.mubr.msk.f32.vlgmr.msra.gmra.mrb[2].mxu0 %vm295_vm1, %v11518_v17 }
  0xd5   : > { %v1709_v23 = vpop.permute.xlu1 %1708  ;;  %v1957_v24 = vpop.permute.xlu0 %1956  ;;  %2047 = vmatprep.mubr.f32.mxu0 %v12051_v0 }
  0xd6   : > { %v1718_v25 = vsel %vm1714_vm6, %v1709_v23, %v1711_v21  ;;  %v1966_v26 = vsel %vm1964_vm7, %v1955_v20, %v1957_v24  ;;  %v1717_v27 = vsel %vm1714_vm6, %v1707_v11, %v1709_v23  ;;  %v12411_v11 = vrot.slane %v196_v59, %v204_v4 }
  0xd7   : > { %1804 = vmatprep.subr.mxu1 %v1718_v25  ;;  %1983 = vmatprep.subr.mxu0 %v1966_v26  ;;  %v12426_v26 = vrot.slane %v196_v59, %v208_v16 }
  0xd8   : > { %1805 = vmatpush1.msra.mxu1 %v1717_v27 }
  0xd9   : > { %v1963_v28 = vpop.permute.xlu1 %1962  ;;  %v1953_v29 = vpop.permute.xlu0 %1952  ;;  %11520 = vmatmul.mubr.msk.f32.vlgmr.msra.gmra.mrb[2].mxu1 %vm295_vm1, %v11518_v17 }
  0xda   : > { %v1965_v31 = vsel %vm1964_vm7, %v1953_v29, %v1955_v20  ;;  %v1977_v32 = vsel %vm1964_vm7, %v1963_v28, %v1953_v29  ;;  %2118 = vmatprep.mubr.f32.mxu1 %v12051_v0  ;;  %v212_v20 = vsub.s32 3, %v12401_v56 }
  0xdb   : > { %1984 = vmatpush1.msra.mxu0 %v1965_v31  ;;  %v12437_v31 = vrot.slane %v196_v59, %v216_v22 }
  0xdc   : > { %2125 = vmatprep.subr.mxu0 %v1977_v32  ;;  %11523 = vmatmul.mubr.msk.f32.vlgmr.msra.gmra.mrb[0].mxu0 %vm295_vm1, %v11522_v30  ;;  %v12431_v29 = vrot.slane %v196_v59, %v212_v20 }
  0xdd   : > { %v2205_v33 = vpop.permute.xlu1 %2204  ;;  %v1961_v34 = vpop.permute.xlu0 %1960  ;;  %2189 = vmatprep.mubr.f32.mxu0 %v12051_v0 }
  0xde   : > { %v1969_v35 = vsel %vm1964_vm7, %v1961_v34, %v1963_v28 }
  0xdf   : > { %2126 = vmatpush1.msra.mxu0 %v1969_v35 }
  0xe0   : > { %11525 = vmatmul.mubr.msk.f32.vlgmr.msra.gmra.mrb[2].mxu0 %vm295_vm1, %v11522_v30 }
  0xe1   : > { %v1959_v36 = vpop.permute.xlu1 %1958  ;;  %v2207_v37 = vpop.permute.xlu0 %2206  ;;  %2297 = vmatprep.mubr.f32.mxu0 %v12051_v0 }
  0xe2   : > { %v1968_v38 = vsel %vm1964_vm7, %v1959_v36, %v1961_v34  ;;  %v2216_v39 = vsel %vm2214_vm8, %v2205_v33, %v2207_v37  ;;  %v1967_v40 = vsel %vm1964_vm7, %v1957_v24, %v1959_v36  ;;  %v11566_v36 = vld [vmem:[%s13452_s3 + $0x8] sm:$0xff] }
  0xe3   : > { %2054 = vmatprep.subr.mxu1 %v1968_v38  ;;  %2233 = vmatprep.subr.mxu0 %v2216_v39 }
  0xe4   : > { %2055 = vmatpush1.msra.mxu1 %v1967_v40 }
  0xe5   : > { %v2213_v41 = vpop.permute.xlu1 %2212  ;;  %11524 = vmatmul.mubr.msk.f32.vlgmr.msra.gmra.mrb[2].mxu1 %vm295_vm1, %v11522_v30  ;;  %v2203_v42 = vpop.permute.xlu0 %2202 }
  0xe6   : > { %v2215_v44 = vsel %vm2214_vm8, %v2203_v42, %v2205_v33  ;;  %v2227_v45 = vsel %vm2214_vm8, %v2213_v41, %v2203_v42  ;;  %2368 = vmatprep.mubr.f32.mxu1 %v12051_v0 }
  0xe7   : > { %2234 = vmatpush1.msra.mxu0 %v2215_v44 }
  0xe8   : > { %11527 = vmatmul.mubr.msk.f32.vlgmr.msra.gmra.mrb[0].mxu0 %vm295_vm1, %v11526_v43  ;;  %2375 = vmatprep.subr.mxu0 %v2227_v45 }
  0xe9   : > { %v2209_v46 = vpop.permute.xlu1 %2208  ;;  %v2211_v47 = vpop.permute.xlu0 %2210  ;;  %2439 = vmatprep.mubr.f32.mxu0 %v12051_v0 }
  0xea   : > { %v2218_v48 = vsel %vm2214_vm8, %v2209_v46, %v2211_v47  ;;  %v2219_v49 = vsel %vm2214_vm8, %v2211_v47, %v2213_v41  ;;  %v2217_v50 = vsel %vm2214_vm8, %v2207_v37, %v2209_v46  ;;  %v11531_v41 = vld [vmem:[%s13451_s2 + $0x50] sm:$0xff] }
  0xeb   : > { %2304 = vmatprep.subr.mxu1 %v2218_v48  ;;  %2376 = vmatpush1.msra.mxu0 %v2219_v49 }
  0xec   : > { %2305 = vmatpush1.msra.mxu1 %v2217_v50  ;;  %11529 = vmatmul.mubr.msk.f32.vlgmr.msra.gmra.mrb[2].mxu0 %vm295_vm1, %v11526_v43 }
  0xed   : > { %11528 = vmatmul.mubr.msk.f32.vlgmr.msra.gmra.mrb[2].mxu1 %vm295_vm1, %v11526_v43  ;;  %4846 = vmatprep.mubr.f32.mxu0 %v12051_v0 }
  0xee   : > { %2603 = vmatprep.mubr.f32.mxu1 %v12051_v0 }
  0xfa   : > { %v2456_v60 = vpop.permute.xlu0 %2455 }
 0x174   : > { %v581_v51 = vpop.f32.mrb[0].mxu1 }
 0x175   : > { %v583_v52 = vpop.f32.mrb[1].mxu1 }
 0x180   : > { %v723_v53 = vpop.f32.mrb[4].mxu1 }
 0x181   : > { %v725_v54 = vpop.f32.mrb[5].mxu1 }
 0x1bb   : > { %v2299_v58 = vpop.f32.mrb[0].mxu0 }
 0x1bc   : > { %v11681_v61 = vadd.f32 %v2299_v58, %v581_v51  ;;  %v2301_v62 = vpop.f32.mrb[1].mxu0 }
 0x1bd   : > { %v11682_v63 = vadd.f32 %v2301_v62, %v583_v52 }
 0x1be   : > { %v2458_v8 = vadd.f32 %v11681_v61, %v2456_v60 }
 0x1bf   : > { %v2459_v2 = vadd.f32 %v11682_v63, %v2456_v60  ;;  %v2441_v1 = vpop.f32.mrb[2].mxu0 }
 0x1c0   : > { %v2464_v3 = vmax.f32 %v2458_v8, 0.0  ;;  %v11683_v5 = vadd.f32 %v2441_v1, %v723_v53  ;;  %v2370_v9 = vpop.f32.mrb[2].mxu1  ;;  %v2443_v10 = vpop.f32.mrb[3].mxu0 }
 0x1c1   : > { %v11684_v12 = vadd.f32 %v2443_v10, %v725_v54  ;;  %v2372_v13 = vpop.f32.mrb[3].mxu1  ;;  %v2465_v14 = vmax.f32 %v2459_v2, 0.0  ;;  %v2460_v17 = vadd.f32 %v2456_v60, %v2370_v9 }
 0x1c2   : > { %v12414_v15 = vmul.f32 %v2464_v3, %v12408_v7  ;;  %v2461_v21 = vadd.f32 %v2456_v60, %v2372_v13  ;;  %v2462_v25 = vadd.f32 %v11683_v5, %v2456_v60  ;;  %v11538_v5 = vld [vmem:[%s13451_s2 + $0x58] sm:$0xff] }
 0x1c3   : > { %v2463_v19 = vadd.f32 %v11684_v12, %v2456_v60  ;;  %v12424_v24 = vmul.f32 %v2465_v14, %v12411_v11  ;;  %v2466_v27 = vmax.f32 %v2460_v17, 0.0 }
 0x1c4   : > { %2512 = vrot.lane.b32.xlu1 %v12414_v15, %s12052_s6  ;;  %v2467_v30 = vmax.f32 %v2461_v21, 0.0  ;;  %v2468_v32 = vmax.f32 %v2462_v25, 0.0  ;;  %v11542_v25 = vld [vmem:[%s13451_s2 + $0x60] sm:$0xff] }
 0x1c5   : > { %v2469_v23 = vmax.f32 %v2463_v19, 0.0  ;;  %v12440_v33 = vmul.f32 %v2466_v27, %v12426_v26 }
 0x1c6   : > { %v12443_v34 = vmul.f32 %v2467_v30, %v12431_v29  ;;  %v12450_v35 = vmul.f32 %v2468_v32, %v12437_v31 }
 0x1c7   : > { %v12429_v28 = vmul.f32 %v2469_v23, %v12417_v18 }
 0x1c8   : > { %2514 = vrot.lane.b32.xlu1 %v12424_v24, %s12052_s6 }
 0x1c9   : > { %2509 = vrot.lane.b32.xlu0 %v12429_v28, %s12052_s6 }
 0x1cc   : > { %2516 = vrot.lane.b32.xlu1 %v12440_v33, %s12052_s6 }
 0x1cd   : > { %2518 = vrot.lane.b32.xlu0 %v12443_v34, %s12052_s6 }
 0x1d0   : > { %2520 = vrot.lane.b32.xlu1 %v12450_v35, %s12052_s6 }
 0x1d1   : > { %2485 = vrot.lane.b32.xlu0 %v12414_v15, %s12053_s7 }
 0x1d4   : > { %2487 = vrot.lane.b32.xlu1 %v12424_v24, %s12053_s7 }
 0x1d5   : > { %2477 = vrot.lane.b32.xlu0 %v12429_v28, %s12053_s7 }
 0x1d8   : > { %2489 = vrot.lane.b32.xlu1 %v12440_v33, %s12053_s7 }
 0x1d9   : > { %2491 = vrot.lane.b32.xlu0 %v12443_v34, %s12053_s7 }
 0x1dc   : > { %2493 = vrot.lane.b32.xlu1 %v12450_v35, %s12053_s7 }
 0x1dd   : > { %2971 = vrot.lane.b32.xlu0 %v12414_v15, %s12054_s8 }
 0x1e0   : > { %2973 = vrot.lane.b32.xlu1 %v12424_v24, %s12054_s8 }
 0x1e1   : > { %2968 = vrot.lane.b32.xlu0 %v12429_v28, %s12054_s8 }
 0x1e4   : > { %2975 = vrot.lane.b32.xlu1 %v12440_v33, %s12054_s8 }
 0x1e5   : > { %2977 = vrot.lane.b32.xlu0 %v12443_v34, %s12054_s8 }
 0x1e8   : > { %2979 = vrot.lane.b32.xlu1 %v12450_v35, %s12054_s8 }
 0x1e9   : > { %3220 = vrot.lane.b32.xlu0 %v12414_v15, %s12055_s9 }
 0x1ec   : > { %3222 = vrot.lane.b32.xlu1 %v12424_v24, %s12055_s9 }
 0x1ed   : > { %3217 = vrot.lane.b32.xlu0 %v12429_v28, %s12055_s9 }
 0x1f0   : > { %3224 = vrot.lane.b32.xlu1 %v12440_v33, %s12055_s9 }
 0x1f1   : > { %3226 = vrot.lane.b32.xlu0 %v12443_v34, %s12055_s9 }
 0x1f4   : > { %3228 = vrot.lane.b32.xlu1 %v12450_v35, %s12055_s9 }
 0x1f5   : > { %3692 = vrot.lane.b32.xlu0 %v12424_v24, %s12056_s10 }
 0x1f8   : > { %3694 = vrot.lane.b32.xlu1 %v12440_v33, %s12056_s10 }
 0x1f9   : > { %3690 = vrot.lane.b32.xlu0 %v12414_v15, %s12056_s10 }
 0x1fc   : > { %3696 = vrot.lane.b32.xlu1 %v12443_v34, %s12056_s10 }
 0x1fd   : > { %3698 = vrot.lane.b32.xlu0 %v12450_v35, %s12056_s10 }
 0x200   : > { %3700 = vrot.lane.b32.xlu1 %v12429_v28, %s12056_s10 }
 0x201   : > { %3941 = vrot.lane.b32.xlu0 %v12424_v24, %s12057_s11 }
 0x204   : > { %3943 = vrot.lane.b32.xlu1 %v12440_v33, %s12057_s11 }
 0x205   : > { %3939 = vrot.lane.b32.xlu0 %v12414_v15, %s12057_s11 }
 0x208   : > { %3945 = vrot.lane.b32.xlu1 %v12443_v34, %s12057_s11 }
 0x209   : > { %3947 = vrot.lane.b32.xlu0 %v12450_v35, %s12057_s11 }
 0x20c   : > { %3949 = vrot.lane.b32.xlu1 %v12429_v28, %s12057_s11 }
 0x20d   : > { %4190 = vrot.lane.b32.xlu0 %v12424_v24, %s12058_s12 }
 0x210   : > { %4192 = vrot.lane.b32.xlu1 %v12440_v33, %s12058_s12 }
 0x211   : > { %4188 = vrot.lane.b32.xlu0 %v12414_v15, %s12058_s12 }
 0x214   : > { %4194 = vrot.lane.b32.xlu1 %v12443_v34, %s12058_s12 }
 0x215   : > { %4196 = vrot.lane.b32.xlu0 %v12450_v35, %s12058_s12 }
 0x218   : > { %4198 = vrot.lane.b32.xlu1 %v12429_v28, %s12058_s12 }
 0x219   : > { %4439 = vrot.lane.b32.xlu0 %v12424_v24, %s12059_s13 }
 0x21c   : > { %4441 = vrot.lane.b32.xlu1 %v12440_v33, %s12059_s13 }
 0x21d   : > { %4437 = vrot.lane.b32.xlu0 %v12414_v15, %s12059_s13 }
 0x220   : > { %4443 = vrot.lane.b32.xlu1 %v12443_v34, %s12059_s13 }
 0x221   : > { %4445 = vrot.lane.b32.xlu0 %v12450_v35, %s12059_s13 }
 0x224   : > { %4447 = vrot.lane.b32.xlu1 %v12429_v28, %s12059_s13 }
 0x225   : > { %4690 = vperm.xlu0 %11985, %v11566_v36  }
 0x236   : > { %v2513_v37 = vpop.permute.xlu1 %2512 }
 0x23a   : > { %v2515_v38 = vpop.permute.xlu1 %2514 }
 0x23b   : > { %v2510_v39 = vpop.permute.xlu0 %2509  ;;  %v2522_v40 = vsel %vm280_vm0, %v2513_v37, %v2515_v38 }
 0x23c   : > { %2539 = vmatprep.subr.mxu1 %v2522_v40  ;;  %v2533_v42 = vsel %vm280_vm0, %v2510_v39, %v2513_v37 }
 0x23d   : > { %2540 = vmatpush1.msra.mxu1 %v2533_v42 }
 0x23e   : > { %v2517_v43 = vpop.permute.xlu1 %2516  ;;  %11532 = vmatmul.mubr.msk.f32.vlgmr.msra.gmra.mrb[6].mxu1 %vm295_vm1, %v11531_v41 }
 0x23f   : > { %v2519_v44 = vpop.permute.xlu0 %2518  ;;  %2674 = vmatprep.mubr.f32.mxu1 %v12051_v0  ;;  %v2523_v46 = vsel %vm280_vm0, %v2515_v38, %v2517_v43 }
 0x240   : > { %v2524_v45 = vsel %vm280_vm0, %v2517_v43, %v2519_v44  ;;  %v11546_v43 = vld [vmem:[%s13451_s2 + $0x68] sm:$0xff] }
 0x241   : > { %2610 = vmatprep.subr.mxu1 %v2524_v45 }
 0x242   : > { %2611 = vmatpush1.msra.mxu1 %v2523_v46  ;;  %v2521_v47 = vpop.permute.xlu1 %2520 }
 0x243   : > { %v2486_v48 = vpop.permute.xlu0 %2485  ;;  %11533 = vmatmul.mubr.msk.f32.vlgmr.msra.gmra.mrb[8].mxu1 %vm295_vm1, %v11531_v41  ;;  %v2526_v49 = vsel %vm280_vm0, %v2521_v47, %v2510_v39  ;;  %v2525_v50 = vsel %vm280_vm0, %v2519_v44, %v2521_v47 }
 0x244   : > { %2681 = vmatprep.subr.mxu1 %v2526_v49  ;;  %2745 = vmatprep.mubr.f32.mxu1 %v12051_v0 }
 0x245   : > { %2682 = vmatpush1.msra.mxu1 %v2525_v50 }
 0x246   : > { %v2488_v51 = vpop.permute.xlu1 %2487 }
 0x247   : > { %v2478_v52 = vpop.permute.xlu0 %2477  ;;  %11534 = vmatmul.mubr.msk.f32.vlgmr.msra.gmra.mrb[10].mxu1 %vm295_vm1, %v11531_v41  ;;  %v2495_v53 = vsel %vm253_vm2, %v2486_v48, %v2488_v51 }
 0x248   : > { %2755 = vmatprep.subr.mxu1 %v2495_v53  ;;  %v2506_v54 = vsel %vm253_vm2, %v2478_v52, %v2486_v48  ;;  %2819 = vmatprep.mubr.f32.mxu1 %v12051_v0  ;;  %v11550_v53 = vld [vmem:[%s13451_s2 + $0x70] sm:$0xff] }
 0x249   : > { %2756 = vmatpush1.msra.mxu1 %v2506_v54 }
 0x24a   : > { %v2490_v58 = vpop.permute.xlu1 %2489 }
 0x24b   : > { %v2492_v59 = vpop.permute.xlu0 %2491  ;;  %11535 = vmatmul.mubr.msk.f32.vlgmr.msra.gmra.mrb[6].mxu1 %vm295_vm1, %v11530_v57  ;;  %v2496_v61 = vsel %vm253_vm2, %v2488_v51, %v2490_v58 }
 0x24c   : > { %v2497_v60 = vsel %vm253_vm2, %v2490_v58, %v2492_v59  ;;  %2890 = vmatprep.mubr.f32.mxu1 %v12051_v0 }
 0x24d   : > { %2826 = vmatprep.subr.mxu1 %v2497_v60 }
 0x24e   : > { %2827 = vmatpush1.msra.mxu1 %v2496_v61  ;;  %v2494_v62 = vpop.permute.xlu1 %2493 }
 0x24f   : > { %v2972_v63 = vpop.permute.xlu0 %2971  ;;  %11536 = vmatmul.mubr.msk.f32.vlgmr.msra.gmra.mrb[8].mxu1 %vm295_vm1, %v11530_v57  ;;  %v2499_v4 = vsel %vm253_vm2, %v2494_v62, %v2478_v52  ;;  %v2498_v8 = vsel %vm253_vm2, %v2492_v59, %v2494_v62 }
 0x250   : > { %2897 = vmatprep.subr.mxu1 %v2499_v4  ;;  %2961 = vmatprep.mubr.f32.mxu1 %v12051_v0 }
 0x251   : > { %2898 = vmatpush1.msra.mxu1 %v2498_v8 }
 0x252   : > { %v2974_v2 = vpop.permute.xlu1 %2973 }
 0x253   : > { %v2969_v1 = vpop.permute.xlu0 %2968  ;;  %11537 = vmatmul.mubr.msk.f32.vlgmr.msra.gmra.mrb[10].mxu1 %vm295_vm1, %v11530_v57  ;;  %v2981_v6 = vsel %vm741_vm3, %v2972_v63, %v2974_v2 }
 0x254   : > { %2998 = vmatprep.subr.mxu1 %v2981_v6  ;;  %v2992_v3 = vsel %vm741_vm3, %v2969_v1, %v2972_v63  ;;  %3062 = vmatprep.mubr.f32.mxu1 %v12051_v0  ;;  %v11554_v6 = vld [vmem:[%s13451_s2 + $0x78] sm:$0xff] }
 0x255   : > { %2999 = vmatpush1.msra.mxu1 %v2992_v3 }
 0x256   : > { %v2976_v9 = vpop.permute.xlu1 %2975 }
 0x257   : > { %v2978_v10 = vpop.permute.xlu0 %2977  ;;  %11539 = vmatmul.mubr.msk.f32.vlgmr.msra.gmra.mrb[6].mxu1 %vm295_vm1, %v11538_v5  ;;  %v2982_v13 = vsel %vm741_vm3, %v2974_v2, %v2976_v9 }
 0x258   : > { %v2983_v12 = vsel %vm741_vm3, %v2976_v9, %v2978_v10  ;;  %3133 = vmatprep.mubr.f32.mxu1 %v12051_v0 }
 0x259   : > { %3069 = vmatprep.subr.mxu1 %v2983_v12 }
 0x25a   : > { %3070 = vmatpush1.msra.mxu1 %v2982_v13  ;;  %v2980_v14 = vpop.permute.xlu1 %2979 }
 0x25b   : > { %v3221_v16 = vpop.permute.xlu0 %3220  ;;  %11540 = vmatmul.mubr.msk.f32.vlgmr.msra.gmra.mrb[8].mxu1 %vm295_vm1, %v11538_v5  ;;  %v2985_v17 = vsel %vm741_vm3, %v2980_v14, %v2969_v1  ;;  %v2984_v19 = vsel %vm741_vm3, %v2978_v10, %v2980_v14 }
 0x25c   : > { %3140 = vmatprep.subr.mxu1 %v2985_v17  ;;  %3204 = vmatprep.mubr.f32.mxu1 %v12051_v0 }
 0x25d   : > { %3141 = vmatpush1.msra.mxu1 %v2984_v19 }
 0x25e   : > { %v3223_v20 = vpop.permute.xlu1 %3222 }
 0x25f   : > { %v3218_v21 = vpop.permute.xlu0 %3217  ;;  %11541 = vmatmul.mubr.msk.f32.vlgmr.msra.gmra.mrb[10].mxu1 %vm295_vm1, %v11538_v5  ;;  %v3230_v22 = vsel %vm991_vm4, %v3221_v16, %v3223_v20 }
 0x260   : > { %3247 = vmatprep.subr.mxu1 %v3230_v22  ;;  %v3241_v23 = vsel %vm991_vm4, %v3218_v21, %v3221_v16  ;;  %3311 = vmatprep.mubr.f32.mxu1 %v12051_v0 }
 0x261   : > { %3248 = vmatpush1.msra.mxu1 %v3241_v23 }
 0x262   : > { %v3225_v27 = vpop.permute.xlu1 %3224 }
 0x263   : > { %v3227_v30 = vpop.permute.xlu0 %3226  ;;  %11543 = vmatmul.mubr.msk.f32.vlgmr.msra.gmra.mrb[6].mxu1 %vm295_vm1, %v11542_v25  ;;  %v3231_v36 = vsel %vm991_vm4, %v3223_v20, %v3225_v27  ;;  %v11558_v20 = vld [vmem:[%s13451_s2 + $0x80] sm:$0xff] }
 0x264   : > { %v3232_v32 = vsel %vm991_vm4, %v3225_v27, %v3227_v30  ;;  %3382 = vmatprep.mubr.f32.mxu1 %v12051_v0 }
 0x265   : > { %3318 = vmatprep.subr.mxu1 %v3232_v32 }
 0x266   : > { %3319 = vmatpush1.msra.mxu1 %v3231_v36  ;;  %v3229_v37 = vpop.permute.xlu1 %3228 }
 0x267   : > { %v3693_v38 = vpop.permute.xlu0 %3692  ;;  %11544 = vmatmul.mubr.msk.f32.vlgmr.msra.gmra.mrb[8].mxu1 %vm295_vm1, %v11542_v25  ;;  %v3234_v39 = vsel %vm991_vm4, %v3229_v37, %v3218_v21  ;;  %v3233_v40 = vsel %vm991_vm4, %v3227_v30, %v3229_v37 }
 0x268   : > { %3389 = vmatprep.subr.mxu1 %v3234_v39  ;;  %3453 = vmatprep.mubr.f32.mxu1 %v12051_v0  ;;  %v11562_v39 = vld [vmem:[%s13451_s2 + $0x88] sm:$0xff] }
 0x269   : > { %3390 = vmatpush1.msra.mxu1 %v3233_v40 }
 0x26a   : > { %3471 = vmatprep.subr.mxu1 %v12424_v24  ;;  %v3695_v41 = vpop.permute.xlu1 %3694 }
 0x26b   : > { %v3691_v42 = vpop.permute.xlu0 %3690  ;;  %11545 = vmatmul.mubr.msk.f32.vlgmr.msra.gmra.mrb[10].mxu1 %vm295_vm1, %v11542_v25  ;;  %v3703_v48 = vsel %vm1464_vm5, %v3693_v38, %v3695_v41 }
 0x26c   : > { %3472 = vmatpush1.msra.mxu1 %v12414_v15  ;;  %3535 = vmatprep.mubr.f32.mxu1 %v12051_v0  ;;  %v3702_v51 = vsel %vm1464_vm5, %v3691_v42, %v3693_v38 }
 0x26d   : > { %3542 = vmatprep.subr.mxu1 %v12443_v34 }
 0x26e   : > { %v3697_v44 = vpop.permute.xlu1 %3696 }
 0x26f   : > { %v3699_v45 = vpop.permute.xlu0 %3698  ;;  %11547 = vmatmul.mubr.msk.f32.vlgmr.msra.gmra.mrb[6].mxu1 %vm295_vm1, %v11546_v43  ;;  %v3704_v58 = vsel %vm1464_vm5, %v3695_v41, %v3697_v44 }
 0x270   : > { %3543 = vmatpush1.msra.mxu1 %v12440_v33  ;;  %3606 = vmatprep.mubr.f32.mxu1 %v12051_v0  ;;  %v3705_v52 = vsel %vm1464_vm5, %v3697_v44, %v3699_v45 }
 0x271   : > { %3613 = vmatprep.subr.mxu1 %v12429_v28 }
 0x272   : > { %v3701_v46 = vpop.permute.xlu1 %3700 }
 0x273   : > { %v3942_v47 = vpop.permute.xlu0 %3941  ;;  %11548 = vmatmul.mubr.msk.f32.vlgmr.msra.gmra.mrb[8].mxu1 %vm295_vm1, %v11546_v43  ;;  %v3714_v59 = vsel %vm1464_vm5, %v3701_v46, %v3691_v42  ;;  %v3706_v62 = vsel %vm1464_vm5, %v3699_v45, %v3701_v46 }
 0x274   : > { %3614 = vmatpush1.msra.mxu1 %v12450_v35  ;;  %3677 = vmatprep.mubr.f32.mxu1 %v12051_v0 }
 0x275   : > { %3720 = vmatprep.subr.mxu1 %v3703_v48 }
 0x276   : > { %v3944_v49 = vpop.permute.xlu1 %3943 }
 0x277   : > { %v3940_v50 = vpop.permute.xlu0 %3939  ;;  %11549 = vmatmul.mubr.msk.f32.vlgmr.msra.gmra.mrb[10].mxu1 %vm295_vm1, %v11546_v43  ;;  %v3952_v63 = vsel %vm1714_vm6, %v3942_v47, %v3944_v49 }
 0x278   : > { %3721 = vmatpush1.msra.mxu1 %v3702_v51  ;;  %3784 = vmatprep.mubr.f32.mxu1 %v12051_v0  ;;  %v3951_v2 = vsel %vm1714_vm6, %v3940_v50, %v3942_v47 }
 0x279   : > { %3791 = vmatprep.subr.mxu1 %v3705_v52 }
 0x27a   : > { %v3946_v54 = vpop.permute.xlu1 %3945 }
 0x27b   : > { %v3948_v57 = vpop.permute.xlu0 %3947  ;;  %11551 = vmatmul.mubr.msk.f32.vlgmr.msra.gmra.mrb[6].mxu1 %vm295_vm1, %v11550_v53  ;;  %v3953_v9 = vsel %vm1714_vm6, %v3944_v49, %v3946_v54 }
 0x27c   : > { %3792 = vmatpush1.msra.mxu1 %v3704_v58  ;;  %3855 = vmatprep.mubr.f32.mxu1 %v12051_v0  ;;  %v3954_v1 = vsel %vm1714_vm6, %v3946_v54, %v3948_v57 }
 0x27d   : > { %3862 = vmatprep.subr.mxu1 %v3714_v59 }
 0x27e   : > { %v3950_v60 = vpop.permute.xlu1 %3949 }
 0x27f   : > { %v4191_v61 = vpop.permute.xlu0 %4190  ;;  %11552 = vmatmul.mubr.msk.f32.vlgmr.msra.gmra.mrb[8].mxu1 %vm295_vm1, %v11550_v53  ;;  %v3963_v10 = vsel %vm1714_vm6, %v3950_v60, %v3940_v50  ;;  %v3955_v13 = vsel %vm1714_vm6, %v3948_v57, %v3950_v60 }
 0x280   : > { %3863 = vmatpush1.msra.mxu1 %v3706_v62  ;;  %3926 = vmatprep.mubr.f32.mxu1 %v12051_v0 }
 0x281   : > { %3969 = vmatprep.subr.mxu1 %v3952_v63 }
 0x282   : > { %v4193_v4 = vpop.permute.xlu1 %4192 }
 0x283   : > { %v4189_v8 = vpop.permute.xlu0 %4188  ;;  %11553 = vmatmul.mubr.msk.f32.vlgmr.msra.gmra.mrb[10].mxu1 %vm295_vm1, %v11550_v53  ;;  %v4201_v14 = vsel %vm1964_vm7, %v4191_v61, %v4193_v4 }
 0x284   : > { %3970 = vmatpush1.msra.mxu1 %v3951_v2  ;;  %4033 = vmatprep.mubr.f32.mxu1 %v12051_v0  ;;  %v4200_v17 = vsel %vm1964_vm7, %v4189_v8, %v4191_v61 }
 0x285   : > { %4040 = vmatprep.subr.mxu1 %v3954_v1 }
 0x286   : > { %v4195_v3 = vpop.permute.xlu1 %4194 }
 0x287   : > { %v4197_v5 = vpop.permute.xlu0 %4196  ;;  %11555 = vmatmul.mubr.msk.f32.vlgmr.msra.gmra.mrb[6].mxu1 %vm295_vm1, %v11554_v6  ;;  %v4202_v23 = vsel %vm1964_vm7, %v4193_v4, %v4195_v3 }
 0x288   : > { %4041 = vmatpush1.msra.mxu1 %v3953_v9  ;;  %4104 = vmatprep.mubr.f32.mxu1 %v12051_v0  ;;  %v4203_v19 = vsel %vm1964_vm7, %v4195_v3, %v4197_v5 }
 0x289   : > { %4111 = vmatprep.subr.mxu1 %v3963_v10 }
 0x28a   : > { %v4199_v12 = vpop.permute.xlu1 %4198 }
 0x28b   : > { %11556 = vmatmul.mubr.msk.f32.vlgmr.msra.gmra.mrb[8].mxu1 %vm295_vm1, %v11554_v6  ;;  %v4440_v16 = vpop.permute.xlu0 %4439  ;;  %v4212_v25 = vsel %vm1964_vm7, %v4199_v12, %v4189_v8  ;;  %v4204_v30 = vsel %vm1964_vm7, %v4197_v5, %v4199_v12 }
 0x28c   : > { %4112 = vmatpush1.msra.mxu1 %v3955_v13  ;;  %4175 = vmatprep.mubr.f32.mxu1 %v12051_v0 }
 0x28d   : > { %4218 = vmatprep.subr.mxu1 %v4201_v14 }
 0x28e   : > { %v4442_v21 = vpop.permute.xlu1 %4441 }
 0x28f   : > { %11557 = vmatmul.mubr.msk.f32.vlgmr.msra.gmra.mrb[10].mxu1 %vm295_vm1, %v11554_v6  ;;  %v4438_v22 = vpop.permute.xlu0 %4437  ;;  %v4450_v32 = vsel %vm2214_vm8, %v4440_v16, %v4442_v21 }
 0x290   : > { %4219 = vmatpush1.msra.mxu1 %v4200_v17  ;;  %4282 = vmatprep.mubr.f32.mxu1 %v12051_v0  ;;  %v4449_v37 = vsel %vm2214_vm8, %v4438_v22, %v4440_v16 }
 0x291   : > { %4289 = vmatprep.subr.mxu1 %v4203_v19  ;;  %v11568_v19 = vld [vmem:[%s13451_s2 + $0x98] sm:$0xff] }
 0x292   : > { %v4444_v27 = vpop.permute.xlu1 %4443 }
 0x293   : > { %11559 = vmatmul.mubr.msk.f32.vlgmr.msra.gmra.mrb[6].mxu1 %vm295_vm1, %v11558_v20  ;;  %v4446_v36 = vpop.permute.xlu0 %4445  ;;  %v4451_v41 = vsel %vm2214_vm8, %v4442_v21, %v4444_v27 }
 0x294   : > { %4290 = vmatpush1.msra.mxu1 %v4202_v23  ;;  %4353 = vmatprep.mubr.f32.mxu1 %v12051_v0  ;;  %v4452_v38 = vsel %vm2214_vm8, %v4444_v27, %v4446_v36 }
 0x295   : > { %4360 = vmatprep.subr.mxu1 %v4212_v25 }
 0x296   : > { %v4448_v40 = vpop.permute.xlu1 %4447 }
 0x297   : > { %11560 = vmatmul.mubr.msk.f32.vlgmr.msra.gmra.mrb[8].mxu1 %vm295_vm1, %v11558_v20  ;;  %v4461_v42 = vsel %vm2214_vm8, %v4448_v40, %v4438_v22  ;;  %v4453_v43 = vsel %vm2214_vm8, %v4446_v36, %v4448_v40 }
 0x298   : > { %4361 = vmatpush1.msra.mxu1 %v4204_v30  ;;  %4424 = vmatprep.mubr.f32.mxu1 %v12051_v0 }
 0x299   : > { %4467 = vmatprep.subr.mxu1 %v4450_v32 }
 0x29b   : > { %11561 = vmatmul.mubr.msk.f32.vlgmr.msra.gmra.mrb[10].mxu1 %vm295_vm1, %v11558_v20 }
 0x29c   : > { %4468 = vmatpush1.msra.mxu1 %v4449_v37  ;;  %4531 = vmatprep.mubr.f32.mxu1 %v12051_v0 }
 0x29d   : > { %4538 = vmatprep.subr.mxu1 %v4452_v38 }
 0x29f   : > { %11563 = vmatmul.mubr.msk.f32.vlgmr.msra.gmra.mrb[6].mxu1 %vm295_vm1, %v11562_v39 }
 0x2a0   : > { %4539 = vmatpush1.msra.mxu1 %v4451_v41  ;;  %4602 = vmatprep.mubr.f32.mxu1 %v12051_v0  ;;  %v11567_v41 = vld [vmem:[%s13451_s2 + $0x90] sm:$0xff] }
 0x2a1   : > { %4609 = vmatprep.subr.mxu1 %v4461_v42 }
 0x2a3   : > { %11564 = vmatmul.mubr.msk.f32.vlgmr.msra.gmra.mrb[8].mxu1 %vm295_vm1, %v11562_v39 }
 0x2a4   : > { %4610 = vmatpush1.msra.mxu1 %v4453_v43  ;;  %4673 = vmatprep.mubr.f32.mxu1 %v12051_v0  ;;  %v4691_v44 = vpop.permute.xlu0 %4690 }
 0x2a7   : > { %11565 = vmatmul.mubr.msk.f32.vlgmr.msra.gmra.mrb[10].mxu1 %vm295_vm1, %v11562_v39 }
 0x2a8   : > { %7016 = vmatprep.mubr.f32.mxu1 %v12051_v0 }
 0x372   : > { %v4533_v45 = vpop.f32.mrb[6].mxu1 }
 0x373   : > { %v4693_v46 = vadd.f32 %v4691_v44, %v4533_v45  ;;  %v4535_v47 = vpop.f32.mrb[7].mxu1 }
 0x374   : > { %v4694_v48 = vadd.f32 %v4691_v44, %v4535_v47 }
 0x375   : > { %v4699_v49 = vmax.f32 %v4693_v46, 0.0 }
 0x376   : > { %v4700_v50 = vmax.f32 %v4694_v48, 0.0  ;;  %v4604_v51 = vpop.f32.mrb[8].mxu1 }
 0x377   : > { %v4705_v52 = vadd.f32 %v4699_v49, %v12414_v15  ;;  %v4695_v53 = vadd.f32 %v4691_v44, %v4604_v51  ;;  %v4606_v54 = vpop.f32.mrb[9].mxu1 }
 0x378   : > { %v4706_v57 = vadd.f32 %v4700_v50, %v12424_v24  ;;  %v4696_v61 = vadd.f32 %v4691_v44, %v4606_v54  ;;  %v11575_v54 = vld [vmem:[%s13451_s2 + $0xa0] sm:$0xff] }
 0x379   : > { %v12679_v58 = vmul.f32 %v4705_v52, %v12408_v7  ;;  %v4701_v59 = vmax.f32 %v4695_v53, 0.0 }
 0x37a   : > { %v12682_v60 = vmul.f32 %v4706_v57, %v12411_v11  ;;  %v4675_v62 = vpop.f32.mrb[10].mxu1  ;;  %v4702_v1 = vmax.f32 %v4696_v61, 0.0 }
 0x37b   : > { %v4707_v63 = vadd.f32 %v4701_v59, %v12440_v33  ;;  %v4697_v4 = vadd.f32 %v4691_v44, %v4675_v62  ;;  %4754 = vrot.lane.b32.xlu1 %v12679_v58, %s12061_s29  ;;  %v4677_v15 = vpop.f32.mrb[11].mxu1 }
 0x37c   : > { %v4698_v8 = vadd.f32 %v4691_v44, %v4677_v15  ;;  %4756 = vrot.lane.b32.xlu0 %v12682_v60, %s12061_s29  ;;  %v4708_v9 = vadd.f32 %v4702_v1, %v12443_v34 }
 0x37d   : > { %v12688_v24 = vmul.f32 %v4707_v63, %v12426_v26  ;;  %v4703_v2 = vmax.f32 %v4697_v4, 0.0 }
 0x37e   : > { %v4704_v6 = vmax.f32 %v4698_v8, 0.0  ;;  %v12703_v12 = vmul.f32 %v4708_v9, %v12431_v29 }
 0x37f   : > { %v4709_v3 = vadd.f32 %v4703_v2, %v12450_v35 }
 0x380   : > { %v4710_v5 = vadd.f32 %v4704_v6, %v12429_v28  ;;  %4758 = vrot.lane.b32.xlu0 %v12688_v24, %s12061_s29  ;;  %v11603_v28 = vld [vmem:[%s13452_s3 + $0x10] sm:$0xff] }
 0x381   : > { %v12694_v33 = vmul.f32 %v4709_v3, %v12437_v31  ;;  %v11579_v3 = vld [vmem:[%s13451_s2 + $0xa8] sm:$0xff] }
 0x382   : > { %v12698_v10 = vmul.f32 %v4710_v5, %v12417_v18 }
 0x384   : > { %4762 = vrot.lane.b32.xlu0 %v12694_v33, %s12061_s29  ;;  %4751 = vrot.lane.b32.xlu1 %v12698_v10, %s12061_s29 }
 0x388   : > { %4728 = vrot.lane.b32.xlu0 %v12682_v60, %s12062_s30  ;;  %4760 = vrot.lane.b32.xlu1 %v12703_v12, %s12061_s29  ;;  %s12068_s29 = smov 3  }
 0x38c   : > { %4730 = vrot.lane.b32.xlu0 %v12688_v24, %s12062_s30  ;;  %4726 = vrot.lane.b32.xlu1 %v12679_v58, %s12062_s30 }
 0x390   : > { %4734 = vrot.lane.b32.xlu0 %v12694_v33, %s12062_s30  ;;  %4718 = vrot.lane.b32.xlu1 %v12698_v10, %s12062_s30 }
 0x394   : > { %5216 = vrot.lane.b32.xlu0 %v12682_v60, %s12063_s5  ;;  %4732 = vrot.lane.b32.xlu1 %v12703_v12, %s12062_s30  ;;  %s12069_s30 = smov 125  }
 0x398   : > { %5218 = vrot.lane.b32.xlu0 %v12688_v24, %s12063_s5  ;;  %5214 = vrot.lane.b32.xlu1 %v12679_v58, %s12063_s5 }
 0x39c   : > { %5222 = vrot.lane.b32.xlu0 %v12694_v33, %s12063_s5  ;;  %5211 = vrot.lane.b32.xlu1 %v12698_v10, %s12063_s5 }
 0x3a0   : > { %5466 = vrot.lane.b32.xlu0 %v12682_v60, %s12064_s14  ;;  %5220 = vrot.lane.b32.xlu1 %v12703_v12, %s12063_s5  ;;  %s12070_s5 = smov 35  }
 0x3a4   : > { %5468 = vrot.lane.b32.xlu0 %v12688_v24, %s12064_s14  ;;  %5464 = vrot.lane.b32.xlu1 %v12679_v58, %s12064_s14 }
 0x3a8   : > { %5472 = vrot.lane.b32.xlu0 %v12694_v33, %s12064_s14  ;;  %5461 = vrot.lane.b32.xlu1 %v12698_v10, %s12064_s14 }
 0x3ac   : > { %5939 = vrot.lane.b32.xlu0 %v12688_v24, %s12065_s20  ;;  %5470 = vrot.lane.b32.xlu1 %v12703_v12, %s12064_s14  ;;  %s12071_s14 = smov 29  }
 0x3b0   : > { %5941 = vrot.lane.b32.xlu0 %v12703_v12, %s12065_s20  ;;  %5937 = vrot.lane.b32.xlu1 %v12682_v60, %s12065_s20 }
 0x3b4   : > { %5945 = vrot.lane.b32.xlu0 %v12698_v10, %s12065_s20  ;;  %5935 = vrot.lane.b32.xlu1 %v12679_v58, %s12065_s20 }
 0x3b8   : > { %5943 = vrot.lane.b32.xlu1 %v12694_v33, %s12065_s20 }
 0x3bc   : > { %6861 = vperm.xlu1 %11986, %v11603_v28  }
 0x3ed   : > { %v4755_v34 = vpop.permute.xlu1 %4754 }
 0x3ee   : > { %v4757_v35 = vpop.permute.xlu0 %4756 }
 0x3ef   : > { %v12734_v13 = vsel %vm4764_vm9, %v4755_v34, %v4757_v35 }
 0x3f0   : > { %4782 = vmatprep.subr.mxu0 %v12734_v13 }
 0x3f2   : > { %v4759_v14 = vpop.permute.xlu0 %4758 }
 0x3f3   : > { %v12751_v25 = vsel %vm4764_vm9, %v4757_v35, %v4759_v14 }
 0x3f6   : > { %v4763_v16 = vpop.permute.xlu0 %4762  ;;  %v4752_v17 = vpop.permute.xlu1 %4751 }
 0x3f7   : > { %v12741_v20 = vsel %vm4764_vm9, %v4752_v17, %v4755_v34  ;;  %v12755_v27 = vsel %vm4764_vm9, %v4763_v16, %v4752_v17  ;;  %v11583_v17 = vld [vmem:[%s13451_s2 + $0xb0] sm:$0xff] }
 0x3f8   : > { %4783 = vmatpush1.msra.mxu0 %v12741_v20 }
 0x3f9   : > { %11569 = vmatmul.mubr.msk.f32.vlgmr.msra.gmra.mrb[4].mxu0 %vm295_vm1, %v11568_v19 }
 0x3fa   : > { %v4729_v21 = vpop.permute.xlu0 %4728  ;;  %v4761_v22 = vpop.permute.xlu1 %4760  ;;  %4917 = vmatprep.mubr.f32.mxu0 %v12051_v0 }
 0x3fb   : > { %v12747_v23 = vsel %vm4764_vm9, %v4759_v14, %v4761_v22  ;;  %v12760_v36 = vsel %vm4764_vm9, %v4761_v22, %v4763_v16  ;;  %vm7644_vm9 = vcmask 23552  }
 0x3fc   : > { %4853 = vmatprep.subr.mxu0 %v12747_v23 }
 0x3fd   : > { %4854 = vmatpush1.msra.mxu0 %v12751_v25 }
 0x3fe   : > { %v4731_v30 = vpop.permute.xlu0 %4730  ;;  %11570 = vmatmul.mubr.msk.f32.vlgmr.msra.gmra.mrb[6].mxu0 %vm295_vm1, %v11568_v19  ;;  %4924 = vmatprep.subr.mxu0 %v12755_v27  ;;  %v4727_v32 = vpop.permute.xlu1 %4726 }
 0x3ff   : > { %4925 = vmatpush1.msra.mxu0 %v12760_v36  ;;  %v12764_v37 = vsel %vm4736_vm10, %v4727_v32, %v4729_v21  ;;  %4988 = vmatprep.mubr.f32.mxu0 %v12051_v0  ;;  %v12784_v45 = vsel %vm4736_vm10, %v4729_v21, %v4731_v30 }
 0x400   : > { %4998 = vmatprep.subr.mxu0 %v12764_v37 }
 0x402   : > { %v4735_v38 = vpop.permute.xlu0 %4734  ;;  %11571 = vmatmul.mubr.msk.f32.vlgmr.msra.gmra.mrb[8].mxu0 %vm295_vm1, %v11568_v19  ;;  %v4719_v39 = vpop.permute.xlu1 %4718 }
 0x403   : > { %v12770_v40 = vsel %vm4736_vm10, %v4719_v39, %v4727_v32  ;;  %5062 = vmatprep.mubr.f32.mxu0 %v12051_v0  ;;  %v12788_v46 = vsel %vm4736_vm10, %v4735_v38, %v4719_v39 }
 0x404   : > { %4999 = vmatpush1.msra.mxu0 %v12770_v40 }
 0x406   : > { %v5217_v42 = vpop.permute.xlu0 %5216  ;;  %11572 = vmatmul.mubr.msk.f32.vlgmr.msra.gmra.mrb[4].mxu0 %vm295_vm1, %v11567_v41  ;;  %v4733_v43 = vpop.permute.xlu1 %4732 }
 0x407   : > { %v12779_v44 = vsel %vm4736_vm10, %v4731_v30, %v4733_v43  ;;  %5133 = vmatprep.mubr.f32.mxu0 %v12051_v0  ;;  %v12793_v49 = vsel %vm4736_vm10, %v4733_v43, %v4735_v38  ;;  %vm8117_vm10 = vcmask 1022976  }
 0x408   : > { %5069 = vmatprep.subr.mxu0 %v12779_v44 }
 0x409   : > { %5070 = vmatpush1.msra.mxu0 %v12784_v45 }
 0x40a   : > { %v5219_v47 = vpop.permute.xlu0 %5218  ;;  %11573 = vmatmul.mubr.msk.f32.vlgmr.msra.gmra.mrb[6].mxu0 %vm295_vm1, %v11567_v41  ;;  %5140 = vmatprep.subr.mxu0 %v12788_v46  ;;  %v5215_v48 = vpop.permute.xlu1 %5214 }
 0x40b   : > { %5141 = vmatpush1.msra.mxu0 %v12793_v49  ;;  %v12797_v50 = vsel %vm5224_vm11, %v5215_v48, %v5217_v42  ;;  %5204 = vmatprep.mubr.f32.mxu0 %v12051_v0  ;;  %v12817_v62 = vsel %vm5224_vm11, %v5217_v42, %v5219_v47 }
 0x40c   : > { %5242 = vmatprep.subr.mxu0 %v12797_v50 }
 0x40e   : > { %v5223_v51 = vpop.permute.xlu0 %5222  ;;  %11574 = vmatmul.mubr.msk.f32.vlgmr.msra.gmra.mrb[8].mxu0 %vm295_vm1, %v11567_v41  ;;  %v5212_v52 = vpop.permute.xlu1 %5211  ;;  %v11587_v41 = vld [vmem:[%s13451_s2 + $0xb8] sm:$0xff] }
 0x40f   : > { %v12803_v53 = vsel %vm5224_vm11, %v5212_v52, %v5215_v48  ;;  %5306 = vmatprep.mubr.f32.mxu0 %v12051_v0  ;;  %v12821_v63 = vsel %vm5224_vm11, %v5223_v51, %v5212_v52 }
 0x410   : > { %5243 = vmatpush1.msra.mxu0 %v12803_v53 }
 0x412   : > { %v5467_v57 = vpop.permute.xlu0 %5466  ;;  %11576 = vmatmul.mubr.msk.f32.vlgmr.msra.gmra.mrb[4].mxu0 %vm295_vm1, %v11575_v54  ;;  %v5221_v59 = vpop.permute.xlu1 %5220 }
 0x413   : > { %v12812_v61 = vsel %vm5224_vm11, %v5219_v47, %v5221_v59  ;;  %5377 = vmatprep.mubr.f32.mxu0 %v12051_v0  ;;  %v12826_v15 = vsel %vm5224_vm11, %v5221_v59, %v5223_v51  ;;  %v11591_v51 = vld [vmem:[%s13451_s2 + $0xc0] sm:$0xff]  ;;  %vm8367_vm11 = vcmask 285696  }
 0x414   : > { %5313 = vmatprep.subr.mxu0 %v12812_v61 }
 0x415   : > { %5314 = vmatpush1.msra.mxu0 %v12817_v62 }
 0x416   : > { %11577 = vmatmul.mubr.msk.f32.vlgmr.msra.gmra.mrb[6].mxu0 %vm295_vm1, %v11575_v54  ;;  %5384 = vmatprep.subr.mxu0 %v12821_v63  ;;  %v5465_v4 = vpop.permute.xlu1 %5464  ;;  %v5469_v2 = vpop.permute.xlu0 %5468 }
 0x417   : > { %5385 = vmatpush1.msra.mxu0 %v12826_v15  ;;  %v5475_v8 = vsel %vm5474_vm12, %v5465_v4, %v5467_v57  ;;  %5448 = vmatprep.mubr.f32.mxu0 %v12051_v0  ;;  %v5476_v34 = vsel %vm5474_vm12, %v5467_v57, %v5469_v2 }
 0x418   : > { %5492 = vmatprep.subr.mxu0 %v5475_v8 }
 0x41a   : > { %11578 = vmatmul.mubr.msk.f32.vlgmr.msra.gmra.mrb[8].mxu0 %vm295_vm1, %v11575_v54  ;;  %v5462_v1 = vpop.permute.xlu1 %5461  ;;  %v5473_v5 = vpop.permute.xlu0 %5472 }
 0x41b   : > { %v5486_v6 = vsel %vm5474_vm12, %v5462_v1, %v5465_v4  ;;  %5556 = vmatprep.mubr.f32.mxu0 %v12051_v0  ;;  %v5479_v35 = vsel %vm5474_vm12, %v5473_v5, %v5462_v1 }
 0x41c   : > { %5493 = vmatpush1.msra.mxu0 %v5486_v6 }
 0x41e   : > { %11580 = vmatmul.mubr.msk.f32.vlgmr.msra.gmra.mrb[4].mxu0 %vm295_vm1, %v11579_v3  ;;  %v5471_v9 = vpop.permute.xlu1 %5470  ;;  %v5940_v19 = vpop.permute.xlu0 %5939 }
 0x41f   : > { %v5477_v28 = vsel %vm5474_vm12, %v5469_v2, %v5471_v9  ;;  %5627 = vmatprep.mubr.f32.mxu0 %v12051_v0  ;;  %v5478_v14 = vsel %vm5474_vm12, %v5471_v9, %v5473_v5  ;;  %vm8866_vm12 = vcmask 236544  }
 0x420   : > { %5563 = vmatprep.subr.mxu0 %v5477_v28 }
 0x421   : > { %5564 = vmatpush1.msra.mxu0 %v5476_v34 }
 0x422   : > { %11581 = vmatmul.mubr.msk.f32.vlgmr.msra.gmra.mrb[6].mxu0 %vm295_vm1, %v11579_v3  ;;  %5634 = vmatprep.subr.mxu0 %v5479_v35  ;;  %v5938_v16 = vpop.permute.xlu1 %5937  ;;  %v5942_v22 = vpop.permute.xlu0 %5941 }
 0x423   : > { %5635 = vmatpush1.msra.mxu0 %v5478_v14  ;;  %5698 = vmatprep.mubr.f32.mxu0 %v12051_v0  ;;  %v5949_v30 = vsel %vm5947_vm13, %v5938_v16, %v5940_v19  ;;  %v5950_v43 = vsel %vm5947_vm13, %v5940_v19, %v5942_v22 }
 0x424   : > { %5716 = vmatprep.subr.mxu0 %v12682_v60 }
 0x426   : > { %11582 = vmatmul.mubr.msk.f32.vlgmr.msra.gmra.mrb[8].mxu0 %vm295_vm1, %v11579_v3  ;;  %v5936_v21 = vpop.permute.xlu1 %5935  ;;  %v5946_v42 = vpop.permute.xlu0 %5945 }
 0x427   : > { %5717 = vmatpush1.msra.mxu0 %v12679_v58  ;;  %5780 = vmatprep.mubr.f32.mxu0 %v12051_v0  ;;  %v5948_v38 = vsel %vm5947_vm13, %v5936_v21, %v5938_v16  ;;  %v5960_v47 = vsel %vm5947_vm13, %v5946_v42, %v5936_v21  ;;  %v11605_v16 = vld [vmem:[%s13451_s2 + $0xe0] sm:$0xff] }
 0x428   : > { %5787 = vmatprep.subr.mxu0 %v12703_v12 }
 0x42a   : > { %11584 = vmatmul.mubr.msk.f32.vlgmr.msra.gmra.mrb[4].mxu0 %vm295_vm1, %v11583_v17  ;;  %v5944_v32 = vpop.permute.xlu1 %5943 }
 0x42b   : > { %5788 = vmatpush1.msra.mxu0 %v12688_v24  ;;  %5851 = vmatprep.mubr.f32.mxu0 %v12051_v0  ;;  %v5951_v39 = vsel %vm5947_vm13, %v5942_v22, %v5944_v32  ;;  %v5952_v48 = vsel %vm5947_vm13, %v5944_v32, %v5946_v42 }
 0x42c   : > { %5858 = vmatprep.subr.mxu0 %v12698_v10 }
 0x42e   : > { %11585 = vmatmul.mubr.msk.f32.vlgmr.msra.gmra.mrb[6].mxu0 %vm295_vm1, %v11583_v17 }
 0x42f   : > { %5859 = vmatpush1.msra.mxu0 %v12694_v33  ;;  %5922 = vmatprep.mubr.f32.mxu0 %v12051_v0 }
 0x430   : > { %5966 = vmatprep.subr.mxu0 %v5949_v30 }
 0x432   : > { %11586 = vmatmul.mubr.msk.f32.vlgmr.msra.gmra.mrb[8].mxu0 %vm295_vm1, %v11583_v17 }
 0x433   : > { %5967 = vmatpush1.msra.mxu0 %v5948_v38  ;;  %6030 = vmatprep.mubr.f32.mxu0 %v12051_v0 }
 0x434   : > { %6037 = vmatprep.subr.mxu0 %v5951_v39 }
 0x436   : > { %11588 = vmatmul.mubr.msk.f32.vlgmr.msra.gmra.mrb[4].mxu0 %vm295_vm1, %v11587_v41 }
 0x437   : > { %6038 = vmatpush1.msra.mxu0 %v5950_v43  ;;  %6101 = vmatprep.mubr.f32.mxu0 %v12051_v0 }
 0x438   : > { %6108 = vmatprep.subr.mxu0 %v5960_v47 }
 0x43a   : > { %11589 = vmatmul.mubr.msk.f32.vlgmr.msra.gmra.mrb[6].mxu0 %vm295_vm1, %v11587_v41 }
 0x43b   : > { %6109 = vmatpush1.msra.mxu0 %v5952_v48  ;;  %6172 = vmatprep.mubr.f32.mxu0 %v12051_v0 }
 0x43c   : > { %6190 = vmatprep.subr.mxu0 %v12784_v45 }
 0x43e   : > { %11590 = vmatmul.mubr.msk.f32.vlgmr.msra.gmra.mrb[8].mxu0 %vm295_vm1, %v11587_v41 }
 0x43f   : > { %6191 = vmatpush1.msra.mxu0 %v12764_v37  ;;  %6254 = vmatprep.mubr.f32.mxu0 %v12051_v0  ;;  %v11595_v37 = vld [vmem:[%s13451_s2 + $0xc8] sm:$0xff] }
 0x440   : > { %6261 = vmatprep.subr.mxu0 %v12793_v49 }
 0x442   : > { %11592 = vmatmul.mubr.msk.f32.vlgmr.msra.gmra.mrb[4].mxu0 %vm295_vm1, %v11591_v51 }
 0x443   : > { %6262 = vmatpush1.msra.mxu0 %v12779_v44  ;;  %6325 = vmatprep.mubr.f32.mxu0 %v12051_v0 }
 0x444   : > { %6332 = vmatprep.subr.mxu0 %v12770_v40 }
 0x446   : > { %11593 = vmatmul.mubr.msk.f32.vlgmr.msra.gmra.mrb[6].mxu0 %vm295_vm1, %v11591_v51 }
 0x447   : > { %6333 = vmatpush1.msra.mxu0 %v12788_v46  ;;  %6396 = vmatprep.mubr.f32.mxu0 %v12051_v0 }
 0x448   : > { %6414 = vmatprep.subr.mxu0 %v12751_v25 }
 0x44a   : > { %11594 = vmatmul.mubr.msk.f32.vlgmr.msra.gmra.mrb[8].mxu0 %vm295_vm1, %v11591_v51  ;;  %v11604_v51 = vld [vmem:[%s13451_s2 + $0xd8] sm:$0xff] }
 0x44b   : > { %6415 = vmatpush1.msra.mxu0 %v12734_v13  ;;  %6478 = vmatprep.mubr.f32.mxu0 %v12051_v0  ;;  %v11599_v13 = vld [vmem:[%s13451_s2 + $0xd0] sm:$0xff] }
 0x44c   : > { %6485 = vmatprep.subr.mxu0 %v12760_v36 }
 0x44e   : > { %11596 = vmatmul.mubr.msk.f32.vlgmr.msra.gmra.mrb[4].mxu0 %vm295_vm1, %v11595_v37 }
 0x44f   : > { %6486 = vmatpush1.msra.mxu0 %v12747_v23  ;;  %6549 = vmatprep.mubr.f32.mxu0 %v12051_v0 }
 0x450   : > { %6556 = vmatprep.subr.mxu0 %v12741_v20  ;;  %v6862_v20 = vpop.permute.xlu1 %6861 }
 0x452   : > { %11597 = vmatmul.mubr.msk.f32.vlgmr.msra.gmra.mrb[6].mxu0 %vm295_vm1, %v11595_v37 }
 0x453   : > { %6557 = vmatpush1.msra.mxu0 %v12755_v27  ;;  %6620 = vmatprep.mubr.f32.mxu0 %v12051_v0 }
 0x454   : > { %6638 = vmatprep.subr.mxu0 %v12817_v62 }
 0x456   : > { %11598 = vmatmul.mubr.msk.f32.vlgmr.msra.gmra.mrb[8].mxu0 %vm295_vm1, %v11595_v37 }
 0x457   : > { %6639 = vmatpush1.msra.mxu0 %v12797_v50  ;;  %6702 = vmatprep.mubr.f32.mxu0 %v12051_v0 }
 0x458   : > { %6709 = vmatprep.subr.mxu0 %v12826_v15 }
 0x45a   : > { %11600 = vmatmul.mubr.msk.f32.vlgmr.msra.gmra.mrb[4].mxu0 %vm295_vm1, %v11599_v13 }
 0x45b   : > { %6710 = vmatpush1.msra.mxu0 %v12812_v61  ;;  %6773 = vmatprep.mubr.f32.mxu0 %v12051_v0 }
 0x45c   : > { %6780 = vmatprep.subr.mxu0 %v12803_v53 }
 0x45e   : > { %11601 = vmatmul.mubr.msk.f32.vlgmr.msra.gmra.mrb[6].mxu0 %vm295_vm1, %v11599_v13 }
 0x45f   : > { %6781 = vmatpush1.msra.mxu0 %v12821_v63  ;;  %6844 = vmatprep.mubr.f32.mxu0 %v12051_v0 }
 0x462   : > { %11602 = vmatmul.mubr.msk.f32.vlgmr.msra.gmra.mrb[8].mxu0 %vm295_vm1, %v11599_v13 }
 0x463   : > { %9262 = vmatprep.mubr.f32.mxu0 %v12051_v0 }
 0x52d   : > { %v6704_v23 = vpop.f32.mrb[4].mxu0 }
 0x52e   : > { %v6864_v25 = vadd.f32 %v6862_v20, %v6704_v23  ;;  %v6706_v27 = vpop.f32.mrb[5].mxu0 }
 0x52f   : > { %v6865_v36 = vadd.f32 %v6862_v20, %v6706_v27 }
 0x530   : > { %v6870_v40 = vmax.f32 %v6864_v25, 0.0 }
 0x531   : > { %v6871_v44 = vmax.f32 %v6865_v36, 0.0  ;;  %v6775_v45 = vpop.f32.mrb[6].mxu0 }
 0x532   : > { %v6876_v46 = vadd.f32 %v6870_v40, %v12679_v58  ;;  %v6866_v49 = vadd.f32 %v6862_v20, %v6775_v45  ;;  %v6777_v50 = vpop.f32.mrb[7].mxu0 }
 0x533   : > { %v6877_v52 = vadd.f32 %v6871_v44, %v12682_v60  ;;  %v6867_v59 = vadd.f32 %v6862_v20, %v6777_v50  ;;  %v11612_v50 = vld [vmem:[%s13451_s2 + $0xe8] sm:$0xff] }
 0x534   : > { %v12925_v53 = vmul.f32 %v6876_v46, %v12408_v7  ;;  %v6872_v54 = vmax.f32 %v6866_v49, 0.0 }
 0x535   : > { %v12928_v57 = vmul.f32 %v6877_v52, %v12411_v11  ;;  %v6846_v61 = vpop.f32.mrb[8].mxu0  ;;  %v6873_v8 = vmax.f32 %v6867_v59, 0.0 }
 0x536   : > { %v6878_v62 = vadd.f32 %v6872_v54, %v12688_v24  ;;  %v6868_v63 = vadd.f32 %v6862_v20, %v6846_v61  ;;  %v6848_v4 = vpop.f32.mrb[9].mxu0  ;;  %6925 = vrot.lane.b32.xlu0 %v12925_v53, %s12058_s12 }
 0x537   : > { %v6869_v58 = vadd.f32 %v6862_v20, %v6848_v4  ;;  %6927 = vrot.lane.b32.xlu1 %v12928_v57, %s12058_s12  ;;  %v6879_v3 = vadd.f32 %v6873_v8, %v12703_v12 }
 0x538   : > { %v12936_v60 = vmul.f32 %v6878_v62, %v12426_v26  ;;  %v6874_v15 = vmax.f32 %v6868_v63, 0.0 }
 0x539   : > { %v6875_v2 = vmax.f32 %v6869_v58, 0.0 }
 0x53a   : > { %v6880_v1 = vadd.f32 %v6874_v15, %v12694_v33  ;;  %v12954_v33 = vmul.f32 %v6879_v3, %v12431_v29 }
 0x53b   : > { %v6881_v6 = vadd.f32 %v6875_v2, %v12698_v10  ;;  %6929 = vrot.lane.b32.xlu1 %v12936_v60, %s12058_s12  ;;  %v11640_v10 = vld [vmem:[%s13452_s3 + $0x18] sm:$0xff] }
 0x53c   : > { %v12943_v24 = vmul.f32 %v6880_v1, %v12437_v31 }
 0x53d   : > { %v12947_v5 = vmul.f32 %v6881_v6, %v12417_v18  ;;  %v11616_v6 = vld [vmem:[%s13451_s2 + $0xf0] sm:$0xff] }
 0x53f   : > { %6933 = vrot.lane.b32.xlu1 %v12943_v24, %s12058_s12  ;;  %6922 = vrot.lane.b32.xlu0 %v12947_v5, %s12058_s12 }
 0x543   : > { %6899 = vrot.lane.b32.xlu1 %v12928_v57, %s12066_s27  ;;  %6931 = vrot.lane.b32.xlu0 %v12954_v33, %s12058_s12 }
 0x547   : > { %6901 = vrot.lane.b32.xlu1 %v12936_v60, %s12066_s27  ;;  %6897 = vrot.lane.b32.xlu0 %v12925_v53, %s12066_s27 }
 0x54b   : > { %6905 = vrot.lane.b32.xlu1 %v12943_v24, %s12066_s27  ;;  %6889 = vrot.lane.b32.xlu0 %v12947_v5, %s12066_s27 }
 0x54f   : > { %7386 = vrot.lane.b32.xlu1 %v12928_v57, %s12067_s28  ;;  %6903 = vrot.lane.b32.xlu0 %v12954_v33, %s12066_s27 }
 0x553   : > { %7388 = vrot.lane.b32.xlu1 %v12936_v60, %s12067_s28  ;;  %7384 = vrot.lane.b32.xlu0 %v12925_v53, %s12067_s28 }
 0x557   : > { %7392 = vrot.lane.b32.xlu1 %v12943_v24, %s12067_s28  ;;  %7381 = vrot.lane.b32.xlu0 %v12947_v5, %s12067_s28 }
 0x55b   : > { %7636 = vrot.lane.b32.xlu1 %v12928_v57, %s12068_s29  ;;  %7390 = vrot.lane.b32.xlu0 %v12954_v33, %s12067_s28 }
 0x55f   : > { %7638 = vrot.lane.b32.xlu1 %v12936_v60, %s12068_s29  ;;  %7634 = vrot.lane.b32.xlu0 %v12925_v53, %s12068_s29 }
 0x563   : > { %7642 = vrot.lane.b32.xlu1 %v12943_v24, %s12068_s29  ;;  %7631 = vrot.lane.b32.xlu0 %v12947_v5, %s12068_s29 }
 0x567   : > { %8109 = vrot.lane.b32.xlu1 %v12936_v60, %s12069_s30  ;;  %7640 = vrot.lane.b32.xlu0 %v12954_v33, %s12068_s29 }
 0x56b   : > { %8111 = vrot.lane.b32.xlu1 %v12954_v33, %s12069_s30  ;;  %8107 = vrot.lane.b32.xlu0 %v12928_v57, %s12069_s30 }
 0x56f   : > { %8115 = vrot.lane.b32.xlu1 %v12947_v5, %s12069_s30  ;;  %8105 = vrot.lane.b32.xlu0 %v12925_v53, %s12069_s30 }
 0x573   : > { %8359 = vrot.lane.b32.xlu1 %v12936_v60, %s12070_s5  ;;  %8113 = vrot.lane.b32.xlu0 %v12943_v24, %s12069_s30  ;;  %s12073_s30 = smov [#allocation2]  }
 0x577   : > { %8361 = vrot.lane.b32.xlu1 %v12954_v33, %s12070_s5  ;;  %8357 = vrot.lane.b32.xlu0 %v12928_v57, %s12070_s5 }
 0x57b   : > { %8365 = vrot.lane.b32.xlu1 %v12947_v5, %s12070_s5  ;;  %8355 = vrot.lane.b32.xlu0 %v12925_v53, %s12070_s5 }
 0x57f   : > { %8609 = vrot.lane.b32.xlu1 %v12936_v60, %s12052_s6  ;;  %8363 = vrot.lane.b32.xlu0 %v12943_v24, %s12070_s5  ;;  %s11991_s5 = sshll.u32 %s12073_s30, 4  ;;  %s11992_s5 = int_to_ptr.vmem [resolvable:$false] %s11991_s5 }
 0x583   : > { %8611 = vrot.lane.b32.xlu1 %v12954_v33, %s12052_s6  ;;  %8607 = vrot.lane.b32.xlu0 %v12928_v57, %s12052_s6 }
 0x587   : > { %8615 = vrot.lane.b32.xlu1 %v12947_v5, %s12052_s6  ;;  %8605 = vrot.lane.b32.xlu0 %v12925_v53, %s12052_s6 }
 0x58b   : > { %8858 = vrot.lane.b32.xlu1 %v12936_v60, %s12071_s14  ;;  %8613 = vrot.lane.b32.xlu0 %v12943_v24, %s12052_s6 }
 0x58f   : > { %8860 = vrot.lane.b32.xlu1 %v12954_v33, %s12071_s14  ;;  %8856 = vrot.lane.b32.xlu0 %v12928_v57, %s12071_s14 }
 0x593   : > { %8864 = vrot.lane.b32.xlu1 %v12947_v5, %s12071_s14  ;;  %8854 = vrot.lane.b32.xlu0 %v12925_v53, %s12071_s14 }
 0x597   : > { %8862 = vrot.lane.b32.xlu0 %v12943_v24, %s12071_s14  ;;  %s11993_s14 = scalar_lea.vmem %s11992_s5, 192 }
 0x59b   : > { %9108 = vperm.xlu0 %11985, %v11640_v10  }
 0x5a8   : > { %v6926_v12 = vpop.permute.xlu0 %6925 }
 0x5a9   : > { %v6928_v9 = vpop.permute.xlu1 %6927 }
 0x5aa   : > { %v6935_v28 = vsel %vm1964_vm7, %v6926_v12, %v6928_v9 }
 0x5ab   : > { %6952 = vmatprep.subr.mxu1 %v6935_v28 }
 0x5ad   : > { %v6930_v34 = vpop.permute.xlu1 %6929 }
 0x5ae   : > { %v6936_v30 = vsel %vm1964_vm7, %v6928_v9, %v6930_v34 }
 0x5b1   : > { %v6934_v35 = vpop.permute.xlu1 %6933  ;;  %v6923_v14 = vpop.permute.xlu0 %6922 }
 0x5b2   : > { %v6946_v17 = vsel %vm1964_vm7, %v6923_v14, %v6926_v12  ;;  %v6939_v32 = vsel %vm1964_vm7, %v6934_v35, %v6923_v14 }
 0x5b3   : > { %6953 = vmatpush1.msra.mxu1 %v6946_v17 }
 0x5b4   : > { %11606 = vmatmul.mubr.msk.f32.vlgmr.msra.gmra.mrb[12].mxu1 %vm295_vm1, %v11605_v16 }
 0x5b5   : > { %v6900_v19 = vpop.permute.xlu1 %6899  ;;  %v6932_v21 = vpop.permute.xlu0 %6931  ;;  %7087 = vmatprep.mubr.f32.mxu1 %v12051_v0 }
 0x5b6   : > { %v6937_v22 = vsel %vm1964_vm7, %v6930_v34, %v6932_v21  ;;  %v6938_v38 = vsel %vm1964_vm7, %v6932_v21, %v6934_v35 }
 0x5b7   : > { %7023 = vmatprep.subr.mxu1 %v6937_v22 }
 0x5b8   : > { %7024 = vmatpush1.msra.mxu1 %v6936_v30 }
 0x5b9   : > { %v6902_v39 = vpop.permute.xlu1 %6901  ;;  %11607 = vmatmul.mubr.msk.f32.vlgmr.msra.gmra.mrb[14].mxu1 %vm295_vm1, %v11605_v16  ;;  %7094 = vmatprep.subr.mxu1 %v6939_v32  ;;  %v6898_v41 = vpop.permute.xlu0 %6897 }
 0x5ba   : > { %7095 = vmatpush1.msra.mxu1 %v6938_v38  ;;  %v6908_v42 = vsel %vm6907_vm14, %v6898_v41, %v6900_v19  ;;  %7158 = vmatprep.mubr.f32.mxu1 %v12051_v0  ;;  %v6909_v23 = vsel %vm6907_vm14, %v6900_v19, %v6902_v39  ;;  %v11620_v19 = vld [vmem:[%s13451_s2 + $0xf8] sm:$0xff] }
 0x5bb   : > { %7168 = vmatprep.subr.mxu1 %v6908_v42 }
 0x5bd   : > { %v6906_v43 = vpop.permute.xlu1 %6905  ;;  %11608 = vmatmul.mubr.msk.f32.vlgmr.msra.gmra.mrb[16].mxu1 %vm295_vm1, %v11605_v16  ;;  %v6890_v47 = vpop.permute.xlu0 %6889 }
 0x5be   : > { %v6919_v48 = vsel %vm6907_vm14, %v6890_v47, %v6898_v41  ;;  %7232 = vmatprep.mubr.f32.mxu1 %v12051_v0  ;;  %v6912_v25 = vsel %vm6907_vm14, %v6906_v43, %v6890_v47 }
 0x5bf   : > { %7169 = vmatpush1.msra.mxu1 %v6919_v48 }
 0x5c1   : > { %v7387_v37 = vpop.permute.xlu1 %7386  ;;  %11609 = vmatmul.mubr.msk.f32.vlgmr.msra.gmra.mrb[12].mxu1 %vm295_vm1, %v11604_v51  ;;  %v6904_v13 = vpop.permute.xlu0 %6903 }
 0x5c2   : > { %v6910_v20 = vsel %vm6907_vm14, %v6902_v39, %v6904_v13  ;;  %7303 = vmatprep.mubr.f32.mxu1 %v12051_v0  ;;  %v6911_v27 = vsel %vm6907_vm14, %v6904_v13, %v6906_v43  ;;  %v11624_v43 = vld [vmem:[%s13451_s2 + $0x100] sm:$0xff] }
 0x5c3   : > { %7239 = vmatprep.subr.mxu1 %v6910_v20 }
 0x5c4   : > { %7240 = vmatpush1.msra.mxu1 %v6909_v23 }
 0x5c5   : > { %v7389_v36 = vpop.permute.xlu1 %7388  ;;  %11610 = vmatmul.mubr.msk.f32.vlgmr.msra.gmra.mrb[14].mxu1 %vm295_vm1, %v11604_v51  ;;  %7310 = vmatprep.subr.mxu1 %v6912_v25  ;;  %v7385_v40 = vpop.permute.xlu0 %7384 }
 0x5c6   : > { %7311 = vmatpush1.msra.mxu1 %v6911_v27  ;;  %v7395_v44 = vsel %vm7394_vm15, %v7385_v40, %v7387_v37  ;;  %7374 = vmatprep.mubr.f32.mxu1 %v12051_v0  ;;  %v7396_v61 = vsel %vm7394_vm15, %v7387_v37, %v7389_v36 }
 0x5c7   : > { %7412 = vmatprep.subr.mxu1 %v7395_v44  ;;  %v11628_v44 = vld [vmem:[%s13451_s2 + $0x108] sm:$0xff] }
 0x5c9   : > { %v7393_v45 = vpop.permute.xlu1 %7392  ;;  %11611 = vmatmul.mubr.msk.f32.vlgmr.msra.gmra.mrb[16].mxu1 %vm295_vm1, %v11604_v51  ;;  %v7382_v46 = vpop.permute.xlu0 %7381 }
 0x5ca   : > { %v7406_v49 = vsel %vm7394_vm15, %v7382_v46, %v7385_v40  ;;  %7476 = vmatprep.mubr.f32.mxu1 %v12051_v0  ;;  %v7399_v62 = vsel %vm7394_vm15, %v7393_v45, %v7382_v46 }
 0x5cb   : > { %7413 = vmatpush1.msra.mxu1 %v7406_v49 }
 0x5cd   : > { %v7637_v52 = vpop.permute.xlu1 %7636  ;;  %11613 = vmatmul.mubr.msk.f32.vlgmr.msra.gmra.mrb[12].mxu1 %vm295_vm1, %v11612_v50  ;;  %v7391_v54 = vpop.permute.xlu0 %7390 }
 0x5ce   : > { %v7397_v59 = vsel %vm7394_vm15, %v7389_v36, %v7391_v54  ;;  %7547 = vmatprep.mubr.f32.mxu1 %v12051_v0  ;;  %v7398_v63 = vsel %vm7394_vm15, %v7391_v54, %v7393_v45 }
 0x5cf   : > { %7483 = vmatprep.subr.mxu1 %v7397_v59 }
 0x5d0   : > { %7484 = vmatpush1.msra.mxu1 %v7396_v61 }
 0x5d1   : > { %v7639_v4 = vpop.permute.xlu1 %7638  ;;  %11614 = vmatmul.mubr.msk.f32.vlgmr.msra.gmra.mrb[14].mxu1 %vm295_vm1, %v11612_v50  ;;  %7554 = vmatprep.subr.mxu1 %v7399_v62  ;;  %v7635_v58 = vpop.permute.xlu0 %7634 }
 0x5d2   : > { %7555 = vmatpush1.msra.mxu1 %v7398_v63  ;;  %v7645_v15 = vsel %vm7644_vm9, %v7635_v58, %v7637_v52  ;;  %7618 = vmatprep.mubr.f32.mxu1 %v12051_v0  ;;  %v7646_v9 = vsel %vm7644_vm9, %v7637_v52, %v7639_v4 }
 0x5d3   : > { %7662 = vmatprep.subr.mxu1 %v7645_v15 }
 0x5d5   : > { %v7643_v8 = vpop.permute.xlu1 %7642  ;;  %11615 = vmatmul.mubr.msk.f32.vlgmr.msra.gmra.mrb[16].mxu1 %vm295_vm1, %v11612_v50  ;;  %v7632_v2 = vpop.permute.xlu0 %7631 }
 0x5d6   : > { %v7656_v1 = vsel %vm7644_vm9, %v7632_v2, %v7635_v58  ;;  %7726 = vmatprep.mubr.f32.mxu1 %v12051_v0  ;;  %v7649_v28 = vsel %vm7644_vm9, %v7643_v8, %v7632_v2 }
 0x5d7   : > { %7663 = vmatpush1.msra.mxu1 %v7656_v1 }
 0x5d9   : > { %v8110_v3 = vpop.permute.xlu1 %8109  ;;  %11617 = vmatmul.mubr.msk.f32.vlgmr.msra.gmra.mrb[12].mxu1 %vm295_vm1, %v11616_v6  ;;  %v7641_v10 = vpop.permute.xlu0 %7640 }
 0x5da   : > { %v7647_v12 = vsel %vm7644_vm9, %v7639_v4, %v7641_v10  ;;  %7797 = vmatprep.mubr.f32.mxu1 %v12051_v0  ;;  %v7648_v34 = vsel %vm7644_vm9, %v7641_v10, %v7643_v8  ;;  %v11632_v4 = vld [vmem:[%s13451_s2 + $0x110] sm:$0xff] }
 0x5db   : > { %7733 = vmatprep.subr.mxu1 %v7647_v12 }
 0x5dc   : > { %7734 = vmatpush1.msra.mxu1 %v7646_v9 }
 0x5dd   : > { %v8112_v35 = vpop.permute.xlu1 %8111  ;;  %11618 = vmatmul.mubr.msk.f32.vlgmr.msra.gmra.mrb[14].mxu1 %vm295_vm1, %v11616_v6  ;;  %7804 = vmatprep.subr.mxu1 %v7649_v28  ;;  %v8108_v14 = vpop.permute.xlu0 %8107  ;;  %v11636_v28 = vld [vmem:[%s13451_s2 + $0x118] sm:$0xff] }
 0x5de   : > { %7805 = vmatpush1.msra.mxu1 %v7648_v34  ;;  %7868 = vmatprep.mubr.f32.mxu1 %v12051_v0  ;;  %v8119_v38 = vsel %vm8117_vm10, %v8108_v14, %v8110_v3  ;;  %v8120_v48 = vsel %vm8117_vm10, %v8110_v3, %v8112_v35 }
 0x5df   : > { %7886 = vmatprep.subr.mxu1 %v12928_v57 }
 0x5e1   : > { %v8116_v16 = vpop.permute.xlu1 %8115  ;;  %11619 = vmatmul.mubr.msk.f32.vlgmr.msra.gmra.mrb[16].mxu1 %vm295_vm1, %v11616_v6  ;;  %v8106_v17 = vpop.permute.xlu0 %8105 }
 0x5e2   : > { %7887 = vmatpush1.msra.mxu1 %v12925_v53  ;;  %7950 = vmatprep.mubr.f32.mxu1 %v12051_v0  ;;  %v8118_v39 = vsel %vm8117_vm10, %v8106_v17, %v8108_v14  ;;  %v8130_v37 = vsel %vm8117_vm10, %v8116_v16, %v8106_v17 }
 0x5e3   : > { %7957 = vmatprep.subr.mxu1 %v12954_v33 }
 0x5e5   : > { %v8360_v21 = vpop.permute.xlu1 %8359  ;;  %11621 = vmatmul.mubr.msk.f32.vlgmr.msra.gmra.mrb[12].mxu1 %vm295_vm1, %v11620_v19  ;;  %v8114_v22 = vpop.permute.xlu0 %8113 }
 0x5e6   : > { %7958 = vmatpush1.msra.mxu1 %v12936_v60  ;;  %8021 = vmatprep.mubr.f32.mxu1 %v12051_v0  ;;  %v8121_v42 = vsel %vm8117_vm10, %v8112_v35, %v8114_v22  ;;  %v8122_v13 = vsel %vm8117_vm10, %v8114_v22, %v8116_v16 }
 0x5e7   : > { %8028 = vmatprep.subr.mxu1 %v12947_v5 }
 0x5e9   : > { %v8362_v30 = vpop.permute.xlu1 %8361  ;;  %11622 = vmatmul.mubr.msk.f32.vlgmr.msra.gmra.mrb[14].mxu1 %vm295_vm1, %v11620_v19  ;;  %v8358_v32 = vpop.permute.xlu0 %8357 }
 0x5ea   : > { %8029 = vmatpush1.msra.mxu1 %v12943_v24  ;;  %8092 = vmatprep.mubr.f32.mxu1 %v12051_v0  ;;  %v8369_v25 = vsel %vm8367_vm11, %v8358_v32, %v8360_v21  ;;  %v8370_v46 = vsel %vm8367_vm11, %v8360_v21, %v8362_v30 }
 0x5eb   : > { %8136 = vmatprep.subr.mxu1 %v8119_v38 }
 0x5ed   : > { %11623 = vmatmul.mubr.msk.f32.vlgmr.msra.gmra.mrb[16].mxu1 %vm295_vm1, %v11620_v19  ;;  %v8356_v41 = vpop.permute.xlu0 %8355  ;;  %v8366_v47 = vpop.permute.xlu1 %8365 }
 0x5ee   : > { %8137 = vmatpush1.msra.mxu1 %v8118_v39  ;;  %8200 = vmatprep.mubr.f32.mxu1 %v12051_v0  ;;  %v8368_v27 = vsel %vm8367_vm11, %v8356_v41, %v8358_v32  ;;  %v8380_v50 = vsel %vm8367_vm11, %v8366_v47, %v8356_v41 }
 0x5ef   : > { %8207 = vmatprep.subr.mxu1 %v8121_v42 }
 0x5f1   : > { %11625 = vmatmul.mubr.msk.f32.vlgmr.msra.gmra.mrb[12].mxu1 %vm295_vm1, %v11624_v43  ;;  %v8364_v51 = vpop.permute.xlu0 %8363  ;;  %v8610_v20 = vpop.permute.xlu1 %8609 }
 0x5f2   : > { %8208 = vmatpush1.msra.mxu1 %v8120_v48  ;;  %8271 = vmatprep.mubr.f32.mxu1 %v12051_v0  ;;  %v8371_v40 = vsel %vm8367_vm11, %v8362_v30, %v8364_v51  ;;  %v8372_v52 = vsel %vm8367_vm11, %v8364_v51, %v8366_v47 }
 0x5f3   : > { %8278 = vmatprep.subr.mxu1 %v8130_v37 }
 0x5f5   : > { %11626 = vmatmul.mubr.msk.f32.vlgmr.msra.gmra.mrb[14].mxu1 %vm295_vm1, %v11624_v43  ;;  %v8608_v23 = vpop.permute.xlu0 %8607  ;;  %v8612_v45 = vpop.permute.xlu1 %8611 }
 0x5f6   : > { %8279 = vmatpush1.msra.mxu1 %v8122_v13  ;;  %8342 = vmatprep.mubr.f32.mxu1 %v12051_v0  ;;  %v8618_v59 = vsel %vm280_vm0, %v8608_v23, %v8610_v20  ;;  %v8619_v15 = vsel %vm280_vm0, %v8610_v20, %v8612_v45 }
 0x5f7   : > { %8386 = vmatprep.subr.mxu1 %v8369_v25 }
 0x5f9   : > { %11627 = vmatmul.mubr.msk.f32.vlgmr.msra.gmra.mrb[16].mxu1 %vm295_vm1, %v11624_v43  ;;  %v8606_v36 = vpop.permute.xlu0 %8605  ;;  %v8616_v54 = vpop.permute.xlu1 %8615 }
 0x5fa   : > { %8387 = vmatpush1.msra.mxu1 %v8368_v27  ;;  %8450 = vmatprep.mubr.f32.mxu1 %v12051_v0  ;;  %v8617_v62 = vsel %vm280_vm0, %v8606_v36, %v8608_v23  ;;  %v8629_v2 = vsel %vm280_vm0, %v8616_v54, %v8606_v36 }
 0x5fb   : > { %8457 = vmatprep.subr.mxu1 %v8371_v40 }
 0x5fd   : > { %11629 = vmatmul.mubr.msk.f32.vlgmr.msra.gmra.mrb[12].mxu1 %vm295_vm1, %v11628_v44  ;;  %v8614_v49 = vpop.permute.xlu0 %8613  ;;  %v8859_v58 = vpop.permute.xlu1 %8858 }
 0x5fe   : > { %8458 = vmatpush1.msra.mxu1 %v8370_v46  ;;  %8521 = vmatprep.mubr.f32.mxu1 %v12051_v0  ;;  %v8620_v63 = vsel %vm280_vm0, %v8612_v45, %v8614_v49  ;;  %v8621_v1 = vsel %vm280_vm0, %v8614_v49, %v8616_v54 }
 0x5ff   : > { %8528 = vmatprep.subr.mxu1 %v8380_v50  ;;  %v11642_v50 = vld [vmem:[%s13451_s2 + $0x128] sm:$0xff] }
 0x601   : > { %11630 = vmatmul.mubr.msk.f32.vlgmr.msra.gmra.mrb[14].mxu1 %vm295_vm1, %v11628_v44  ;;  %v8857_v61 = vpop.permute.xlu0 %8856  ;;  %v8861_v6 = vpop.permute.xlu1 %8860 }
 0x602   : > { %8529 = vmatpush1.msra.mxu1 %v8372_v52  ;;  %8592 = vmatprep.mubr.f32.mxu1 %v12051_v0  ;;  %v8868_v3 = vsel %vm8866_vm12, %v8857_v61, %v8859_v58  ;;  %v8869_v35 = vsel %vm8866_vm12, %v8859_v58, %v8861_v6 }
 0x603   : > { %8635 = vmatprep.subr.mxu1 %v8618_v59 }
 0x605   : > { %11631 = vmatmul.mubr.msk.f32.vlgmr.msra.gmra.mrb[16].mxu1 %vm295_vm1, %v11628_v44  ;;  %v8855_v8 = vpop.permute.xlu0 %8854  ;;  %v8865_v34 = vpop.permute.xlu1 %8864 }
 0x606   : > { %8636 = vmatpush1.msra.mxu1 %v8617_v62  ;;  %8699 = vmatprep.mubr.f32.mxu1 %v12051_v0  ;;  %v8867_v12 = vsel %vm8866_vm12, %v8855_v8, %v8857_v61  ;;  %v8879_v14 = vsel %vm8866_vm12, %v8865_v34, %v8855_v8 }
 0x607   : > { %8706 = vmatprep.subr.mxu1 %v8620_v63 }
 0x609   : > { %11633 = vmatmul.mubr.msk.f32.vlgmr.msra.gmra.mrb[12].mxu1 %vm295_vm1, %v11632_v4  ;;  %v8863_v10 = vpop.permute.xlu0 %8862 }
 0x60a   : > { %8707 = vmatpush1.msra.mxu1 %v8619_v15  ;;  %8770 = vmatprep.mubr.f32.mxu1 %v12051_v0  ;;  %v8870_v9 = vsel %vm8866_vm12, %v8861_v6, %v8863_v10  ;;  %v8871_v16 = vsel %vm8866_vm12, %v8863_v10, %v8865_v34 }
 0x60b   : > { %8777 = vmatprep.subr.mxu1 %v8629_v2 }
 0x60d   : > { %11634 = vmatmul.mubr.msk.f32.vlgmr.msra.gmra.mrb[14].mxu1 %vm295_vm1, %v11632_v4 }
 0x60e   : > { %8778 = vmatpush1.msra.mxu1 %v8621_v1  ;;  %8841 = vmatprep.mubr.f32.mxu1 %v12051_v0 }
 0x60f   : > { %8885 = vmatprep.subr.mxu1 %v8868_v3  ;;  %v11641_v3 = vld [vmem:[%s13451_s2 + $0x120] sm:$0xff] }
 0x611   : > { %11635 = vmatmul.mubr.msk.f32.vlgmr.msra.gmra.mrb[16].mxu1 %vm295_vm1, %v11632_v4 }
 0x612   : > { %8886 = vmatpush1.msra.mxu1 %v8867_v12  ;;  %8949 = vmatprep.mubr.f32.mxu1 %v12051_v0 }
 0x613   : > { %8956 = vmatprep.subr.mxu1 %v8870_v9 }
 0x615   : > { %11637 = vmatmul.mubr.msk.f32.vlgmr.msra.gmra.mrb[12].mxu1 %vm295_vm1, %v11636_v28 }
 0x616   : > { %8957 = vmatpush1.msra.mxu1 %v8869_v35  ;;  %9020 = vmatprep.mubr.f32.mxu1 %v12051_v0 }
 0x617   : > { %9027 = vmatprep.subr.mxu1 %v8879_v14 }
 0x619   : > { %11638 = vmatmul.mubr.msk.f32.vlgmr.msra.gmra.mrb[14].mxu1 %vm295_vm1, %v11636_v28 }
 0x61a   : > { %9028 = vmatpush1.msra.mxu1 %v8871_v16  ;;  %9091 = vmatprep.mubr.f32.mxu1 %v12051_v0  ;;  %v9109_v17 = vpop.permute.xlu0 %9108 }
 0x61d   : > { %11639 = vmatmul.mubr.msk.f32.vlgmr.msra.gmra.mrb[16].mxu1 %vm295_vm1, %v11636_v28 }
 0x6e8   : > { %v8951_v19 = vpop.f32.mrb[12].mxu1 }
 0x6e9   : > { %v9111_v21 = vadd.f32 %v9109_v17, %v8951_v19  ;;  %v8953_v22 = vpop.f32.mrb[13].mxu1 }
 0x6ea   : > { %v9112_v30 = vadd.f32 %v9109_v17, %v8953_v22 }
 0x6eb   : > { %v9117_v32 = vmax.f32 %v9111_v21, 0.0 }
 0x6ec   : > { %v9118_v38 = vmax.f32 %v9112_v30, 0.0  ;;  %v9022_v39 = vpop.f32.mrb[14].mxu1  ;;  %v11649_v30 = vld [vmem:[%s13451_s2 + $0x130] sm:$0xff] }
 0x6ed   : > { %v9123_v41 = vadd.f32 %v9117_v32, %v12925_v53  ;;  %v9113_v42 = vadd.f32 %v9109_v17, %v9022_v39  ;;  %v9024_v43 = vpop.f32.mrb[15].mxu1 }
 0x6ee   : > { %v9124_v47 = vadd.f32 %v9118_v38, %v12928_v57  ;;  %v9114_v13 = vadd.f32 %v9109_v17, %v9024_v43 }
 0x6ef   : > { %v13146_v48 = vmul.f32 %v9123_v41, %v12408_v7  ;;  %v9119_v51 = vmax.f32 %v9113_v42, 0.0 }
 0x6f0   : > { %v13149_v37 = vmul.f32 %v9124_v47, %v12411_v11  ;;  %v9093_v20 = vpop.f32.mrb[16].mxu1  ;;  %v9120_v36 = vmax.f32 %v9114_v13, 0.0 }
 0x6f1   : > { %v9125_v23 = vadd.f32 %v9119_v51, %v12936_v60  ;;  %v9115_v25 = vadd.f32 %v9109_v17, %v9093_v20  ;;  %v9095_v27 = vpop.f32.mrb[17].mxu1  ;;  %9171 = vrot.lane.b32.xlu1 %v13146_v48, %s12052_s6 }
 0x6f2   : > { %v9116_v53 = vadd.f32 %v9109_v17, %v9095_v27  ;;  %9173 = vrot.lane.b32.xlu0 %v13149_v37, %s12052_s6  ;;  %v9126_v45 = vadd.f32 %v9120_v36, %v12954_v33  ;;  %v11653_v27 = vld [vmem:[%s13451_s2 + $0x138] sm:$0xff] }
 0x6f3   : > { %v13157_v7 = vmul.f32 %v9125_v23, %v12426_v26  ;;  %v9121_v57 = vmax.f32 %v9115_v25, 0.0 }
 0x6f4   : > { %v9122_v11 = vmax.f32 %v9116_v53, 0.0  ;;  %v13175_v26 = vmul.f32 %v9126_v45, %v12431_v29 }
 0x6f5   : > { %v9127_v40 = vadd.f32 %v9121_v57, %v12943_v24 }
 0x6f6   : > { %v9128_v44 = vadd.f32 %v9122_v11, %v12947_v5  ;;  %9175 = vrot.lane.b32.xlu0 %v13157_v7, %s12052_s6 }
 0x6f7   : > { %v13164_v60 = vmul.f32 %v9127_v40, %v12437_v31 }
 0x6f8   : > { %v13168_v46 = vmul.f32 %v9128_v44, %v12417_v18  ;;  %v11677_v18 = vld [vmem:[%s13452_s3 + $0x20] sm:$0xff] }
 0x6fa   : > { %9179 = vrot.lane.b32.xlu0 %v13164_v60, %s12052_s6  ;;  %9168 = vrot.lane.b32.xlu1 %v13168_v46, %s12052_s6 }
 0x6fe   : > { %9146 = vrot.lane.b32.xlu0 %v13149_v37, %s12053_s7  ;;  %9177 = vrot.lane.b32.xlu1 %v13175_v26, %s12052_s6 }
 0x702   : > { %9148 = vrot.lane.b32.xlu0 %v13157_v7, %s12053_s7  ;;  %9144 = vrot.lane.b32.xlu1 %v13146_v48, %s12053_s7 }
 0x706   : > { %9152 = vrot.lane.b32.xlu0 %v13164_v60, %s12053_s7  ;;  %9136 = vrot.lane.b32.xlu1 %v13168_v46, %s12053_s7 }
 0x70a   : > { %9632 = vrot.lane.b32.xlu0 %v13149_v37, %s12054_s8  ;;  %9150 = vrot.lane.b32.xlu1 %v13175_v26, %s12053_s7 }
 0x70e   : > { %9634 = vrot.lane.b32.xlu0 %v13157_v7, %s12054_s8  ;;  %9630 = vrot.lane.b32.xlu1 %v13146_v48, %s12054_s8 }
 0x712   : > { %9638 = vrot.lane.b32.xlu0 %v13164_v60, %s12054_s8  ;;  %9627 = vrot.lane.b32.xlu1 %v13168_v46, %s12054_s8 }
 0x716   : > { %9881 = vrot.lane.b32.xlu0 %v13149_v37, %s12055_s9  ;;  %9636 = vrot.lane.b32.xlu1 %v13175_v26, %s12054_s8 }
 0x71a   : > { %9883 = vrot.lane.b32.xlu0 %v13157_v7, %s12055_s9  ;;  %9879 = vrot.lane.b32.xlu1 %v13146_v48, %s12055_s9 }
 0x71e   : > { %9887 = vrot.lane.b32.xlu0 %v13164_v60, %s12055_s9  ;;  %9876 = vrot.lane.b32.xlu1 %v13168_v46, %s12055_s9 }
 0x722   : > { %10353 = vrot.lane.b32.xlu0 %v13157_v7, %s12056_s10  ;;  %9885 = vrot.lane.b32.xlu1 %v13175_v26, %s12055_s9  ;;  %s188_s9 = sand.u32 1, %s12041_s16  }
 0x723   : > { %s11417_s29 = scalar_lea.sflag [#allocation3], %s188_s9 }
 0x726   : > { %10355 = vrot.lane.b32.xlu0 %v13175_v26, %s12056_s10  ;;  %10351 = vrot.lane.b32.xlu1 %v13149_v37, %s12056_s10 }
 0x72a   : > { %10359 = vrot.lane.b32.xlu0 %v13168_v46, %s12056_s10  ;;  %10349 = vrot.lane.b32.xlu1 %v13146_v48, %s12056_s10 }
 0x72e   : > { %10602 = vrot.lane.b32.xlu0 %v13157_v7, %s12057_s11  ;;  %10357 = vrot.lane.b32.xlu1 %v13164_v60, %s12056_s10  ;;  %s11921_s10 = smul.u32 6, %s188_s9 }
 0x732   : > { %10604 = vrot.lane.b32.xlu0 %v13175_v26, %s12057_s11  ;;  %10600 = vrot.lane.b32.xlu1 %v13149_v37, %s12057_s11 }
 0x736   : > { %10608 = vrot.lane.b32.xlu0 %v13168_v46, %s12057_s11  ;;  %10598 = vrot.lane.b32.xlu1 %v13146_v48, %s12057_s11 }
 0x73a   : > { %10851 = vrot.lane.b32.xlu0 %v13157_v7, %s12058_s12  ;;  %10606 = vrot.lane.b32.xlu1 %v13164_v60, %s12057_s11  ;;  %s11923_s11 = smul.u32 96, %s12120_s19 }
 0x73c   : > { %s13407_s28 = scalar_lea.hbm %s13453_s4, %s11923_s11 }
 0x73e   : > { %10853 = vrot.lane.b32.xlu0 %v13175_v26, %s12058_s12  ;;  %10849 = vrot.lane.b32.xlu1 %v13149_v37, %s12058_s12 }
 0x742   : > { %10857 = vrot.lane.b32.xlu0 %v13168_v46, %s12058_s12  ;;  %10847 = vrot.lane.b32.xlu1 %v13146_v48, %s12058_s12 }
 0x746   : > { %11100 = vrot.lane.b32.xlu0 %v13157_v7, %s12059_s13  ;;  %10855 = vrot.lane.b32.xlu1 %v13164_v60, %s12058_s12  ;;  %s190_s12 = scalar_lea.vmem [#allocation2], %s11921_s10 }
 0x74a   : > { %11102 = vrot.lane.b32.xlu0 %v13175_v26, %s12059_s13  ;;  %11098 = vrot.lane.b32.xlu1 %v13149_v37, %s12059_s13 }
 0x74e   : > { %11106 = vrot.lane.b32.xlu0 %v13168_v46, %s12059_s13  ;;  %11096 = vrot.lane.b32.xlu1 %v13146_v48, %s12059_s13 }
 0x752   : > { %11104 = vrot.lane.b32.xlu1 %v13164_v60, %s12059_s13  ;;  %s11431_s13 = sshll.u32 %s190_s12, 4  ;;  %s13409_s13 = int_to_ptr.vmem [resolvable:$true] %s11431_s13 }
 0x753   : > { %s11987_s19 = scalar_lea.vmem %s13409_s13, 96  ;;  %p11994_p0 = scmp.lt.s32.totalorder %s13409_s13, %s11992_s5 }
 0x754   : > { %p11988_p11 = scmp.ne.s32.totalorder %s13409_s13, %s11987_s19  ;;  %p11995_p1 = scmp.lt.s32.totalorder %s11993_s14, %s11987_s19 }
 0x756   : > { %11349 = vperm.xlu1 %11986, %v11677_v18   ;;  %p11989_p12 = pnand %p11988_p11, %p12137_p5  ;;  %p11996_p2 = por %p11995_p1, %p11994_p0 }
 0x758   : > { %p11990_p13 = pneg %p11989_p12 }
 0x75a   : > { %p11997_p3 = pnand %p11996_p2, %p11990_p13 }
 0x763   : > { %v9172_v29 = vpop.permute.xlu1 %9171 }
 0x764   : > { %v9174_v31 = vpop.permute.xlu0 %9173 }
 0x765   : > { %v9181_v24 = vsel %vm280_vm0, %v9172_v29, %v9174_v31 }
 0x766   : > { %9198 = vmatprep.subr.mxu0 %v9181_v24  ;;  %v11657_v24 = vld [vmem:[%s13451_s2 + $0x140] sm:$0xff] }
 0x768   : > { %v9176_v5 = vpop.permute.xlu0 %9175 }
 0x769   : > { %v9182_v62 = vsel %vm280_vm0, %v9174_v31, %v9176_v5 }
 0x76c   : > { %v9180_v33 = vpop.permute.xlu0 %9179  ;;  %v9169_v49 = vpop.permute.xlu1 %9168 }
 0x76d   : > { %v9192_v52 = vsel %vm280_vm0, %v9169_v49, %v9172_v29  ;;  %v9185_v63 = vsel %vm280_vm0, %v9180_v33, %v9169_v49 }
 0x76e   : > { %9199 = vmatpush1.msra.mxu0 %v9192_v52 }
 0x76f   : > { %11643 = vmatmul.mubr.msk.f32.vlgmr.msra.gmra.mrb[10].mxu0 %vm295_vm1, %v11642_v50 }
 0x770   : > { %v9147_v54 = vpop.permute.xlu0 %9146  ;;  %v9178_v59 = vpop.permute.xlu1 %9177  ;;  %9333 = vmatprep.mubr.f32.mxu0 %v12051_v0 }
 0x771   : > { %v9183_v61 = vsel %vm280_vm0, %v9176_v5, %v9178_v59  ;;  %v9184_v4 = vsel %vm280_vm0, %v9178_v59, %v9180_v33  ;;  %vm11413_vm0 = vcmp.lt.s32.totalorder %v198_v55, 768 }
 0x772   : > { %9269 = vmatprep.subr.mxu0 %v9183_v61 }
 0x773   : > { %9270 = vmatpush1.msra.mxu0 %v9182_v62 }
 0x774   : > { %v9149_v58 = vpop.permute.xlu0 %9148  ;;  %11644 = vmatmul.mubr.msk.f32.vlgmr.msra.gmra.mrb[12].mxu0 %vm295_vm1, %v11642_v50  ;;  %9340 = vmatprep.subr.mxu0 %v9185_v63  ;;  %v9145_v15 = vpop.permute.xlu1 %9144 }
 0x775   : > { %9341 = vmatpush1.msra.mxu0 %v9184_v4  ;;  %v9154_v8 = vsel %vm253_vm2, %v9145_v15, %v9147_v54  ;;  %9404 = vmatprep.mubr.f32.mxu0 %v12051_v0  ;;  %v9155_v28 = vsel %vm253_vm2, %v9147_v54, %v9149_v58 }
 0x776   : > { %9414 = vmatprep.subr.mxu0 %v9154_v8 }
 0x778   : > { %v9153_v2 = vpop.permute.xlu0 %9152  ;;  %11645 = vmatmul.mubr.msk.f32.vlgmr.msra.gmra.mrb[14].mxu0 %vm295_vm1, %v11642_v50  ;;  %v9137_v1 = vpop.permute.xlu1 %9136 }
 0x779   : > { %v9165_v6 = vsel %vm253_vm2, %v9137_v1, %v9145_v15  ;;  %9478 = vmatprep.mubr.f32.mxu0 %v12051_v0  ;;  %v9158_v34 = vsel %vm253_vm2, %v9153_v2, %v9137_v1 }
 0x77a   : > { %9415 = vmatpush1.msra.mxu0 %v9165_v6 }
 0x77c   : > { %v9633_v10 = vpop.permute.xlu0 %9632  ;;  %11646 = vmatmul.mubr.msk.f32.vlgmr.msra.gmra.mrb[10].mxu0 %vm295_vm1, %v11641_v3  ;;  %v9151_v12 = vpop.permute.xlu1 %9150 }
 0x77d   : > { %v9156_v9 = vsel %vm253_vm2, %v9149_v58, %v9151_v12  ;;  %9549 = vmatprep.mubr.f32.mxu0 %v12051_v0  ;;  %v9157_v35 = vsel %vm253_vm2, %v9151_v12, %v9153_v2  ;;  %v11665_v2 = vld [vmem:[%s13451_s2 + $0x150] sm:$0xff] }
 0x77e   : > { %9485 = vmatprep.subr.mxu0 %v9156_v9 }
 0x77f   : > { %9486 = vmatpush1.msra.mxu0 %v9155_v28 }
 0x780   : > { %v9635_v14 = vpop.permute.xlu0 %9634  ;;  %11647 = vmatmul.mubr.msk.f32.vlgmr.msra.gmra.mrb[12].mxu0 %vm295_vm1, %v11641_v3  ;;  %9556 = vmatprep.subr.mxu0 %v9158_v34  ;;  %v9631_v16 = vpop.permute.xlu1 %9630 }
 0x781   : > { %9557 = vmatpush1.msra.mxu0 %v9157_v35  ;;  %v9640_v17 = vsel %vm741_vm3, %v9631_v16, %v9633_v10  ;;  %9620 = vmatprep.mubr.f32.mxu0 %v12051_v0  ;;  %v9641_v41 = vsel %vm741_vm3, %v9633_v10, %v9635_v14 }
 0x782   : > { %9657 = vmatprep.subr.mxu0 %v9640_v17 }
 0x784   : > { %v9639_v19 = vpop.permute.xlu0 %9638  ;;  %11648 = vmatmul.mubr.msk.f32.vlgmr.msra.gmra.mrb[14].mxu0 %vm295_vm1, %v11641_v3  ;;  %v9628_v21 = vpop.permute.xlu1 %9627 }
 0x785   : > { %v9651_v22 = vsel %vm741_vm3, %v9628_v21, %v9631_v16  ;;  %9721 = vmatprep.mubr.f32.mxu0 %v12051_v0  ;;  %v9644_v42 = vsel %vm741_vm3, %v9639_v19, %v9628_v21  ;;  %v11669_v16 = vld [vmem:[%s13451_s2 + $0x158] sm:$0xff] }
 0x786   : > { %9658 = vmatpush1.msra.mxu0 %v9651_v22 }
 0x788   : > { %v9882_v32 = vpop.permute.xlu0 %9881  ;;  %11650 = vmatmul.mubr.msk.f32.vlgmr.msra.gmra.mrb[10].mxu0 %vm295_vm1, %v11649_v30  ;;  %v9637_v38 = vpop.permute.xlu1 %9636 }
 0x789   : > { %v9642_v39 = vsel %vm741_vm3, %v9635_v14, %v9637_v38  ;;  %9792 = vmatprep.mubr.f32.mxu0 %v12051_v0  ;;  %v9643_v43 = vsel %vm741_vm3, %v9637_v38, %v9639_v19 }
 0x78a   : > { %9728 = vmatprep.subr.mxu0 %v9642_v39 }
 0x78b   : > { %9729 = vmatpush1.msra.mxu0 %v9641_v41 }
 0x78c   : > { %v9884_v47 = vpop.permute.xlu0 %9883  ;;  %11651 = vmatmul.mubr.msk.f32.vlgmr.msra.gmra.mrb[12].mxu0 %vm295_vm1, %v11649_v30  ;;  %9799 = vmatprep.subr.mxu0 %v9644_v42  ;;  %v9880_v51 = vpop.permute.xlu1 %9879 }
 0x78d   : > { %9800 = vmatpush1.msra.mxu0 %v9643_v43  ;;  %v9889_v13 = vsel %vm991_vm4, %v9880_v51, %v9882_v32  ;;  %9863 = vmatprep.mubr.f32.mxu0 %v12051_v0  ;;  %v9890_v11 = vsel %vm991_vm4, %v9882_v32, %v9884_v47  ;;  %v11673_v43 = vld [vmem:[%s13451_s2 + $0x160] sm:$0xff] }
 0x78e   : > { %9906 = vmatprep.subr.mxu0 %v9889_v13 }
 0x790   : > { %v9888_v20 = vpop.permute.xlu0 %9887  ;;  %11652 = vmatmul.mubr.msk.f32.vlgmr.msra.gmra.mrb[14].mxu0 %vm295_vm1, %v11649_v30  ;;  %v9877_v23 = vpop.permute.xlu1 %9876 }
 0x791   : > { %v9900_v25 = vsel %vm991_vm4, %v9877_v23, %v9880_v51  ;;  %9970 = vmatprep.mubr.f32.mxu0 %v12051_v0  ;;  %v9893_v40 = vsel %vm991_vm4, %v9888_v20, %v9877_v23 }
 0x792   : > { %9907 = vmatpush1.msra.mxu0 %v9900_v25 }
 0x794   : > { %v10354_v53 = vpop.permute.xlu0 %10353  ;;  %11654 = vmatmul.mubr.msk.f32.vlgmr.msra.gmra.mrb[10].mxu0 %vm295_vm1, %v11653_v27  ;;  %v9886_v57 = vpop.permute.xlu1 %9885 }
 0x795   : > { %v9891_v36 = vsel %vm991_vm4, %v9884_v47, %v9886_v57  ;;  %10041 = vmatprep.mubr.f32.mxu0 %v12051_v0  ;;  %v9892_v44 = vsel %vm991_vm4, %v9886_v57, %v9888_v20 }
 0x796   : > { %9977 = vmatprep.subr.mxu0 %v9891_v36 }
 0x797   : > { %9978 = vmatpush1.msra.mxu0 %v9890_v11 }
 0x798   : > { %v10356_v45 = vpop.permute.xlu0 %10355  ;;  %11655 = vmatmul.mubr.msk.f32.vlgmr.msra.gmra.mrb[12].mxu0 %vm295_vm1, %v11653_v27  ;;  %10048 = vmatprep.subr.mxu0 %v9893_v40  ;;  %v10352_v18 = vpop.permute.xlu1 %10351 }
 0x799   : > { %10049 = vmatpush1.msra.mxu0 %v9892_v44  ;;  %10112 = vmatprep.mubr.f32.mxu0 %v12051_v0  ;;  %v10362_v49 = vsel %vm1464_vm5, %v10352_v18, %v10354_v53  ;;  %v10363_v52 = vsel %vm1464_vm5, %v10354_v53, %v10356_v45 }
 0x79a   : > { %10130 = vmatprep.subr.mxu0 %v13149_v37 }
 0x79c   : > { %v10360_v29 = vpop.permute.xlu0 %10359  ;;  %11656 = vmatmul.mubr.msk.f32.vlgmr.msra.gmra.mrb[14].mxu0 %vm295_vm1, %v11653_v27  ;;  %v10350_v31 = vpop.permute.xlu1 %10349  ;;  %v12072_v27 = vmov 1966171168  }
 0x79d   : > { %10131 = vmatpush1.msra.mxu0 %v13146_v48  ;;  %10194 = vmatprep.mubr.f32.mxu0 %v12051_v0  ;;  %v10373_v59 = vsel %vm1464_vm5, %v10360_v29, %v10350_v31  ;;  %v11374_v53 = vunpack.c.l.s4 %v12072_v27 }
 0x79e   : > { %10201 = vmatprep.subr.mxu0 %v13175_v26  ;;  %v10361_v26 = vsel %vm1464_vm5, %v10350_v31, %v10352_v18 }
 0x7a0   : > { %v10603_v5 = vpop.permute.xlu0 %10602  ;;  %11658 = vmatmul.mubr.msk.f32.vlgmr.msra.gmra.mrb[10].mxu0 %vm295_vm1, %v11657_v24  ;;  %v10358_v33 = vpop.permute.xlu1 %10357 }
 0x7a1   : > { %10202 = vmatpush1.msra.mxu0 %v13157_v7  ;;  %10265 = vmatprep.mubr.f32.mxu0 %v12051_v0  ;;  %v10364_v50 = vsel %vm1464_vm5, %v10356_v45, %v10358_v33  ;;  %v10365_v61 = vsel %vm1464_vm5, %v10358_v33, %v10360_v29  ;;  %v11375_v45 = vunpack.c.0.s8 %v11374_v53 }
 0x7a2   : > { %10272 = vmatprep.subr.mxu0 %v13168_v46  ;;  %v11661_v46 = vld [vmem:[%s13451_s2 + $0x148] sm:$0xff] }
 0x7a4   : > { %v10605_v37 = vpop.permute.xlu0 %10604  ;;  %11659 = vmatmul.mubr.msk.f32.vlgmr.msra.gmra.mrb[12].mxu0 %vm295_vm1, %v11657_v24  ;;  %v10601_v48 = vpop.permute.xlu1 %10600 }
 0x7a5   : > { %10273 = vmatpush1.msra.mxu0 %v13164_v60  ;;  %10336 = vmatprep.mubr.f32.mxu0 %v12051_v0  ;;  %v10611_v4 = vsel %vm1714_vm6, %v10601_v48, %v10603_v5  ;;  %v10612_v6 = vsel %vm1714_vm6, %v10603_v5, %v10605_v37 }
 0x7a6   : > { %10379 = vmatprep.subr.mxu0 %v10362_v49 }
 0x7a8   : > { %11660 = vmatmul.mubr.msk.f32.vlgmr.msra.gmra.mrb[14].mxu0 %vm295_vm1, %v11657_v24  ;;  %v10599_v7 = vpop.permute.xlu1 %10598  ;;  %v10609_v60 = vpop.permute.xlu0 %10608 }
 0x7a9   : > { %10380 = vmatpush1.msra.mxu0 %v10361_v26  ;;  %10443 = vmatprep.mubr.f32.mxu0 %v12051_v0  ;;  %v10610_v58 = vsel %vm1714_vm6, %v10599_v7, %v10601_v48  ;;  %v10622_v10 = vsel %vm1714_vm6, %v10609_v60, %v10599_v7 }
 0x7aa   : > { %10450 = vmatprep.subr.mxu0 %v10364_v50 }
 0x7ac   : > { %11662 = vmatmul.mubr.msk.f32.vlgmr.msra.gmra.mrb[10].mxu0 %vm295_vm1, %v11661_v46  ;;  %v10607_v54 = vpop.permute.xlu1 %10606  ;;  %v10852_v62 = vpop.permute.xlu0 %10851 }
 0x7ad   : > { %10451 = vmatpush1.msra.mxu0 %v10363_v52  ;;  %10514 = vmatprep.mubr.f32.mxu0 %v12051_v0  ;;  %v10613_v8 = vsel %vm1714_vm6, %v10605_v37, %v10607_v54  ;;  %v10614_v12 = vsel %vm1714_vm6, %v10607_v54, %v10609_v60 }
 0x7ae   : > { %10521 = vmatprep.subr.mxu0 %v10373_v59 }
 0x7b0   : > { %11663 = vmatmul.mubr.msk.f32.vlgmr.msra.gmra.mrb[12].mxu0 %vm295_vm1, %v11661_v46  ;;  %v10850_v63 = vpop.permute.xlu1 %10849  ;;  %v10854_v1 = vpop.permute.xlu0 %10853 }
 0x7b1   : > { %10522 = vmatpush1.msra.mxu0 %v10365_v61  ;;  %10585 = vmatprep.mubr.f32.mxu0 %v12051_v0  ;;  %v10860_v28 = vsel %vm1964_vm7, %v10850_v63, %v10852_v62  ;;  %v10861_v19 = vsel %vm1964_vm7, %v10852_v62, %v10854_v1 }
 0x7b2   : > { %10628 = vmatprep.subr.mxu0 %v10611_v4 }
 0x7b4   : > { %11664 = vmatmul.mubr.msk.f32.vlgmr.msra.gmra.mrb[14].mxu0 %vm295_vm1, %v11661_v46  ;;  %v10848_v15 = vpop.permute.xlu1 %10847  ;;  %v10858_v9 = vpop.permute.xlu0 %10857 }
 0x7b5   : > { %10629 = vmatpush1.msra.mxu0 %v10610_v58  ;;  %10692 = vmatprep.mubr.f32.mxu0 %v12051_v0  ;;  %v10859_v35 = vsel %vm1964_vm7, %v10848_v15, %v10850_v63  ;;  %v10871_v22 = vsel %vm1964_vm7, %v10858_v9, %v10848_v15 }
 0x7b6   : > { %10699 = vmatprep.subr.mxu0 %v10613_v8 }
 0x7b8   : > { %11666 = vmatmul.mubr.msk.f32.vlgmr.msra.gmra.mrb[10].mxu0 %vm295_vm1, %v11665_v2  ;;  %v10856_v3 = vpop.permute.xlu1 %10855  ;;  %v11101_v17 = vpop.permute.xlu0 %11100 }
 0x7b9   : > { %10700 = vmatpush1.msra.mxu0 %v10612_v6  ;;  %10763 = vmatprep.mubr.f32.mxu0 %v12051_v0  ;;  %v10862_v14 = vsel %vm1964_vm7, %v10854_v1, %v10856_v3  ;;  %v10863_v30 = vsel %vm1964_vm7, %v10856_v3, %v10858_v9 }
 0x7ba   : > { %10770 = vmatprep.subr.mxu0 %v10622_v10 }
 0x7bc   : > { %11667 = vmatmul.mubr.msk.f32.vlgmr.msra.gmra.mrb[12].mxu0 %vm295_vm1, %v11665_v2  ;;  %v11099_v34 = vpop.permute.xlu1 %11098  ;;  %v11103_v32 = vpop.permute.xlu0 %11102 }
 0x7bd   : > { %10771 = vmatpush1.msra.mxu0 %v10614_v12  ;;  %10834 = vmatprep.mubr.f32.mxu0 %v12051_v0  ;;  %v11109_v38 = vsel %vm2214_vm8, %v11099_v34, %v11101_v17  ;;  %v11110_v51 = vsel %vm2214_vm8, %v11101_v17, %v11103_v32 }
 0x7be   : > { %10877 = vmatprep.subr.mxu0 %v10860_v28 }
 0x7c0   : > { %11668 = vmatmul.mubr.msk.f32.vlgmr.msra.gmra.mrb[14].mxu0 %vm295_vm1, %v11665_v2  ;;  %v11097_v21 = vpop.permute.xlu1 %11096  ;;  %v11107_v47 = vpop.permute.xlu0 %11106 }
 0x7c1   : > { %10878 = vmatpush1.msra.mxu0 %v10859_v35  ;;  %10941 = vmatprep.mubr.f32.mxu0 %v12051_v0  ;;  %v11108_v41 = vsel %vm2214_vm8, %v11097_v21, %v11099_v34  ;;  %v11120_v13 = vsel %vm2214_vm8, %v11107_v47, %v11097_v21 }
 0x7c2   : > { %10948 = vmatprep.subr.mxu0 %v10862_v14 }
 0x7c4   : > { %11670 = vmatmul.mubr.msk.f32.vlgmr.msra.gmra.mrb[10].mxu0 %vm295_vm1, %v11669_v16  ;;  %v11105_v39 = vpop.permute.xlu1 %11104 }
 0x7c5   : > { %10949 = vmatpush1.msra.mxu0 %v10861_v19  ;;  %11012 = vmatprep.mubr.f32.mxu0 %v12051_v0  ;;  %v11111_v42 = vsel %vm2214_vm8, %v11103_v32, %v11105_v39  ;;  %v11112_v20 = vsel %vm2214_vm8, %v11105_v39, %v11107_v47 }
 0x7c6   : > { %11019 = vmatprep.subr.mxu0 %v10871_v22 }
 0x7c8   : > { %11671 = vmatmul.mubr.msk.f32.vlgmr.msra.gmra.mrb[12].mxu0 %vm295_vm1, %v11669_v16 }
 0x7c9   : > { %11020 = vmatpush1.msra.mxu0 %v10863_v30  ;;  %11083 = vmatprep.mubr.f32.mxu0 %v12051_v0 }
 0x7ca   : > { %11126 = vmatprep.subr.mxu0 %v11109_v38 }
 0x7cc   : > { %11672 = vmatmul.mubr.msk.f32.vlgmr.msra.gmra.mrb[14].mxu0 %vm295_vm1, %v11669_v16 }
 0x7cd   : > { %11127 = vmatpush1.msra.mxu0 %v11108_v41  ;;  %11190 = vmatprep.mubr.f32.mxu0 %v12051_v0 }
 0x7ce   : > { %11197 = vmatprep.subr.mxu0 %v11111_v42 }
 0x7d0   : > { %11674 = vmatmul.mubr.msk.f32.vlgmr.msra.gmra.mrb[10].mxu0 %vm295_vm1, %v11673_v43 }
 0x7d1   : > { %11198 = vmatpush1.msra.mxu0 %v11110_v51  ;;  %11261 = vmatprep.mubr.f32.mxu0 %v12051_v0 }
 0x7d2   : > { %11268 = vmatprep.subr.mxu0 %v11120_v13 }
 0x7d4   : > { %11675 = vmatmul.mubr.msk.f32.vlgmr.msra.gmra.mrb[12].mxu0 %vm295_vm1, %v11673_v43 }
 0x7d5   : > { %11269 = vmatpush1.msra.mxu0 %v11112_v20  ;;  %11332 = vmatprep.mubr.f32.mxu0 %v12051_v0  ;;  %v11350_v23 = vpop.permute.xlu1 %11349  ;;  %v11378_v0 = vsub.s32 %v11375_v45, %v12401_v56 }
 0x7d8   : > { %11676 = vmatmul.mubr.msk.f32.vlgmr.msra.gmra.mrb[14].mxu0 %vm295_vm1, %v11673_v43 }
 0x8a3   : > { %v11192_v25 = vpop.f32.mrb[10].mxu0 }
 0x8a4   : > { %v11352_v57 = vadd.f32 %v11350_v23, %v11192_v25  ;;  %v11194_v36 = vpop.f32.mrb[11].mxu0 }
 0x8a5   : > { %v11353_v11 = vadd.f32 %v11350_v23, %v11194_v36 }
 0x8a6   : > { %v11358_v40 = vmax.f32 %v11352_v57, 0.0 }
 0x8a7   : > { %v11359_v44 = vmax.f32 %v11353_v11, 0.0  ;;  %v11263_v18 = vpop.f32.mrb[12].mxu0 }
 0x8a8   : > { %v11354_v29 = vadd.f32 %v11350_v23, %v11263_v18  ;;  %v11265_v31 = vpop.f32.mrb[13].mxu0 }
 0x8a9   : > { %v11370_v24 = vcombine.low %v11358_v40, %v11359_v44  ;;  %v11355_v5 = vadd.f32 %v11350_v23, %v11265_v31 }
 0x8aa   : > { %v11360_v33 = vmax.f32 %v11354_v29, 0.0 }
 0x8ab   : > { %v11361_v37 = vmax.f32 %v11355_v5, 0.0  ;;  %v11334_v48 = vpop.f32.mrb[14].mxu0  ;;  %v11379_v60 = vrot.slane %v11370_v24, %v11378_v0 }
 0x8ac   : > { %v11356_v49 = vadd.f32 %v11350_v23, %v11334_v48  ;;  %v11336_v26 = vpop.f32.mrb[15].mxu0 }
 0x8ad   : > { %v11371_v7 = vcombine.low %v11360_v33, %v11361_v37  ;;  %v11357_v50 = vadd.f32 %v11350_v23, %v11336_v26 }
 0x8ae   : > { %v11362_v46 = vmax.f32 %v11356_v49, 0.0 }
 0x8af   : > { %v11386_v52 = vrot.slane %v11371_v7, %v11378_v0  ;;  %v11363_v54 = vmax.f32 %v11357_v50, 0.0 }
 0x8b1   : > { %v11394_v59 = vcombine.low %v11379_v60, %v11386_v52  ;;  %v11372_v61 = vcombine.low %v11362_v46, %v11363_v54 }
 0x8b3   : > { %v11393_v62 = vrot.slane %v11372_v61, %v11378_v0  ;;  %v11401_v63 = vrot.slane %v11394_v59, %v11378_v0 }
 0x8b5   : > { %v11408_v56 = vrot.slane %v11393_v62, %v11378_v0 }
 0x8b7   : > { %v11409_v4 = vcombine.low %v11401_v63, %v11408_v56 }
 0x8b9   : > { %11415 = vst.msk [vmem:[%s190_s12] sm:$0x3f] %vm11413_vm0, %v11409_v4 }
 0x8ba   : > { %12000 = shalt.err (!%p11997_p3)
}
 0x8bb   : > { %s12001_s20 = scalar_lea.hbm %s13407_s28, 96  ;;  %s12005_s7 = scalar_lea.hbm %s13453_s4, 192 }
 0x8bc   : > { %p12002_p4 = scmp.ne.s32.totalorder %s13407_s28, %s12001_s20  ;;  %p12006_p9 = scmp.lt.u32.totalorder %s13407_s28, %s13453_s4 }
 0x8bd   : > { %p12007_p10 = scmp.lt.u32.totalorder %s12005_s7, %s12001_s20  ;;  %p12009_p12 = scmp.lt.u32.totalorder %s12001_s20, %s13407_s28 }
 0x8be   : > { %p12003_p7 = pnand %p12002_p4, %p12137_p5 }
 0x8bf   : > { %p12008_p11 = por %p12007_p10, %p12006_p9 }
 0x8c0   : > { %p12004_p8 = pneg %p12003_p7 }
 0x8c1   : > { %p12010_p13 = por %p12009_p12, %p12008_p11 }
 0x8c3   : > { %p12011_p0 = pnand %p12010_p13, %p12004_p8 }
 0x8c5   : > { %12014 = shalt.err (!%p12011_p0)
}
 0x8c6   : > { %11924 = dma.vmem_to_hbm [thread:$0]  (%p12137_p5), %s13409_s13, 96, %s13407_s28, %s11417_s29  }
 0x8c7 PF: > { %p11930_p1 = scmp.ge.s32.totalorder %s12049_s18, 2  ;;  %s11443_s10 = sand.u32 1, %s12037_s15  }
 0x8c8   : > { %s11444_s11 = scalar_lea.sflag [#allocation3], %s11443_s10 }
 0x8c9   : > { %p11927_p2 = pnand %p11930_p1, %p12141_p6 }
 0x8cb   : > { %12032 = dma.done.wait (!%p11927_p2), %s11444_s11, 96  }
 0x8cc   : > { %12034 = vsyncadd (!%p11927_p2), %s11444_s11, 4294967200  ;;  %p14_p3 = scmp.ge.s32.totalorder %s12124_s21, 4   ;;  %s13456_s15 = smov %s12041_s16 }
 0x8cd   : > { %s13457_s16 = smov %s12045_s17  ;;  %s13458_s17 = smov %s12135_s24 }
 0x8ce   : > { %s13459_s18 = smov %s12124_s21  ;;  %16 = sbr.rel (!%p14_p3) target bundleno = 3 (0x3), region = 119 }
 0x8d5   :  { %11449 = vsyncpa [#allocation3], 1 }
 0x8d6   :  { %11451 = vsyncpa [#allocation3 + $0x1], 1 }

</bundles_post_ra>
